<compile_context>
chip_gen: v5e
topology: v5e:2x2
jax: 0.10.0
libtpu: 0.0.40
codegen_flags: <defaults>
</compile_context>

<pallas_src>
import functools
import math
import jax
import jax.numpy as jnp
from jax.experimental import pallas as pl
from jax.experimental.pallas import tpu as pltpu

N_NODES = 16
N_EDGES = 32
CIN = 8                      # in_irreps multiplicity (scalars)
CSH = 4                      # sh_irreps multiplicity (scalars)
COUT = 16                    # out_irreps multiplicity (scalars)
COUT_PAD = 128               # lane-dense output width (real lanes: 0..COUT-1)
NEF = 16                     # n_edge_features
HID = 32                     # hidden_features
WNUM = CIN * CSH * COUT      # tp.weight_numel = 512
ALPHA = 1.0 / math.sqrt(CIN * CSH)   # e3nn path normalization (folded into fc2)
BN_EPS = 1e-5

G = 8                        # graphs fused per grid step
GN = G * N_NODES             # 128 node rows per step
GE = G * N_EDGES             # 256 edge rows per step

# edge-slab lane layout: [ edge_attr (NEF) | edge_sh (CSH) | dst | src | 0... ]
LANE_DST = NEF + CSH
LANE_SRC = NEF + CSH + 1
SLAB_W = COUT_PAD


def tpconv_kernel(node_slab_ref, edge_slab_ref, w1_ref, b1_ref, w2_ref, b2_ref,
                  exp_in_ref, exp_sh_ref, contract_ref, bn_mat_ref, out_ref):
    f32 = jnp.float32
    bf16 = jnp.bfloat16

    node_slab = node_slab_ref[...]                 # [GN, 128]; lanes >= CIN are 0
    slab = edge_slab_ref[...]                      # [GE, 128]
    e_attr = slab[:, :NEF]                         # [GE, NEF]
    e_sh = slab[:, NEF:NEF + CSH]                  # [GE, CSH]
    dst_i = slab[:, LANE_DST:LANE_DST + 1].astype(jnp.int32)   # [GE, 1]
    src_i = slab[:, LANE_SRC:LANE_SRC + 1].astype(jnp.int32)   # [GE, 1]

    # ---- fc: Linear -> ReLU -> (Dropout: eval no-op) -> Linear (ALPHA folded)
    h = jnp.dot(e_attr, w1_ref[...], preferred_element_type=f32) + b1_ref[...]
    h = jnp.maximum(h, 0.0)
    tp_w = jnp.dot(h, w2_ref[...], preferred_element_type=f32) + b2_ref[...]   # [GE, 512]

    # ---- block-diagonal one-hot masks for gather/scatter (exact in bf16) ----
    node_iota = jax.lax.broadcasted_iota(jnp.int32, (GE, GN), 1)
    dst_mask = (node_iota == dst_i).astype(bf16)                        # [GE, GN]
    src_mask = (node_iota == src_i).astype(bf16)                        # [GE, GN]

    # ---- gather node_attr[edge_dst] (un-padded CIN lanes) -------------------
    node_cin = node_slab[:, :CIN].astype(bf16)                          # [GN, CIN]
    x_dst = jnp.dot(dst_mask, node_cin, preferred_element_type=f32)     # [GE, CIN]

    # ---- FullyConnectedTensorProduct, MXU-only lane-dense formulation -------
    #   a[e,k] = x_dst[e, i(k)],  b[e,k] = e_sh[e, s(k)],  k = (i*CSH+s)*COUT+o
    a = jnp.dot(x_dst.astype(bf16), exp_in_ref[...],
                preferred_element_type=f32)                             # [GE, 512]
    b = jnp.dot(e_sh.astype(bf16), exp_sh_ref[...],
                preferred_element_type=f32)                             # [GE, 512]
    prod = a * b * tp_w                                                 # [GE, 512]
    tp = jnp.dot(prod.astype(bf16), contract_ref[...],
                 preferred_element_type=f32)                            # [GE, 128]

    # ---- scatter(tp, edge_src, reduce='mean'); edge count rides in lane COUT
    # (lane COUT of tp is zero by construction -> carries a per-edge "1") ----
    lane = jax.lax.broadcasted_iota(jnp.int32, (1, COUT_PAD), 1)        # [1, 128]
    tp_aug = tp + (lane == COUT).astype(f32)
    ssum = jax.lax.dot_general(src_mask, tp_aug.astype(bf16),
                               dimension_numbers=(((0,), (0,)), ((), ())),
                               preferred_element_type=f32)              # [GN, 128]
    cnt = ssum[:, COUT:COUT + 1]                                        # [GN, 1]
    inv_cnt = pl.reciprocal(jnp.maximum(cnt, 1.0), approx=True)
    valid = (lane < COUT).astype(f32)                                   # [1, 128]
    out = ssum * valid * inv_cnt

    # ---- residual: out + pad(node_attr)  (padded lanes stay zero) -----------
    out = out + node_slab

    # ---- e3nn BatchNorm (scalar irreps, per-graph batch stats, w=1, b=0)
    #      per-graph mean/var via constant block-averaging matmuls ------------
    bn = bn_mat_ref[...]                                                # [GN, GN]
    mean = jnp.dot(bn, out, preferred_element_type=f32)
    cen = out - mean
    var = jnp.dot(bn, cen * cen, preferred_element_type=f32)
    out_ref[...] = (cen * jax.lax.rsqrt(var + BN_EPS)).astype(out_ref.dtype)


@functools.cache
def _constant_matrices():
    """0/1 expansion / contraction / BN-averaging matrices (built once)."""
    k = jnp.arange(WNUM)
    i_of_k = k // (CSH * COUT)          # input-channel index per weight slot
    s_of_k = (k // COUT) % CSH          # sh-channel index per weight slot
    o_of_k = k % COUT                   # output-channel index per weight slot
    exp_in = (jnp.arange(CIN)[:, None] == i_of_k[None, :]).astype(jnp.bfloat16)
    exp_sh = (jnp.arange(CSH)[:, None] == s_of_k[None, :]).astype(jnp.bfloat16)
    # Columns >= COUT are zero -> lane-dense output with zero padding lanes.
    contract = (o_of_k[:, None] == jnp.arange(COUT_PAD)[None, :]).astype(jnp.bfloat16)
    # Per-graph block-averaging matrix: 1/N within each graph's NxN block.
    gidx = jnp.arange(GN) // N_NODES
    bn_mat = (gidx[:, None] == gidx[None, :]).astype(jnp.float32) / N_NODES
    return exp_in, exp_sh, contract, bn_mat


def tensor_product_conv(node_attr, edge_index, edge_attr, edge_sh, params):
    """Batched over B independent graphs (each graph = one module call).

    node_attr [B,N,CIN] f32, edge_index [B,2,E] int32, edge_attr [B,E,NEF] f32,
    edge_sh [B,E,CSH] f32 -> out [B,N,COUT] f32.  G graphs are fused per grid
    step with block-diagonal gather/scatter and per-graph BatchNorm.
    """
    B = node_attr.shape[0]
    assert B % G == 0, "batch must be a multiple of the fused group size G"
    nsteps = B // G
    f32 = jnp.float32

    node_pad = jnp.pad(node_attr.astype(f32),
                       ((0, 0), (0, 0), (0, COUT_PAD - CIN)))
    node_slab = node_pad.reshape(nsteps, GN, COUT_PAD)

    # Pack [edge_attr | edge_sh | dst | src] into ONE lane-dense slab per step;
    # indices are offset by (local graph id)*N to make gather/scatter
    # block-diagonal over the fused graphs.
    offs = ((jnp.arange(B) % G) * N_NODES).astype(f32)[:, None]          # [B,1]
    src_f = edge_index[:, 0, :].astype(f32) + offs                       # [B,E]
    dst_f = edge_index[:, 1, :].astype(f32) + offs                       # [B,E]
    slab = jnp.concatenate(
        [edge_attr.astype(f32), edge_sh.astype(f32),
         dst_f[:, :, None], src_f[:, :, None],
         jnp.zeros((B, N_EDGES, SLAB_W - LANE_SRC - 1), f32)], axis=-1)
    edge_slab = slab.reshape(nsteps, GE, SLAB_W)

    w1, b1, w2, b2 = params
    exp_in, exp_sh, contract, bn_mat = _constant_matrices()

    per_step = lambda i: (i, 0, 0)
    shared = lambda shape: pl.BlockSpec(shape, lambda i: (0, 0))  # VMEM-resident

    out = pl.pallas_call(
        tpconv_kernel,
        out_shape=jax.ShapeDtypeStruct((nsteps, GN, COUT_PAD), f32),
        grid=(nsteps,),
        in_specs=[
            pl.BlockSpec((None, GN, COUT_PAD), per_step),      # node slab
            pl.BlockSpec((None, GE, SLAB_W), per_step),        # packed edge slab
            shared((NEF, HID)),                                # w1
            shared((1, HID)),                                  # b1
            shared((HID, WNUM)),                               # w2 (ALPHA folded)
            shared((1, WNUM)),                                 # b2 (ALPHA folded)
            shared((CIN, WNUM)),                               # exp_in  (bf16)
            shared((CSH, WNUM)),                               # exp_sh  (bf16)
            shared((WNUM, COUT_PAD)),                          # contract (bf16)
            shared((GN, GN)),                                  # bn_mat
        ],
        out_specs=pl.BlockSpec((None, GN, COUT_PAD), per_step),
        compiler_params=pltpu.CompilerParams(
            dimension_semantics=("parallel",)),
    )(node_slab, edge_slab, w1, b1.reshape(1, -1), w2, b2.reshape(1, -1),
      exp_in, exp_sh, contract, bn_mat)

    return out.reshape(B, N_NODES, COUT_PAD)[:, :, :COUT]


def init_params(key):
    k1, k2, k3, k4 = jax.random.split(key, 4)
    w1 = jax.random.normal(k1, (NEF, HID), jnp.float32) / math.sqrt(NEF)
    b1 = jax.random.normal(k2, (HID,), jnp.float32) * 0.01
    w2 = jax.random.normal(k3, (HID, WNUM), jnp.float32) / math.sqrt(HID)
    b2 = jax.random.normal(k4, (WNUM,), jnp.float32) * 0.01
    # Fold e3nn path normalization into the (linear) second fc layer — exact.
    return w1, b1, w2 * ALPHA, b2 * ALPHA


if __name__ == "__main__":
    key = jax.random.PRNGKey(0)
    k_node, k_src, k_dst, k_eattr, k_esh, k_par = jax.random.split(key, 6)

    B = 2 * G   # 16 graphs -> grid=(2,), both v7x TensorCores stay busy
    node_attr = jax.random.normal(k_node, (B, N_NODES, CIN), jnp.float32)
    edge_src = jax.random.randint(k_src, (B, N_EDGES), 0, N_NODES, jnp.int32)
    edge_dst = jax.random.randint(k_dst, (B, N_EDGES), 0, N_NODES, jnp.int32)
    edge_index = jnp.stack([edge_src, edge_dst], axis=1)          # [B, 2, E]
    edge_attr = jax.random.normal(k_eattr, (B, N_EDGES, NEF), jnp.float32)
    edge_sh = jax.random.normal(k_esh, (B, N_EDGES, CSH), jnp.float32)
    params = init_params(k_par)

    out = tensor_product_conv(node_attr, edge_index, edge_attr, edge_sh, params)
    out = jax.block_until_ready(out)
    assert out.shape == (B, N_NODES, COUT) and out.dtype == jnp.float32
    assert bool(jnp.all(jnp.isfinite(out)))
    print("KERNEL_OK")
</pallas_src>

<mosaic_0001>
module attributes {stable_mosaic.version = 11 : i64} {
  func.func @tpconv_kernel(%arg0: i32, %arg1: memref<1x128x128xf32, #tpu.memory_space<vmem>>, %arg2: memref<1x256x128xf32, #tpu.memory_space<vmem>>, %arg3: memref<16x32xf32, #tpu.memory_space<vmem>>, %arg4: memref<1x32xf32, #tpu.memory_space<vmem>>, %arg5: memref<32x512xf32, #tpu.memory_space<vmem>>, %arg6: memref<1x512xf32, #tpu.memory_space<vmem>>, %arg7: memref<8x512xbf16, #tpu.memory_space<vmem>>, %arg8: memref<4x512xbf16, #tpu.memory_space<vmem>>, %arg9: memref<512x128xbf16, #tpu.memory_space<vmem>>, %arg10: memref<128x128xf32, #tpu.memory_space<vmem>>, %arg11: memref<1x128x128xf32, #tpu.memory_space<vmem>>) attributes {dimension_semantics = [#tpu.dimension_semantics<parallel>], iteration_bounds = array<i64: 2>, scalar_prefetch = 0 : i64, scratch_operands = 0 : i64, tpu.core_type = #tpu.core_type<tc>, window_params = [{transform_indices = @transform_0, window_bounds = array<i64: 1, 128, 128>}, {transform_indices = @transform_1, window_bounds = array<i64: 1, 256, 128>}, {pipeline_mode = #tpu.pipeline_mode<synchronous>, transform_indices = @transform_2, window_bounds = array<i64: 16, 32>}, {pipeline_mode = #tpu.pipeline_mode<synchronous>, transform_indices = @transform_3, window_bounds = array<i64: 1, 32>}, {pipeline_mode = #tpu.pipeline_mode<synchronous>, transform_indices = @transform_4, window_bounds = array<i64: 32, 512>}, {pipeline_mode = #tpu.pipeline_mode<synchronous>, transform_indices = @transform_5, window_bounds = array<i64: 1, 512>}, {pipeline_mode = #tpu.pipeline_mode<synchronous>, transform_indices = @transform_6, window_bounds = array<i64: 8, 512>}, {pipeline_mode = #tpu.pipeline_mode<synchronous>, transform_indices = @transform_7, window_bounds = array<i64: 4, 512>}, {pipeline_mode = #tpu.pipeline_mode<synchronous>, transform_indices = @transform_8, window_bounds = array<i64: 512, 128>}, {pipeline_mode = #tpu.pipeline_mode<synchronous>, transform_indices = @transform_9, window_bounds = array<i64: 128, 128>}, {transform_indices = @transform_10, window_bounds = array<i64: 1, 128, 128>}]} {
    %c0 = arith.constant 0 : index
    %c0_0 = arith.constant 0 : index
    %c0_1 = arith.constant 0 : index
    %0 = vector.load %arg1[%c0, %c0_0, %c0_1] : memref<1x128x128xf32, #tpu.memory_space<vmem>>, vector<1x128x128xf32>
    %1 = vector.shape_cast %0 : vector<1x128x128xf32> to vector<128x128xf32>
    %c0_2 = arith.constant 0 : index
    %c0_3 = arith.constant 0 : index
    %c0_4 = arith.constant 0 : index
    %2 = vector.load %arg2[%c0_2, %c0_3, %c0_4] : memref<1x256x128xf32, #tpu.memory_space<vmem>>, vector<1x256x128xf32>
    %3 = vector.shape_cast %2 : vector<1x256x128xf32> to vector<256x128xf32>
    %4 = vector.extract_strided_slice %3 {offsets = [0, 0], sizes = [256, 16], strides = [1, 1]} : vector<256x128xf32> to vector<256x16xf32>
    %5 = vector.extract_strided_slice %3 {offsets = [0, 16], sizes = [256, 4], strides = [1, 1]} : vector<256x128xf32> to vector<256x4xf32>
    %6 = vector.extract_strided_slice %3 {offsets = [0, 20], sizes = [256, 1], strides = [1, 1]} : vector<256x128xf32> to vector<256x1xf32>
    %7 = arith.fptosi %6 : vector<256x1xf32> to vector<256x1xi32>
    %8 = vector.extract_strided_slice %3 {offsets = [0, 21], sizes = [256, 1], strides = [1, 1]} : vector<256x128xf32> to vector<256x1xf32>
    %9 = arith.fptosi %8 : vector<256x1xf32> to vector<256x1xi32>
    %c0_5 = arith.constant 0 : index
    %c0_6 = arith.constant 0 : index
    %10 = vector.load %arg3[%c0_5, %c0_6] : memref<16x32xf32, #tpu.memory_space<vmem>>, vector<16x32xf32>
    %cst = arith.constant dense<0.000000e+00> : vector<256x32xf32>
    %11 = tpu.matmul %4, %10, %cst {dimension_numbers = #tpu.dot_dimension_numbers<[1], [0], [0], [1], [0, 0, 1, 1], [], []>} : vector<256x16xf32>, vector<16x32xf32>, vector<256x32xf32> -> vector<256x32xf32>
    %c0_7 = arith.constant 0 : index
    %c0_8 = arith.constant 0 : index
    %12 = vector.load %arg4[%c0_7, %c0_8] : memref<1x32xf32, #tpu.memory_space<vmem>>, vector<1x32xf32>
    %13 = vector.broadcast %12 : vector<1x32xf32> to vector<256x32xf32>
    %14 = arith.addf %11, %13 : vector<256x32xf32>
    %cst_9 = arith.constant 0.000000e+00 : f32
    %15 = vector.broadcast %cst_9 : f32 to vector<256x32xf32>
    %16 = arith.maximumf %14, %15 : vector<256x32xf32>
    %c0_10 = arith.constant 0 : index
    %c0_11 = arith.constant 0 : index
    %17 = vector.load %arg5[%c0_10, %c0_11] : memref<32x512xf32, #tpu.memory_space<vmem>>, vector<32x512xf32>
    %cst_12 = arith.constant dense<0.000000e+00> : vector<256x512xf32>
    %18 = tpu.matmul %16, %17, %cst_12 {dimension_numbers = #tpu.dot_dimension_numbers<[1], [0], [0], [1], [0, 0, 1, 1], [], []>} : vector<256x32xf32>, vector<32x512xf32>, vector<256x512xf32> -> vector<256x512xf32>
    %c0_13 = arith.constant 0 : index
    %c0_14 = arith.constant 0 : index
    %19 = vector.load %arg6[%c0_13, %c0_14] : memref<1x512xf32, #tpu.memory_space<vmem>>, vector<1x512xf32>
    %20 = vector.broadcast %19 : vector<1x512xf32> to vector<256x512xf32>
    %21 = arith.addf %18, %20 : vector<256x512xf32>
    %22 = tpu.iota {dimensions = array<i32: 1>} : vector<256x128xi32>
    %23 = vector.broadcast %7 : vector<256x1xi32> to vector<256x128xi32>
    %24 = arith.cmpi eq, %22, %23 : vector<256x128xi32>
    %25 = arith.extui %24 : vector<256x128xi1> to vector<256x128xi32>
    %26 = arith.sitofp %25 : vector<256x128xi32> to vector<256x128xf32>
    %27 = arith.truncf %26 : vector<256x128xf32> to vector<256x128xbf16>
    %28 = vector.broadcast %9 : vector<256x1xi32> to vector<256x128xi32>
    %29 = arith.cmpi eq, %22, %28 : vector<256x128xi32>
    %30 = arith.extui %29 : vector<256x128xi1> to vector<256x128xi32>
    %31 = arith.sitofp %30 : vector<256x128xi32> to vector<256x128xf32>
    %32 = arith.truncf %31 : vector<256x128xf32> to vector<256x128xbf16>
    %33 = vector.extract_strided_slice %1 {offsets = [0, 0], sizes = [128, 8], strides = [1, 1]} : vector<128x128xf32> to vector<128x8xf32>
    %34 = arith.truncf %33 : vector<128x8xf32> to vector<128x8xbf16>
    %cst_15 = arith.constant dense<0.000000e+00> : vector<256x8xf32>
    %35 = tpu.matmul %27, %34, %cst_15 {dimension_numbers = #tpu.dot_dimension_numbers<[1], [0], [0], [1], [0, 0, 1, 1], [], []>} : vector<256x128xbf16>, vector<128x8xbf16>, vector<256x8xf32> -> vector<256x8xf32>
    %36 = arith.truncf %35 : vector<256x8xf32> to vector<256x8xbf16>
    %c0_16 = arith.constant 0 : index
    %c0_17 = arith.constant 0 : index
    %37 = vector.load %arg7[%c0_16, %c0_17] : memref<8x512xbf16, #tpu.memory_space<vmem>>, vector<8x512xbf16>
    %cst_18 = arith.constant dense<0.000000e+00> : vector<256x512xf32>
    %38 = tpu.matmul %36, %37, %cst_18 {dimension_numbers = #tpu.dot_dimension_numbers<[1], [0], [0], [1], [0, 0, 1, 1], [], []>} : vector<256x8xbf16>, vector<8x512xbf16>, vector<256x512xf32> -> vector<256x512xf32>
    %39 = arith.truncf %5 : vector<256x4xf32> to vector<256x4xbf16>
    %c0_19 = arith.constant 0 : index
    %c0_20 = arith.constant 0 : index
    %40 = vector.load %arg8[%c0_19, %c0_20] : memref<4x512xbf16, #tpu.memory_space<vmem>>, vector<4x512xbf16>
    %cst_21 = arith.constant dense<0.000000e+00> : vector<256x512xf32>
    %41 = tpu.matmul %39, %40, %cst_21 {dimension_numbers = #tpu.dot_dimension_numbers<[1], [0], [0], [1], [0, 0, 1, 1], [], []>} : vector<256x4xbf16>, vector<4x512xbf16>, vector<256x512xf32> -> vector<256x512xf32>
    %42 = arith.mulf %38, %41 : vector<256x512xf32>
    %43 = arith.mulf %42, %21 : vector<256x512xf32>
    %44 = arith.truncf %43 : vector<256x512xf32> to vector<256x512xbf16>
    %c0_22 = arith.constant 0 : index
    %c0_23 = arith.constant 0 : index
    %45 = vector.load %arg9[%c0_22, %c0_23] : memref<512x128xbf16, #tpu.memory_space<vmem>>, vector<512x128xbf16>
    %cst_24 = arith.constant dense<0.000000e+00> : vector<256x128xf32>
    %46 = tpu.matmul %44, %45, %cst_24 {dimension_numbers = #tpu.dot_dimension_numbers<[1], [0], [0], [1], [0, 0, 1, 1], [], []>} : vector<256x512xbf16>, vector<512x128xbf16>, vector<256x128xf32> -> vector<256x128xf32>
    %47 = tpu.iota {dimensions = array<i32: 1>} : vector<1x128xi32>
    %c16_i32 = arith.constant 16 : i32
    %48 = vector.broadcast %c16_i32 : i32 to vector<1x128xi32>
    %49 = arith.cmpi eq, %47, %48 : vector<1x128xi32>
    %50 = arith.extui %49 : vector<1x128xi1> to vector<1x128xi32>
    %51 = arith.sitofp %50 : vector<1x128xi32> to vector<1x128xf32>
    %52 = vector.broadcast %51 : vector<1x128xf32> to vector<256x128xf32>
    %53 = arith.addf %46, %52 : vector<256x128xf32>
    %54 = arith.truncf %53 : vector<256x128xf32> to vector<256x128xbf16>
    %cst_25 = arith.constant dense<0.000000e+00> : vector<128x128xf32>
    %55 = tpu.matmul %32, %54, %cst_25 {dimension_numbers = #tpu.dot_dimension_numbers<[0], [0], [1], [1], [0, 1, 1, 1], [], []>} : vector<256x128xbf16>, vector<256x128xbf16>, vector<128x128xf32> -> vector<128x128xf32>
    %56 = vector.extract_strided_slice %55 {offsets = [0, 16], sizes = [128, 1], strides = [1, 1]} : vector<128x128xf32> to vector<128x1xf32>
    %cst_26 = arith.constant 1.000000e+00 : f32
    %57 = vector.broadcast %cst_26 : f32 to vector<128x1xf32>
    %58 = arith.maximumf %56, %57 : vector<128x1xf32>
    %59 = tpu.reciprocal %58 {approx = true} : vector<128x1xf32> -> vector<128x1xf32>
    %c16_i32_27 = arith.constant 16 : i32
    %60 = vector.broadcast %c16_i32_27 : i32 to vector<1x128xi32>
    %61 = arith.cmpi slt, %47, %60 : vector<1x128xi32>
    %62 = arith.extui %61 : vector<1x128xi1> to vector<1x128xi32>
    %63 = arith.sitofp %62 : vector<1x128xi32> to vector<1x128xf32>
    %64 = vector.broadcast %63 : vector<1x128xf32> to vector<128x128xf32>
    %65 = arith.mulf %55, %64 : vector<128x128xf32>
    %66 = vector.broadcast %59 : vector<128x1xf32> to vector<128x128xf32>
    %67 = arith.mulf %65, %66 : vector<128x128xf32>
    %68 = arith.addf %67, %1 : vector<128x128xf32>
    %c0_28 = arith.constant 0 : index
    %c0_29 = arith.constant 0 : index
    %69 = vector.load %arg10[%c0_28, %c0_29] : memref<128x128xf32, #tpu.memory_space<vmem>>, vector<128x128xf32>
    %cst_30 = arith.constant dense<0.000000e+00> : vector<128x128xf32>
    %70 = tpu.matmul %69, %68, %cst_30 {dimension_numbers = #tpu.dot_dimension_numbers<[1], [0], [0], [1], [0, 0, 1, 1], [], []>} : vector<128x128xf32>, vector<128x128xf32>, vector<128x128xf32> -> vector<128x128xf32>
    %71 = arith.subf %68, %70 : vector<128x128xf32>
    %72 = arith.mulf %71, %71 : vector<128x128xf32>
    %cst_31 = arith.constant dense<0.000000e+00> : vector<128x128xf32>
    %73 = tpu.matmul %69, %72, %cst_31 {dimension_numbers = #tpu.dot_dimension_numbers<[1], [0], [0], [1], [0, 0, 1, 1], [], []>} : vector<128x128xf32>, vector<128x128xf32>, vector<128x128xf32> -> vector<128x128xf32>
    %cst_32 = arith.constant 9.99999974E-6 : f32
    %74 = vector.broadcast %cst_32 : f32 to vector<128x128xf32>
    %75 = arith.addf %73, %74 : vector<128x128xf32>
    %76 = math.rsqrt %75 : vector<128x128xf32>
    %77 = arith.mulf %71, %76 : vector<128x128xf32>
    %c0_33 = arith.constant 0 : index
    %c0_34 = arith.constant 0 : index
    %c0_35 = arith.constant 0 : index
    %78 = vector.load %arg11[%c0_33, %c0_34, %c0_35] : memref<1x128x128xf32, #tpu.memory_space<vmem>>, vector<1x128x128xf32>
    %79 = vector.shape_cast %78 : vector<1x128x128xf32> to vector<128x128xf32>
    %80 = vector.shape_cast %77 : vector<128x128xf32> to vector<1x128x128xf32>
    tpu.vector_store %arg11[%c0_33, %c0_34, %c0_35], %80 {strides = array<i32>} : memref<1x128x128xf32, #tpu.memory_space<vmem>>, vector<1x128x128xf32>,
    return
  }
  func.func @transform_0(%arg0: i32) -> (i32, i32, i32) {
    %c0_i32 = arith.constant 0 : i32
    %c0_i32_0 = arith.constant 0 : i32
    %c0_i32_1 = arith.constant 0 : i32
    return %arg0, %c0_i32, %c0_i32_0 : i32, i32, i32
  }
  func.func @transform_1(%arg0: i32) -> (i32, i32, i32) {
    %c0_i32 = arith.constant 0 : i32
    %c0_i32_0 = arith.constant 0 : i32
    %c0_i32_1 = arith.constant 0 : i32
    return %arg0, %c0_i32, %c0_i32_0 : i32, i32, i32
  }
  func.func @transform_2(%arg0: i32) -> (i32, i32) {
    %c0_i32 = arith.constant 0 : i32
    %c0_i32_0 = arith.constant 0 : i32
    %c0_i32_1 = arith.constant 0 : i32
    return %c0_i32, %c0_i32_0 : i32, i32
  }
  func.func @transform_3(%arg0: i32) -> (i32, i32) {
    %c0_i32 = arith.constant 0 : i32
    %c0_i32_0 = arith.constant 0 : i32
    %c0_i32_1 = arith.constant 0 : i32
    return %c0_i32, %c0_i32_0 : i32, i32
  }
  func.func @transform_4(%arg0: i32) -> (i32, i32) {
    %c0_i32 = arith.constant 0 : i32
    %c0_i32_0 = arith.constant 0 : i32
    %c0_i32_1 = arith.constant 0 : i32
    return %c0_i32, %c0_i32_0 : i32, i32
  }
  func.func @transform_5(%arg0: i32) -> (i32, i32) {
    %c0_i32 = arith.constant 0 : i32
    %c0_i32_0 = arith.constant 0 : i32
    %c0_i32_1 = arith.constant 0 : i32
    return %c0_i32, %c0_i32_0 : i32, i32
  }
  func.func @transform_6(%arg0: i32) -> (i32, i32) {
    %c0_i32 = arith.constant 0 : i32
    %c0_i32_0 = arith.constant 0 : i32
    %c0_i32_1 = arith.constant 0 : i32
    return %c0_i32, %c0_i32_0 : i32, i32
  }
  func.func @transform_7(%arg0: i32) -> (i32, i32) {
    %c0_i32 = arith.constant 0 : i32
    %c0_i32_0 = arith.constant 0 : i32
    %c0_i32_1 = arith.constant 0 : i32
    return %c0_i32, %c0_i32_0 : i32, i32
  }
  func.func @transform_8(%arg0: i32) -> (i32, i32) {
    %c0_i32 = arith.constant 0 : i32
    %c0_i32_0 = arith.constant 0 : i32
    %c0_i32_1 = arith.constant 0 : i32
    return %c0_i32, %c0_i32_0 : i32, i32
  }
  func.func @transform_9(%arg0: i32) -> (i32, i32) {
    %c0_i32 = arith.constant 0 : i32
    %c0_i32_0 = arith.constant 0 : i32
    %c0_i32_1 = arith.constant 0 : i32
    return %c0_i32, %c0_i32_0 : i32, i32
  }
  func.func @transform_10(%arg0: i32) -> (i32, i32, i32) {
    %c0_i32 = arith.constant 0 : i32
    %c0_i32_0 = arith.constant 0 : i32
    %c0_i32_1 = arith.constant 0 : i32
    return %arg0, %c0_i32, %c0_i32_0 : i32, i32, i32
  }
}

</mosaic_0001>

<bundles_post_ra>
// kernel: tpu_custom_call.1
= control target key start
LH: loop header
LB: loop body
LE: loop exit
PB: predicated region body
PF: predicated region fallthrough
CT: control target
= control target key end

     0   :  { %s9785_s0 = inlined_call_operand.hbm [shape: f32[2,128,128], index: 0, kind: input, shape index: {}]   ;;  %s9786_s1 = inlined_call_operand.hbm [shape: f32[2,256,128], index: 1, kind: input, shape index: {}]   ;;  %s9787_s2 = inlined_call_operand.hbm [shape: f32[16,32], index: 2, kind: input, shape index: {}]   ;;  %s9788_s3 = inlined_call_operand.hbm [shape: f32[1,32], index: 3, kind: input, shape index: {}]   ;;  %s9789_s4 = inlined_call_operand.hbm [shape: f32[32,512], index: 4, kind: input, shape index: {}]   ;;  %s9790_s5 = inlined_call_operand.vmem [shape: f32[1,512], index: 5, kind: input, shape index: {}]   ;;  %s9791_s6 = inlined_call_operand.hbm [shape: bf16[8,512], index: 6, kind: input, shape index: {}]   ;;  %s9792_s7 = inlined_call_operand.hbm [shape: bf16[4,512], index: 7, kind: input, shape index: {}]   ;;  %s9793_s8 = inlined_call_operand.hbm [shape: bf16[512,128], index: 8, kind: input, shape index: {}]   ;;  %s9794_s9 = inlined_call_operand.hbm [shape: f32[128,128], index: 9, kind: input, shape index: {}]   ;;  %s9795_s10 = inlined_call_operand.hbm [shape: f32[2,128,128], index: 10, kind: output, shape index: {}]  }
   0x1   :  { %9893 = sst [smem:[#allocation271_spill]] %s9787_s2 }
   0x2   :  { %9894 = sst [smem:[#allocation272_spill]] %s9788_s3 }
   0x3   :  { %9895 = sst [smem:[#allocation273_spill]] %s9789_s4 }
   0x4   :  { %9896 = sst [smem:[#allocation274_spill]] %s9791_s6 }
   0x5   :  { %9897 = sst [smem:[#allocation275_spill]] %s9792_s7 }
   0x6   :  { %9898 = sst [smem:[#allocation276_spill]] %s9793_s8 }
   0x7   :  { %9899 = sst [smem:[#allocation277_spill]] %s9794_s9 }
   0x8   :  { %15 = vsyncpa [#allocation3], 0 }
   0x9   :  { %17 = vsyncpa [#allocation3 + $0x1], 0 }
   0xa   :  { %18 = vsyncpa [#allocation6], 0 }
   0xb   :  { %20 = vsyncpa [#allocation6 + $0x1], 0 }
   0xc   :  { %21 = vsyncpa [#allocation9], 0 }
   0xd   :  { %22 = vsyncpa [#allocation12], 0 }
   0xe   :  { %23 = vsyncpa [#allocation15], 0 }
   0xf   :  { %24 = vsyncpa [#allocation4], 0 }
  0x10   :  { %26 = vsyncpa [#allocation4 + $0x1], 0  ;;  %s6196_s13 = smov 0   ;;  %s6198_s14 = smov 0  }
  0x11   :  { %s6200_s15 = smov 0   ;;  %s6202_s16 = smov 0  }
  0x12 LB: > { %9900 = sst [smem:[#allocation25_spill]] %s6112_s15  ;;  %s6220_s20 = sadd.s32 4294967295, %s6116_s16   ;;  %s6116_s16 = sphi %s6202_s16, %s10568_s16   ;;  %s6112_s15 = sphi %s6200_s15, %s10565_s15   ;;  %s6108_s14 = sphi %s6198_s14, %s10567_s14   ;;  %s6104_s13 = sphi %s6196_s13, %s10566_s13  }
  0x13   : > { %s9901_s2 = sld [smem:[#allocation271_spill]]  ;;  %p4674_p0 = scmp.ge.s32.totalorder %s6116_s16, 1 }
  0x14   : > { %p53_p1 = scmp.eq.s32.totalorder %s6220_s20, 0  ;;  %p283_p2 = scmp.lt.s32.totalorder %s6116_s16, 3 }
  0x15   : > { %s6118_s22 = smov [#allocation7]   ;;  %s9903_s3 = sld [smem:[#allocation272_spill]] }
  0x16   : > { %p6225_p3 = pnand %p4674_p0, %p283_p2  ;;  %s296_s23 = sshll.u32 %s6118_s22, 4  ;;  %s297_s23 = int_to_ptr.vmem [resolvable:$true] %s296_s23 }
  0x17   : > { %s9905_s6 = sld [smem:[#allocation274_spill]]  ;;  %s6119_s11 = smov [#allocation8]  }
  0x18   : > { %p5536_p4 = pneg %p6225_p3  ;;  %s311_s12 = sshll.u32 %s6119_s11, 4  ;;  %s312_s12 = int_to_ptr.vmem [resolvable:$true] %s311_s12 }
  0x19   : > { %s294_s19 = sshll.u32 %s9901_s2, 4  ;;  %s9796_s17 = smov 128   ;;  %s295_s19 = int_to_ptr.hbm [resolvable:$true] %s294_s19 }
  0x1a   : > { %p6237_p6 = pnand %p5536_p4, %p53_p1  ;;  %s9798_s18 = smov 8  }
  0x1b   : > { %s309_s26 = sshll.u32 %s9903_s3, 4  ;;  %s9906_s8 = sld [smem:[#allocation276_spill]]  ;;  %s310_s26 = int_to_ptr.hbm [resolvable:$true] %s309_s26 }
  0x1c   : > { %5539 = dma.hbm_to_vmem [thread:$0]  (!%p6237_p6), %s295_s19, 256, %s297_s23, [#allocation6], %s9796_s17, %s9796_s17, %s9798_s18  }
  0x1d   : > { %s338_s30 = sshll.u32 %s9905_s6, 4  ;;  %s6122_s28 = smov [#allocation11]   ;;  %s339_s30 = int_to_ptr.hbm [resolvable:$true] %s338_s30 }
  0x1e   : > { %5542 = dma.hbm_to_vmem [thread:$0]  (!%p6237_p6), %s310_s26, 16, %s312_s12, [#allocation9]  }
  0x1f   : > { %s340_s29 = sshll.u32 %s6122_s28, 4  ;;  %s6123_s11 = smov [#allocation14]   ;;  %s341_s29 = int_to_ptr.vmem [resolvable:$true] %s340_s29 }
  0x20   : > { %5548 = dma.hbm_to_vmem [thread:$0]  (!%p6237_p6), %s339_s30, 256, %s341_s29, [#allocation12]  }
  0x21   : > { %s361_s25 = sshll.u32 %s9906_s8, 4  ;;  %s363_s2 = sshll.u32 %s6123_s11, 4  ;;  %s362_s25 = int_to_ptr.hbm [resolvable:$true] %s361_s25  ;;  %s364_s2 = int_to_ptr.vmem [resolvable:$true] %s363_s2 }
  0x22   : > { %s6124_s3 = smov 64   ;;  %s6125_s19 = smov 4  }
  0x23   : > { %5554 = dma.hbm_to_vmem [thread:$0]  (!%p6237_p6), %s362_s25, 4096, %s364_s2, [#allocation15], %s6124_s3, %s6124_s3, %s6125_s19  }
  0x24   : > { %s9907_s4 = sld [smem:[#allocation273_spill]]  ;;  %s6126_s22 = smov [#allocation10]  }
  0x25   : > { %s322_s24 = sshll.u32 %s6126_s22, 4  ;;  %s9908_s7 = sld [smem:[#allocation275_spill]]  ;;  %s323_s24 = int_to_ptr.vmem [resolvable:$true] %s322_s24 }
  0x26   : > { %s6127_s29 = smov 512   ;;  %s6128_s11 = smov 32  }
  0x27   : > { %s6129_s2 = smov [#allocation13]   ;;  %s9909_s9 = sld [smem:[#allocation277_spill]] }
  0x28   : > { %s352_s3 = sshll.u32 %s6129_s2, 4  ;;  %s6130_s23 = smov [#allocation16]   ;;  %s353_s3 = int_to_ptr.vmem [resolvable:$true] %s352_s3 }
  0x29   : > { %s377_s26 = sshll.u32 %s6130_s23, 4  ;;  %s4673_s22 = sadd.s32 4294967294, %s6116_s16   ;;  %s378_s26 = int_to_ptr.vmem [resolvable:$true] %s377_s26 }
  0x2a   : > { %s320_s12 = sshll.u32 %s9907_s4, 4  ;;  %s39_s28 = sadd.s32 1, %s6112_s15  ;;  %s321_s12 = int_to_ptr.hbm [resolvable:$true] %s320_s12 }
  0x2b   : > { %s350_s30 = sshll.u32 %s9908_s7, 4  ;;  %p46_p7 = scmp.ne.s32.totalorder %s6112_s15, %s6108_s14  ;;  %s351_s30 = int_to_ptr.hbm [resolvable:$true] %s350_s30 }
  0x2c   : > { %5545 = dma.hbm_to_vmem [thread:$0]  (!%p6237_p6), %s321_s12, 2048, %s323_s24, [#allocation9], %s6127_s29, %s6127_s29, %s6128_s11  }
  0x2d   : > { %s375_s17 = sshll.u32 %s9909_s9, 4  ;;  %s9910_s12 = smov 128   ;;  %s376_s17 = int_to_ptr.hbm [resolvable:$true] %s375_s17 }
  0x2e   : > { %5551 = dma.hbm_to_vmem [thread:$0]  (!%p6237_p6), %s351_s30, 128, %s353_s3, [#allocation12]  }
  0x2f   : > { %5557 = dma.hbm_to_vmem [thread:$0]  (!%p6237_p6), %s376_s17, 2048, %s378_s26, [#allocation15], %s9910_s12, %s9910_s12, %s9798_s18  }
  0x30   : > { %s6278_s24 = sadd.s32 1, %s6116_s16   ;;  %p47_p9 = scmp.eq.s32.totalorder %s6116_s16, 0 }
  0x31   : > { %s36_s29 = ssub.s32 %s6116_s16, %s6278_s24  ;;  %p52_p10 = scmp.ne.s32.totalorder %s6108_s14, %s6104_s13 }
  0x32   : > { %p37_p8 = scmp.eq.s32.totalorder %s36_s29, 0  ;;  %p270_p11 = scmp.eq.s32.totalorder %s6220_s20, 1 }
  0x33   : > { %p6292_p12 = por %p47_p9, %p46_p7  ;;  %p6298_p13 = por %p53_p1, %p52_p10 }
  0x34   : > { %s6290_s30 = scalar_select %p37_p8, %s6112_s15, %s39_s28  }
  0x35   : > { %p6302_p0 = por %p270_p11, %p46_p7  ;;  %p276_p2 = scmp.eq.s32.totalorder %s4673_s22, 1 }
  0x36   : > { %9911 = sst [smem:[#allocation26_spill]] %s6290_s30  ;;  %p5576_p4 = scmp.lt.s32.totalorder %s6116_s16, 2 }
  0x37   : > { %s6308_s3 = sand.u32 1, %s6112_s15   ;;  %p6310_p6 = por %p276_p2, %p52_p10 }
  0x38   : > { %s4683_s19 = sshll.u32 %s6308_s3, 7  ;;  %s5219_s17 = sshll.u32 %s6116_s16, 7 }
  0x39   : > { %s400_s28 = scalar_lea.hbm %s9785_s0, %s5219_s17  ;;  %s395_s18 = scalar_lea.vmem [#allocation2], %s4683_s19 }
  0x3a   : > { %s401_s29 = sshll.u32 %s400_s28, 4  ;;  %s403_s4 = sshll.u32 %s395_s18, 4  ;;  %s402_s29 = int_to_ptr.hbm [resolvable:$true] %s401_s29  ;;  %s404_s4 = int_to_ptr.vmem [resolvable:$true] %s403_s4 }
  0x3b   : > { %p6321_p7 = pnand %p5576_p4, %p6292_p12  ;;  %s413_s6 = sand.u32 1, %s6116_s16  }
  0x3c   : > { %s4686_s7 = sshll.u32 %s6308_s3, 8  ;;  %s392_s8 = scalar_lea.sflag [#allocation3], %s6308_s3 }
  0x3d   : > { %s5970_s9 = sshra.s32 %s402_s29, 4  ;;  %p5974_p9 = pneg %p6321_p7  ;;  %s5971_s9 = int_to_ptr.hbm [resolvable:$true] %s5970_s9 }
  0x3e   : > { %s5972_s30 = scalar_lea.hbm %s5971_s9, 128  ;;  %s5977_s19 = scalar_lea.hbm %s9785_s0, 256 }
  0x3f   : > { %p5973_p8 = scmp.ne.s32.totalorder %s5971_s9, %s5972_s30  ;;  %p5978_p12 = scmp.lt.s32.totalorder %s5971_s9, %s9785_s0 }
  0x40   : > { %p5979_p2 = scmp.lt.s32.totalorder %s5977_s19, %s5972_s30 }
  0x41   : > { %p5975_p10 = pnand %p5974_p9, %p5973_p8 }
  0x42   : > { %p5980_p4 = por %p5979_p2, %p5978_p12 }
  0x43   : > { %p5976_p11 = pneg %p5975_p10 }
  0x45   : > { %p5981_p5 = pnand %p5980_p4, %p5976_p11 }
  0x47   : > { %5984 = shalt.err (!%p5981_p5)
}
  0x48   : > { %s9917_s3 = smov 8   ;;  %s5220_s26 = sshll.u32 %s6116_s16, 8 }
  0x49   : > { %5561 = dma.hbm_to_vmem [thread:$0]  (!%p6321_p7), %s402_s29, 2048, %s404_s4, %s392_s8, %s9910_s12, %s9910_s12, %s9917_s3  }
  0x4a   : > { %s417_s28 = scalar_lea.vmem [#allocation5], %s4686_s7  ;;  %s422_s17 = scalar_lea.hbm %s9786_s1, %s5220_s26 }
  0x4b   : > { %s425_s18 = sshll.u32 %s417_s28, 4  ;;  %s423_s9 = sshll.u32 %s422_s17, 4  ;;  %s426_s18 = int_to_ptr.vmem [resolvable:$true] %s425_s18  ;;  %s424_s9 = int_to_ptr.hbm [resolvable:$true] %s423_s9 }
  0x4c   : > { %s414_s30 = scalar_lea.sflag [#allocation6], %s413_s6  ;;  %s6000_s19 = sshra.s32 %s424_s9, 4  ;;  %s6001_s19 = int_to_ptr.hbm [resolvable:$true] %s6000_s19 }
  0x4d   : > { %s6002_s23 = scalar_lea.hbm %s6001_s19, 256  ;;  %s6007_s7 = scalar_lea.hbm %s9786_s1, 512 }
  0x4e   : > { %p6003_p5 = scmp.ne.s32.totalorder %s6001_s19, %s6002_s23  ;;  %p6008_p11 = scmp.lt.s32.totalorder %s6001_s19, %s9786_s1 }
  0x4f   : > { %p6009_p12 = scmp.lt.s32.totalorder %s6007_s7, %s6002_s23 }
  0x50   : > { %p6005_p8 = pnand %p6003_p5, %p5974_p9 }
  0x51   : > { %p6010_p2 = por %p6009_p12, %p6008_p11 }
  0x52   : > { %p6006_p10 = pneg %p6005_p8 }
  0x54   : > { %p6011_p4 = pnand %p6010_p2, %p6006_p10 }
  0x56   : > { %6014 = shalt.err (!%p6011_p4)
}
  0x57   : > { %5564 = dma.hbm_to_vmem [thread:$0]  (!%p6321_p7), %s424_s9, 4096, %s426_s18, %s414_s30, %s9910_s12, %s9910_s12, %s9917_s3  }
  0x58   : > { %437 = sbr.rel (%p6225_p3) target bundleno = 2657 (0xa61), region = 60 }
  0x5d   : > { %s6365_s6 = sand.u32 1, %s6108_s14  }
  0x5e   : > { %s4690_s15 = sshll.u32 %s6365_s6, 7  ;;  %s440_s26 = scalar_lea.sflag [#allocation3], %s6365_s6 }
  0x5f   : > { %s6371_s27 = scalar_lea.vmem [#allocation2], %s4690_s15 }
  0x60   : > { %6075 = dma.done.wait (%p6298_p13), %s440_s26, 2048  }
  0x61   : > { %6077 = vsyncadd (%p6298_p13), %s440_s26, 4294965248  ;;  %s449_s21 = sand.u32 1, %s6220_s20   ;;  %s4691_s12 = sshll.u32 %s6365_s6, 8 }
  0x62   : > { %s450_s22 = scalar_lea.sflag [#allocation6], %s449_s21  ;;  %s6379_s3 = scalar_lea.vmem [#allocation5], %s4691_s12 }
  0x63   : > { %6079 = dma.done.wait (%p6298_p13), %s450_s22, 4096  }
  0x64   : > { %6081 = vsyncadd (%p6298_p13), %s450_s22, 4294963200 }
  0x65   : > { %6083 = dma.done.wait (%p53_p1), [#allocation6], 256  }
  0x66   : > { %6085 = vsyncadd (%p53_p1), [#allocation6], 4294967040 }
  0x67   : > { %6087 = dma.done.wait (%p53_p1), [#allocation9], 2064  }
  0x68   : > { %6089 = vsyncadd (%p53_p1), [#allocation9], 4294965232 }
  0x69   : > { %6091 = dma.done.wait (%p53_p1), [#allocation12], 384  }
  0x6a   : > { %6093 = vsyncadd (%p53_p1), [#allocation12], 4294966912 }
  0x6b   : > { %6095 = dma.done.wait (%p53_p1), [#allocation15], 6144  }
  0x6c   : > { %6097 = vsyncadd (%p53_p1), [#allocation15], 4294961152  ;;  %v613_v0 = vld [vmem:[#allocation7 + $0x8] sm:$0xff]  ;;  %v612_v1 = vld [vmem:[#allocation7] sm:$0xff]  ;;  %vm618_vm0 = vcmask 130048   ;;  %vm886_vm1 = vcmask 261120  }
  0x6d   : > { %729 = vmatpush.msra.mxu0 %v613_v0  ;;  %v6402_v2 = vld [vmem:[%s6379_s3] sm:$0xff]  ;;  %v6407_v3 = vld [vmem:[%s6379_s3 + $0x8] sm:$0xff]  ;;  %v6412_v4 = vld [vmem:[%s6379_s3 + $0x10] sm:$0xff]  ;;  %v6131_v49 = vmov 20   ;;  %s6133_s11 = smov 112   ;;  %s9718_s9 = scalar_lea.vmem [#allocation17], %s4690_s15 }
  0x6e   : > { %v6417_v5 = vld [vmem:[%s6379_s3 + $0x18] sm:$0xff]  ;;  %v6422_v6 = vld [vmem:[%s6379_s3 + $0x20] sm:$0xff]  ;;  %v6427_v7 = vld [vmem:[%s6379_s3 + $0x28] sm:$0xff]  ;;  %v5353_v43 = vceil.f32 %v6412_v4  ;;  %v5354_v44 = vfloor.f32 %v6412_v4  ;;  %v5343_v45 = vceil.f32 %v6402_v2  ;;  %v5344_v46 = vfloor.f32 %v6402_v2  ;;  %5639 = vset.pattern.permute.xlu1 %v6131_v49  ;;  %5638 = vset.pattern.permute.xlu0 %v6131_v49  ;;  %s5253_s30 = sshll.u32 %s6220_s20, 7  ;;  %s4508_s8 = sshll.u32 %s9718_s9, 4  ;;  %s4509_s8 = int_to_ptr.vmem [resolvable:$true] %s4508_s8 }
  0x6f   : > { %730 = vmatpush.msra.mxu0 %v612_v1  ;;  %v6432_v8 = vld [vmem:[%s6379_s3 + $0x30] sm:$0xff]  ;;  %v6437_v9 = vld [vmem:[%s6379_s3 + $0x38] sm:$0xff]  ;;  %v6442_v10 = vld [vmem:[%s6379_s3 + $0x40] sm:$0xff]  ;;  %vm5352_vm2 = vcmp.lt.s32.totalorder %v6412_v4, 0  ;;  %vm5342_vm3 = vcmp.lt.s32.totalorder %v6402_v2, 0  ;;  %5640 = vset.pattern.permute.xlu2 %v6131_v49  ;;  %v5358_v56 = vceil.f32 %v6417_v5  ;;  %v5359_v57 = vfloor.f32 %v6417_v5  ;;  %s4507_s4 = scalar_lea.hbm %s9795_s10, %s5253_s30  ;;  %s4496_s20 = scalar_lea.sflag [#allocation4], %s6365_s6 }
  0x70   : > { %4700 = vmatmul.msk.f32.vlgmr.msra.gmra.mxu0 %vm618_vm0, %v6402_v2  ;;  %v6447_v11 = vld [vmem:[%s6379_s3 + $0x48] sm:$0xff]  ;;  %v6452_v12 = vld [vmem:[%s6379_s3 + $0x50] sm:$0xff]  ;;  %v6457_v13 = vld [vmem:[%s6379_s3 + $0x58] sm:$0xff]  ;;  %v6531_v47 = vsel %vm5352_vm2, %v5353_v43, %v5354_v44  ;;  %v6533_v48 = vsel %vm5342_vm3, %v5343_v45, %v5344_v46  ;;  %v5348_v58 = vceil.f32 %v6407_v3  ;;  %v5349_v59 = vfloor.f32 %v6407_v3  ;;  %s4510_s7 = sshll.u32 %s4507_s4, 4  ;;  %s4511_s7 = int_to_ptr.hbm [resolvable:$true] %s4510_s7 }
  0x71   : > { %v872_v14 = vld [vmem:[#allocation10 + $0x60] sm:$0xff]  ;;  %v873_v15 = vld [vmem:[#allocation10 + $0x68] sm:$0xff]  ;;  %v874_v16 = vld [vmem:[#allocation10 + $0x70] sm:$0xff]  ;;  %9918 = vst [vmem:[#allocation27_spill] sm:$0xff] %v6531_v47  ;;  %v9807_v50 = vcvt.f32.s32 %v6531_v47  ;;  %v9802_v51 = vcvt.f32.s32 %v6533_v48  ;;  %vm5357_vm4 = vcmp.lt.s32.totalorder %v6417_v5, 0  ;;  %vm5347_vm5 = vcmp.lt.s32.totalorder %v6407_v3, 0 }
  0x72   : > { %995 = vmatpush.msra.mxu1 %v872_v14  ;;  %1108 = vmatpush.msra.mxu2 %v873_v15  ;;  %v868_v17 = vld [vmem:[#allocation10 + $0x40] sm:$0xff]  ;;  %v869_v18 = vld [vmem:[#allocation10 + $0x48] sm:$0xff]  ;;  %v870_v19 = vld [vmem:[#allocation10 + $0x50] sm:$0xff]  ;;  %9919 = vst [vmem:[#allocation28_spill] sm:$0xff] %v6533_v48  ;;  %v6561_v60 = vsel %vm5357_vm4, %v5358_v56, %v5359_v57  ;;  %v6563_v61 = vsel %vm5347_vm5, %v5348_v58, %v5349_v59  ;;  %v5373_v14 = vceil.f32 %v6432_v8  ;;  %v5374_v15 = vfloor.f32 %v6432_v8  ;;  %s6044_s29 = sshra.s32 %s4511_s7, 4  ;;  %s6045_s29 = int_to_ptr.hbm [resolvable:$true] %s6044_s29 }
  0x73   : > { %1221 = vmatpush.msra.mxu3 %v874_v16  ;;  %v6462_v20 = vld [vmem:[%s6379_s3 + $0x60] sm:$0xff]  ;;  %v864_v21 = vld [vmem:[#allocation10 + $0x20] sm:$0xff]  ;;  %v6467_v27 = vld [vmem:[%s6379_s3 + $0x68] sm:$0xff]  ;;  %1444 = vperm.xlu1 %5639, %v9807_v50   ;;  %9920 = vst [vmem:[#allocation29_spill] sm:$0xff] %v6561_v60  ;;  %v9805_v62 = vcvt.f32.s32 %v6561_v60  ;;  %v9803_v63 = vcvt.f32.s32 %v6563_v61  ;;  %vm5377_vm6 = vcmp.lt.s32.totalorder %v6437_v9, 0  ;;  %vm5372_vm7 = vcmp.lt.s32.totalorder %v6432_v8, 0  ;;  %p6051_p7 = scmp.lt.s32.totalorder %s6045_s29, %s9795_s10 }
  0x74   : > { %996 = vmatpush.msra.mxu1 %v868_v17  ;;  %1109 = vmatpush.msra.mxu2 %v869_v18  ;;  %v865_v22 = vld [vmem:[#allocation10 + $0x28] sm:$0xff]  ;;  %v866_v23 = vld [vmem:[#allocation10 + $0x30] sm:$0xff]  ;;  %v860_v24 = vld [vmem:[#allocation10] sm:$0xff]  ;;  %9921 = vst [vmem:[#allocation30_spill] sm:$0xff] %v6563_v61  ;;  %v6593_v17 = vsel %vm5372_vm7, %v5373_v14, %v5374_v15  ;;  %vm5392_vm8 = vcmp.lt.s32.totalorder %v6452_v12, 0  ;;  %vm5387_vm9 = vcmp.lt.s32.totalorder %v6447_v11, 0  ;;  %v5409_v44 = vfloor.f32 %v6467_v27 }
  0x75   : > { %1222 = vmatpush.msra.mxu3 %v870_v19  ;;  %v861_v25 = vld [vmem:[#allocation10 + $0x8] sm:$0xff]  ;;  %v862_v26 = vld [vmem:[#allocation10 + $0x10] sm:$0xff]  ;;  %v6472_v28 = vld [vmem:[%s6379_s3 + $0x70] sm:$0xff]  ;;  %1438 = vperm.xlu0 %5638, %v9802_v51   ;;  %9923 = vst [vmem:[#allocation32_spill] sm:$0xff] %v6593_v17  ;;  %v9812_v19 = vcvt.f32.s32 %v6593_v17  ;;  %v5403_v45 = vceil.f32 %v6462_v20  ;;  %v5404_v46 = vfloor.f32 %v6462_v20  ;;  %vm5407_vm10 = vcmp.lt.s32.totalorder %v6467_v27, 0  ;;  %s6046_s28 = scalar_lea.hbm %s6045_s29, 128 }
  0x76   : > { %997 = vmatpush.msra.mxu1 %v864_v21  ;;  %1110 = vmatpush.msra.mxu2 %v865_v22  ;;  %v6477_v29 = vld [vmem:[%s6379_s3 + $0x78] sm:$0xff]  ;;  %v6481_v30 = vld [vmem:[#allocation8] ss:$0 sm:$0xff]  ;;  %v6484_v32 = vld [vmem:[%s6379_s3 + $0x80] sm:$0xff]  ;;  %vm5402_vm11 = vcmp.lt.s32.totalorder %v6462_v20, 0  ;;  %vm5362_vm12 = vcmp.lt.s32.totalorder %v6422_v6, 0  ;;  %p6047_p1 = scmp.ne.s32.totalorder %s6045_s29, %s6046_s28 }
  0x77   : > { %1223 = vmatpush.msra.mxu3 %v866_v23  ;;  %v6498_v36 = vld [vmem:[%s6379_s3 + $0x88] sm:$0xff]  ;;  %v6512_v40 = vld [vmem:[%s6379_s3 + $0x90] sm:$0xff]  ;;  %v6538_v53 = vld [vmem:[%s6379_s3 + $0x98] sm:$0xff]  ;;  %vm5422_vm13 = vcmp.lt.s32.totalorder %v6484_v32, 0  ;;  %vm5417_vm14 = vcmp.lt.s32.totalorder %v6477_v29, 0  ;;  %vm5367_vm15 = vcmp.lt.s32.totalorder %v6427_v7, 0 }
  0x78   : > { %4701 = vmatmul.msk.f32.gmra.mxu0 %vm618_vm0, %v6407_v3  ;;  %998 = vmatpush.msra.mxu1 %v860_v24  ;;  %v6568_v1 = vld [vmem:[%s6379_s3 + $0xa0] sm:$0xff]  ;;  %v6598_v22 = vld [vmem:[%s6379_s3 + $0xa8] sm:$0xff]  ;;  %v5394_v24 = vfloor.f32 %v6452_v12  ;;  %v6658_v58 = vld [vmem:[%s6379_s3 + $0xb8] sm:$0xff]  ;;  %vm5437_vm2 = vcmp.lt.s32.totalorder %v6538_v53, 0  ;;  %vm5432_vm3 = vcmp.lt.s32.totalorder %v6512_v40, 0  ;;  %vm5382_vm4 = vcmp.lt.s32.totalorder %v6442_v10, 0  ;;  %p6048_p3 = pnand %p6047_p1, %p6302_p0 }
  0x79   : > { %1111 = vmatpush.msra.mxu2 %v861_v25  ;;  %1224 = vmatpush.msra.mxu3 %v862_v26  ;;  %v5388_v25 = vceil.f32 %v6447_v11  ;;  %v5389_v26 = vfloor.f32 %v6447_v11  ;;  %vm5397_vm7 = vcmp.lt.s32.totalorder %v6457_v13, 0  ;;  %v867_v50 = vld [vmem:[#allocation10 + $0x38] sm:$0xff]  ;;  %v547_v48 = vld [vmem:[%s6371_s27 + $0x78] sm:$0xff]  ;;  %v544_v61 = vld [vmem:[%s6371_s27 + $0x60] sm:$0xff] }
  0x7a   : > { %p6049_p13 = pneg %p6048_p3 }
  0x7b   : > { %1447 = vperm.xlu1 %5639, %v9805_v62  }
  0x7d   : > { %1441 = vperm.xlu0 %5638, %v9803_v63  }
  0x80   : > { %4702 = vmatmul.msk.f32.gmra.mxu0 %vm618_vm0, %v6412_v4  ;;  %v5378_v4 = vceil.f32 %v6437_v9 }
  0x85   : > { %1456 = vperm.xlu0 %5638, %v9812_v19  }
  0x88   : > { %4703 = vmatmul.msk.f32.gmra.mxu0 %vm618_vm0, %v6417_v5  ;;  %v5379_v5 = vfloor.f32 %v6437_v9 }
  0x8a   : > { %v6591_v16 = vsel %vm5377_vm6, %v5378_v4, %v5379_v5  ;;  %v5424_v4 = vfloor.f32 %v6484_v32  ;;  %v5418_v5 = vceil.f32 %v6477_v29  ;;  %vm5447_vm6 = vcmp.lt.s32.totalorder %v6598_v22, 0 }
  0x8b   : > { %9922 = vst [vmem:[#allocation31_spill] sm:$0xff] %v6591_v16  ;;  %v9813_v18 = vcvt.f32.s32 %v6591_v16 }
  0x8d   : > { %1459 = vperm.xlu1 %5639, %v9813_v18  }
  0x90   : > { %4704 = vmatmul.msk.f32.gmra.mxu0 %vm618_vm0, %v6422_v6 }
  0x98   : > { %4705 = vmatmul.msk.f32.gmra.mxu0 %vm618_vm0, %v6427_v7 }
  0xa0   : > { %4706 = vmatmul.msk.f32.gmra.mxu0 %vm618_vm0, %v6432_v8 }
  0xa8   : > { %4707 = vmatmul.msk.f32.gmra.mxu0 %vm618_vm0, %v6437_v9  ;;  %v5393_v9 = vceil.f32 %v6452_v12 }
  0xb0   : > { %4708 = vmatmul.msk.f32.gmra.mxu0 %vm618_vm0, %v6442_v10 }
  0xb8   : > { %4709 = vmatmul.msk.f32.gmra.mxu0 %vm618_vm0, %v6447_v11 }
  0xc0   : > { %4710 = vmatmul.msk.f32.gmra.mxu0 %vm618_vm0, %v6452_v12  ;;  %v5408_v12 = vceil.f32 %v6467_v27 }
  0xc2   : > { %v6651_v49 = vsel %vm5407_vm10, %v5408_v12, %v5409_v44  ;;  %v5438_v12 = vceil.f32 %v6538_v53  ;;  %v5439_v44 = vfloor.f32 %v6538_v53  ;;  %vm5412_vm10 = vcmp.lt.s32.totalorder %v6472_v28, 0 }
  0xc3   : > { %9926 = vst [vmem:[#allocation35_spill] sm:$0xff] %v6651_v49 }
  0xc8   : > { %4711 = vmatmul.msk.f32.gmra.mxu0 %vm618_vm0, %v6457_v13 }
  0xd0   : > { %4712 = vmatmul.msk.f32.gmra.mxu0 %vm618_vm0, %v6462_v20 }
  0xd8   : > { %4713 = vmatmul.msk.f32.gmra.mxu0 %vm618_vm0, %v6467_v27  ;;  %v5363_v27 = vceil.f32 %v6422_v6 }
  0xe0   : > { %4714 = vmatmul.msk.f32.gmra.mxu0 %vm618_vm0, %v6472_v28 }
  0xe8   : > { %4715 = vmatmul.msk.f32.gmra.mxu0 %vm618_vm0, %v6477_v29 }
  0xed   : > { %v732_v31 = vpop.f32.mrf.mxu0 }
  0xee   : > { %v733_v33 = vadd.f32 %v6481_v30, %v732_v31  ;;  %v6621_v31 = vsel %vm5392_vm8, %v5393_v9, %v5394_v24  ;;  %v6691_v24 = vld [vmem:[%s6379_s3 + $0xc0] sm:$0xff] }
  0xef   : > { %9924 = vst [vmem:[#allocation33_spill] sm:$0xff] %v6621_v31  ;;  %v5464_v51 = vfloor.f32 %v6691_v24 }
  0xf0   : > { %v6487_v34 = vmax.f32 %v733_v33, 0.0  ;;  %4716 = vmatmul.msk.f32.gmra.mxu0 %vm618_vm0, %v6484_v32  ;;  %v6623_v33 = vsel %vm5387_vm9, %v5388_v25, %v5389_v26  ;;  %vm5462_vm9 = vcmp.lt.s32.totalorder %v6691_v24, 0 }
  0xf1   : > { %9925 = vst [vmem:[#allocation34_spill] sm:$0xff] %v6623_v33 }
  0xf2   : > { %4732 = vmatmul.msk.f32.vlgmr.msra.gmra.mxu1 %vm886_vm1, %v6487_v34  ;;  %4764 = vmatmul.msk.f32.vlgmr.msra.gmra.mxu2 %vm886_vm1, %v6487_v34 }
  0xf3   : > { %4796 = vmatmul.msk.f32.vlgmr.msra.gmra.mxu3 %vm886_vm1, %v6487_v34 }
  0xf5   : > { %v735_v35 = vpop.f32.mrf.mxu0 }
  0xf6   : > { %v736_v37 = vadd.f32 %v6481_v30, %v735_v35  ;;  %v9821_v35 = vcvt.f32.s32 %v6621_v31 }
  0xf8   : > { %v6501_v38 = vmax.f32 %v736_v37, 0.0  ;;  %4717 = vmatmul.msk.f32.gmra.mxu0 %vm618_vm0, %v6498_v36  ;;  %v9815_v37 = vcvt.f32.s32 %v6623_v33  ;;  %1468 = vperm.xlu1 %5639, %v9821_v35   ;;  %v5458_v35 = vceil.f32 %v6658_v58  ;;  %v1439_v33 = vpop.permute.xlu0 %1438 }
  0xfa   : > { %4733 = vmatmul.msk.f32.gmra.mxu1 %vm886_vm1, %v6501_v38  ;;  %4765 = vmatmul.msk.f32.gmra.mxu2 %vm886_vm1, %v6501_v38 }
  0xfb   : > { %4797 = vmatmul.msk.f32.gmra.mxu3 %vm886_vm1, %v6501_v38  ;;  %1465 = vperm.xlu0 %5638, %v9815_v37  }
  0xfd   : > { %v738_v39 = vpop.f32.mrf.mxu0 }
  0xfe   : > { %v739_v41 = vadd.f32 %v6481_v30, %v738_v39 }
 0x100   : > { %v6515_v42 = vmax.f32 %v739_v41, 0.0  ;;  %4718 = vmatmul.msk.f32.gmra.mxu0 %vm618_vm0, %v6512_v40  ;;  %v6628_v41 = vld [vmem:[%s6379_s3 + $0xb0] sm:$0xff] }
 0x101   : > { %vm5452_vm5 = vcmp.lt.s32.totalorder %v6628_v41, 0 }
 0x102   : > { %4734 = vmatmul.msk.f32.gmra.mxu1 %vm886_vm1, %v6515_v42  ;;  %4766 = vmatmul.msk.f32.gmra.mxu2 %vm886_vm1, %v6515_v42 }
 0x103   : > { %4798 = vmatmul.msk.f32.gmra.mxu3 %vm886_vm1, %v6515_v42 }
 0x105   : > { %v741_v52 = vpop.f32.mrf.mxu0 }
 0x106   : > { %v742_v54 = vadd.f32 %v6481_v30, %v741_v52  ;;  %v6653_v52 = vsel %vm5402_vm11, %v5403_v45, %v5404_v46  ;;  %v5433_v45 = vceil.f32 %v6512_v40 }
 0x107   : > { %9927 = vst [vmem:[#allocation36_spill] sm:$0xff] %v6653_v52  ;;  %v9826_v56 = vcvt.f32.s32 %v6653_v52 }
 0x108   : > { %v6545_v55 = vmax.f32 %v742_v54, 0.0  ;;  %4719 = vmatmul.msk.f32.gmra.mxu0 %vm618_vm0, %v6538_v53  ;;  %v9828_v54 = vcvt.f32.s32 %v6651_v49 }
 0x109   : > { %1474 = vperm.xlu0 %5638, %v9826_v56  }
 0x10a   : > { %4735 = vmatmul.msk.f32.gmra.mxu1 %vm886_vm1, %v6545_v55  ;;  %4767 = vmatmul.msk.f32.gmra.mxu2 %vm886_vm1, %v6545_v55 }
 0x10b   : > { %4799 = vmatmul.msk.f32.gmra.mxu3 %vm886_vm1, %v6545_v55  ;;  %1477 = vperm.xlu1 %5639, %v9828_v54  }
 0x10d   : > { %v744_v0 = vpop.f32.mrf.mxu0 }
 0x10e   : > { %v745_v2 = vadd.f32 %v6481_v30, %v744_v0  ;;  %v5364_v0 = vfloor.f32 %v6422_v6 }
 0x110   : > { %v6575_v3 = vmax.f32 %v745_v2, 0.0  ;;  %4720 = vmatmul.msk.f32.gmra.mxu0 %vm618_vm0, %v6568_v1  ;;  %v5423_v2 = vceil.f32 %v6484_v32  ;;  %v6683_v14 = vsel %vm5362_vm12, %v5363_v27, %v5364_v0 }
 0x111   : > { %9928 = vst [vmem:[#allocation37_spill] sm:$0xff] %v6683_v14 }
 0x112   : > { %4736 = vmatmul.msk.f32.gmra.mxu1 %vm886_vm1, %v6575_v3  ;;  %4768 = vmatmul.msk.f32.gmra.mxu2 %vm886_vm1, %v6575_v3  ;;  %v6685_v15 = vsel %vm5422_vm13, %v5423_v2, %v5424_v4  ;;  %v573_v2 = vld [vmem:[%s6379_s3 + $0xc8] sm:$0xff]  ;;  %vm5427_vm13 = vcmp.lt.s32.totalorder %v6498_v36, 0 }
 0x113   : > { %4800 = vmatmul.msk.f32.gmra.mxu3 %vm886_vm1, %v6575_v3  ;;  %9929 = vst [vmem:[#allocation38_spill] sm:$0xff] %v6685_v15  ;;  %v9801_v9 = vcvt.f32.s32 %v6685_v15  ;;  %vm5467_vm8 = vcmp.lt.s32.totalorder %v573_v2, 0  ;;  %v546_v15 = vld [vmem:[%s6371_s27 + $0x70] sm:$0xff] }
 0x115   : > { %v747_v21 = vpop.f32.mrf.mxu0  ;;  %1486 = vperm.xlu1 %5639, %v9801_v9  }
 0x116   : > { %v748_v23 = vadd.f32 %v6481_v30, %v747_v21  ;;  %v5419_v21 = vfloor.f32 %v6477_v29 }
 0x118   : > { %v6605_v8 = vmax.f32 %v748_v23, 0.0  ;;  %4721 = vmatmul.msk.f32.gmra.mxu0 %vm618_vm0, %v6598_v22  ;;  %v9810_v23 = vcvt.f32.s32 %v6683_v14  ;;  %v6693_v32 = vsel %vm5417_vm14, %v5418_v5, %v5419_v21 }
 0x119   : > { %9930 = vst [vmem:[#allocation39_spill] sm:$0xff] %v6693_v32  ;;  %v9832_v26 = vcvt.f32.s32 %v6693_v32 }
 0x11a   : > { %4737 = vmatmul.msk.f32.gmra.mxu1 %vm886_vm1, %v6605_v8  ;;  %4769 = vmatmul.msk.f32.gmra.mxu2 %vm886_vm1, %v6605_v8 }
 0x11b   : > { %4801 = vmatmul.msk.f32.gmra.mxu3 %vm886_vm1, %v6605_v8  ;;  %1450 = vperm.xlu2 %5640, %v9810_v23  }
 0x11c   : > { %1483 = vperm.xlu0 %5638, %v9832_v26  }
 0x11d   : > { %v750_v39 = vpop.f32.mrf.mxu0 }
 0x11e   : > { %v751_v43 = vadd.f32 %v6481_v30, %v750_v39  ;;  %v5368_v39 = vceil.f32 %v6427_v7 }
 0x120   : > { %v6635_v11 = vmax.f32 %v751_v43, 0.0  ;;  %4722 = vmatmul.msk.f32.gmra.mxu0 %vm618_vm0, %v6628_v41  ;;  %v5369_v43 = vfloor.f32 %v6427_v7 }
 0x122   : > { %4738 = vmatmul.msk.f32.gmra.mxu1 %vm886_vm1, %v6635_v11  ;;  %4770 = vmatmul.msk.f32.gmra.mxu2 %vm886_vm1, %v6635_v11  ;;  %v6721_v46 = vsel %vm5367_vm15, %v5368_v39, %v5369_v43  ;;  %v5454_v39 = vfloor.f32 %v6628_v41  ;;  %v5448_v43 = vceil.f32 %v6598_v22 }
 0x123   : > { %4802 = vmatmul.msk.f32.gmra.mxu3 %vm886_vm1, %v6635_v11  ;;  %9931 = vst [vmem:[#allocation40_spill] sm:$0xff] %v6721_v46  ;;  %v9809_v27 = vcvt.f32.s32 %v6721_v46 }
 0x125   : > { %v753_v57 = vpop.f32.mrf.mxu0  ;;  %1453 = vperm.xlu2 %5640, %v9809_v27  }
 0x126   : > { %v754_v59 = vadd.f32 %v6481_v30, %v753_v57  ;;  %v6723_v57 = vsel %vm5437_vm2, %v5438_v12, %v5439_v44  ;;  %vm5442_vm2 = vcmp.lt.s32.totalorder %v6568_v1, 0 }
 0x127   : > { %9932 = vst [vmem:[#allocation41_spill] sm:$0xff] %v6723_v57  ;;  %v9804_v0 = vcvt.f32.s32 %v6723_v57  ;;  %v545_v57 = vld [vmem:[%s6371_s27 + $0x68] sm:$0xff] }
 0x128   : > { %v6665_v20 = vmax.f32 %v754_v59, 0.0  ;;  %4723 = vmatmul.msk.f32.gmra.mxu0 %vm618_vm0, %v6658_v58  ;;  %v5434_v59 = vfloor.f32 %v6512_v40  ;;  %v5383_v40 = vceil.f32 %v6442_v10  ;;  %v1859_v60 = vpack.c.bf16 %v545_v57, %v544_v61 }
 0x129   : > { %1495 = vperm.xlu1 %5639, %v9804_v0  }
 0x12a   : > { %4739 = vmatmul.msk.f32.gmra.mxu1 %vm886_vm1, %v6665_v20  ;;  %4771 = vmatmul.msk.f32.gmra.mxu2 %vm886_vm1, %v6665_v20  ;;  %v6729_v53 = vsel %vm5432_vm3, %v5433_v45, %v5434_v59  ;;  %v5449_v45 = vfloor.f32 %v6598_v22  ;;  %vm5457_vm3 = vcmp.lt.s32.totalorder %v6658_v58, 0 }
 0x12b   : > { %4803 = vmatmul.msk.f32.gmra.mxu3 %vm886_vm1, %v6665_v20  ;;  %9933 = vst [vmem:[#allocation42_spill] sm:$0xff] %v6729_v53  ;;  %v9806_v5 = vcvt.f32.s32 %v6729_v53 }
 0x12d   : > { %v756_v6 = vpop.f32.mrf.mxu0  ;;  %1492 = vperm.xlu0 %5638, %v9806_v5  }
 0x12e   : > { %v757_v25 = vadd.f32 %v6481_v30, %v756_v6  ;;  %v5384_v6 = vfloor.f32 %v6442_v10 }
 0x130   : > { %v6701_v29 = vmax.f32 %v757_v25, 0.0  ;;  %4724 = vmatmul.msk.f32.gmra.mxu0 %vm618_vm0, %v6691_v24  ;;  %v5453_v25 = vceil.f32 %v6628_v41  ;;  %v6756_v12 = vsel %vm5382_vm4, %v5383_v40, %v5384_v6  ;;  %v6766_v41 = vsel %vm5447_vm6, %v5448_v43, %v5449_v45 }
 0x131   : > { %9934 = vst [vmem:[#allocation43_spill] sm:$0xff] %v6756_v12  ;;  %v9817_v59 = vcvt.f32.s32 %v6756_v12  ;;  %v9808_v40 = vcvt.f32.s32 %v6766_v41  ;;  %v5398_v6 = vceil.f32 %v6457_v13  ;;  %v5469_v43 = vfloor.f32 %v573_v2 }
 0x132   : > { %4740 = vmatmul.msk.f32.gmra.mxu1 %vm886_vm1, %v6701_v29  ;;  %4772 = vmatmul.msk.f32.gmra.mxu2 %vm886_vm1, %v6701_v29  ;;  %v6758_v44 = vsel %vm5452_vm5, %v5453_v25, %v5454_v39  ;;  %9936 = vst [vmem:[#allocation45_spill] sm:$0xff] %v6766_v41  ;;  %v5399_v25 = vfloor.f32 %v6457_v13  ;;  %v5468_v39 = vceil.f32 %v573_v2 }
 0x133   : > { %4804 = vmatmul.msk.f32.gmra.mxu3 %vm886_vm1, %v6701_v29  ;;  %9935 = vst [vmem:[#allocation44_spill] sm:$0xff] %v6758_v44  ;;  %1462 = vperm.xlu2 %5640, %v9817_v59  }
 0x134   : > { %v6791_v45 = vsel %vm5397_vm7, %v5398_v6, %v5399_v25 }
 0x135   : > { %v759_v7 = vpop.f32.mrf.mxu0  ;;  %1501 = vperm.xlu0 %5638, %v9808_v40   ;;  %9937 = vst [vmem:[#allocation46_spill] sm:$0xff] %v6791_v45  ;;  %v9819_v63 = vcvt.f32.s32 %v6791_v45 }
 0x136   : > { %v760_v4 = vadd.f32 %v6481_v30, %v759_v7  ;;  %v9811_v7 = vcvt.f32.s32 %v6758_v44 }
 0x138   : > { %v6737_v21 = vmax.f32 %v760_v4, 0.0  ;;  %4725 = vmatmul.msk.f32.gmra.mxu0 %vm618_vm0, %v573_v2  ;;  %v6764_v4 = vld [vmem:[%s6379_s3 + $0xd0] sm:$0xff]  ;;  %1504 = vperm.xlu1 %5639, %v9811_v7   ;;  %v575_v2 = vld [vmem:[%s6379_s3 + $0xd8] sm:$0xff] }
 0x139   : > { %vm5477_vm12 = vcmp.lt.s32.totalorder %v575_v2, 0  ;;  %v5479_v23 = vfloor.f32 %v575_v2  ;;  %vm5472_vm4 = vcmp.lt.s32.totalorder %v6764_v4, 0 }
 0x13a   : > { %4741 = vmatmul.msk.f32.gmra.mxu1 %vm886_vm1, %v6737_v21  ;;  %4773 = vmatmul.msk.f32.gmra.mxu2 %vm886_vm1, %v6737_v21 }
 0x13b   : > { %4805 = vmatmul.msk.f32.gmra.mxu3 %vm886_vm1, %v6737_v21  ;;  %1471 = vperm.xlu2 %5640, %v9819_v63  }
 0x13d   : > { %v762_v10 = vpop.f32.mrf.mxu0 }
 0x13e   : > { %v763_v9 = vadd.f32 %v6481_v30, %v762_v10  ;;  %v6793_v10 = vsel %vm5467_vm8, %v5468_v39, %v5469_v43  ;;  %v5413_v39 = vceil.f32 %v6472_v28  ;;  %v5414_v43 = vfloor.f32 %v6472_v28 }
 0x13f   : > { %9938 = vst [vmem:[#allocation47_spill] sm:$0xff] %v6793_v10  ;;  %v9814_v0 = vcvt.f32.s32 %v6793_v10 }
 0x140   : > { %v6774_v22 = vmax.f32 %v763_v9, 0.0  ;;  %4726 = vmatmul.msk.f32.gmra.mxu0 %vm618_vm0, %v6764_v4  ;;  %v5463_v9 = vceil.f32 %v6691_v24  ;;  %v576_v24 = vld [vmem:[%s6379_s3 + $0xe0] sm:$0xff]  ;;  %v6822_v40 = vsel %vm5412_vm10, %v5413_v39, %v5414_v43 }
 0x141   : > { %1513 = vperm.xlu1 %5639, %v9814_v0   ;;  %vm5482_vm11 = vcmp.lt.s32.totalorder %v576_v24, 0  ;;  %9940 = vst [vmem:[#allocation49_spill] sm:$0xff] %v6822_v40  ;;  %v9831_v7 = vcvt.f32.s32 %v6822_v40 }
 0x142   : > { %4742 = vmatmul.msk.f32.gmra.mxu1 %vm886_vm1, %v6774_v22  ;;  %4774 = vmatmul.msk.f32.gmra.mxu2 %vm886_vm1, %v6774_v22  ;;  %v6799_v62 = vsel %vm5462_vm9, %v5463_v9, %v5464_v51  ;;  %v875_v51 = vld [vmem:[#allocation10 + $0x78] sm:$0xff]  ;;  %v5483_v9 = vceil.f32 %v576_v24 }
 0x143   : > { %4806 = vmatmul.msk.f32.gmra.mxu3 %vm886_vm1, %v6774_v22  ;;  %9939 = vst [vmem:[#allocation48_spill] sm:$0xff] %v6799_v62  ;;  %v9816_v6 = vcvt.f32.s32 %v6799_v62  ;;  %1334 = vmatpush.msrb.mxu0 %v875_v51  ;;  %v871_v51 = vld [vmem:[#allocation10 + $0x58] sm:$0xff]  ;;  %v1435_v62 = vlaneseq }
 0x144   : > { %1480 = vperm.xlu2 %5640, %v9831_v7  }
 0x145   : > { %v765_v13 = vpop.f32.mrf.mxu0  ;;  %1510 = vperm.xlu0 %5638, %v9816_v6   ;;  %1335 = vmatpush.msrb.mxu0 %v871_v51 }
 0x146   : > { %v766_v5 = vadd.f32 %v6481_v30, %v765_v13  ;;  %v5484_v13 = vfloor.f32 %v576_v24 }
 0x147   : > { %1336 = vmatpush.msrb.mxu0 %v867_v50  ;;  %v5428_v50 = vceil.f32 %v6498_v36 }
 0x148   : > { %v6807_v25 = vmax.f32 %v766_v5, 0.0  ;;  %4727 = vmatmul.msk.f32.gmra.mxu0 %vm618_vm0, %v575_v2  ;;  %v5478_v5 = vceil.f32 %v575_v2  ;;  %v6824_v27 = vsel %vm5482_vm11, %v5483_v9, %v5484_v13  ;;  %v863_v2 = vld [vmem:[#allocation10 + $0x18] sm:$0xff]  ;;  %v579_v9 = vld [vmem:[%s6379_s3 + $0xf8] sm:$0xff] }
 0x149   : > { %9941 = vst [vmem:[#allocation50_spill] sm:$0xff] %v6824_v27  ;;  %v9825_v28 = vcvt.f32.s32 %v6824_v27  ;;  %1337 = vmatpush.msrb.mxu0 %v863_v2  ;;  %v5498_v13 = vceil.f32 %v579_v9  ;;  %vm5497_vm14 = vcmp.lt.s32.totalorder %v579_v9, 0 }
 0x14a   : > { %4743 = vmatmul.msk.f32.gmra.mxu1 %vm886_vm1, %v6807_v25  ;;  %4775 = vmatmul.msk.f32.gmra.mxu2 %vm886_vm1, %v6807_v25  ;;  %v6828_v18 = vsel %vm5477_vm12, %v5478_v5, %v5479_v23  ;;  %v578_v23 = vld [vmem:[%s6379_s3 + $0xf0] sm:$0xff]  ;;  %v5499_v5 = vfloor.f32 %v579_v9 }
 0x14b   : > { %4807 = vmatmul.msk.f32.gmra.mxu3 %vm886_vm1, %v6807_v25  ;;  %9942 = vst [vmem:[#allocation51_spill] sm:$0xff] %v6828_v18  ;;  %v9818_v39 = vcvt.f32.s32 %v6828_v18  ;;  %1522 = vperm.xlu1 %5639, %v9825_v28   ;;  %vm5492_vm15 = vcmp.lt.s32.totalorder %v578_v23, 0  ;;  %v5494_v2 = vfloor.f32 %v578_v23 }
 0x14c   : > { %v6854_v51 = vsel %vm5497_vm14, %v5498_v13, %v5499_v5  ;;  %v5443_v13 = vceil.f32 %v6568_v1 }
 0x14d   : > { %v768_v19 = vpop.f32.mrf.mxu0  ;;  %1519 = vperm.xlu0 %5638, %v9818_v39   ;;  %9944 = vst [vmem:[#allocation53_spill] sm:$0xff] %v6854_v51  ;;  %v9829_v6 = vcvt.f32.s32 %v6854_v51  ;;  %v6859_v39 = vld [vmem:[%s6379_s3 + $0xe8] sm:$0xff]  ;;  %v9974_v51 = vmov 1.0|1.0  }
 0x14e   : > { %v769_v0 = vadd.f32 %v6481_v30, %v768_v19  ;;  %v5429_v19 = vfloor.f32 %v6498_v36 }
 0x150   : > { %v6836_v43 = vmax.f32 %v769_v0, 0.0  ;;  %4728 = vmatmul.msk.f32.gmra.mxu0 %vm618_vm0, %v576_v24  ;;  %v5493_v0 = vceil.f32 %v578_v23  ;;  %v6852_v24 = vsel %vm5427_vm13, %v5428_v50, %v5429_v19 }
 0x151   : > { %9943 = vst [vmem:[#allocation52_spill] sm:$0xff] %v6852_v24  ;;  %v9820_v37 = vcvt.f32.s32 %v6852_v24 }
 0x152   : > { %4744 = vmatmul.msk.f32.gmra.mxu1 %vm886_vm1, %v6836_v43  ;;  %4776 = vmatmul.msk.f32.gmra.mxu2 %vm886_vm1, %v6836_v43  ;;  %v6861_v63 = vsel %vm5492_vm15, %v5493_v0, %v5494_v2 }
 0x153   : > { %4808 = vmatmul.msk.f32.gmra.mxu3 %vm886_vm1, %v6836_v43  ;;  %9945 = vst [vmem:[#allocation54_spill] sm:$0xff] %v6861_v63  ;;  %1489 = vperm.xlu2 %5640, %v9820_v37   ;;  %v9830_v50 = vcvt.f32.s32 %v6861_v63 }
 0x154   : > { %1531 = vperm.xlu1 %5639, %v9829_v6  }
 0x155   : > { %v771_v59 = vpop.f32.mrf.mxu0  ;;  %1528 = vperm.xlu0 %5638, %v9830_v50  }
 0x156   : > { %v772_v36 = vadd.f32 %v6481_v30, %v771_v59  ;;  %v5444_v59 = vfloor.f32 %v6568_v1  ;;  %v5459_v1 = vfloor.f32 %v6658_v58  ;;  %v5474_v58 = vfloor.f32 %v6764_v4 }
 0x158   : > { %v6869_v19 = vmax.f32 %v772_v36, 0.0  ;;  %4729 = vmatmul.msk.f32.gmra.mxu0 %vm618_vm0, %v6859_v39  ;;  %v6884_v5 = vsel %vm5442_vm2, %v5443_v13, %v5444_v59  ;;  %v6902_v13 = vsel %vm5457_vm3, %v5458_v35, %v5459_v1 }
 0x159   : > { %9946 = vst [vmem:[#allocation55_spill] sm:$0xff] %v6884_v5  ;;  %v9822_v0 = vcvt.f32.s32 %v6884_v5  ;;  %v9823_v59 = vcvt.f32.s32 %v6902_v13 }
 0x15a   : > { %4745 = vmatmul.msk.f32.gmra.mxu1 %vm886_vm1, %v6869_v19  ;;  %4777 = vmatmul.msk.f32.gmra.mxu2 %vm886_vm1, %v6869_v19  ;;  %9947 = vst [vmem:[#allocation56_spill] sm:$0xff] %v6902_v13 }
 0x15b   : > { %4809 = vmatmul.msk.f32.gmra.mxu3 %vm886_vm1, %v6869_v19  ;;  %1498 = vperm.xlu2 %5640, %v9822_v0   ;;  %v5473_v0 = vceil.f32 %v6764_v4 }
 0x15d   : > { %v774_v2 = vpop.f32.mrf.mxu0  ;;  %v6920_v35 = vsel %vm5472_vm4, %v5473_v0, %v5474_v58 }
 0x15e   : > { %v775_v36 = vadd.f32 %v6481_v30, %v774_v2  ;;  %9948 = vst [vmem:[#allocation57_spill] sm:$0xff] %v6920_v35  ;;  %v9824_v1 = vcvt.f32.s32 %v6920_v35 }
 0x160   : > { %v6890_v37 = vmax.f32 %v775_v36, 0.0  ;;  %4730 = vmatmul.msk.f32.gmra.mxu0 %vm618_vm0, %v578_v23 }
 0x162   : > { %4746 = vmatmul.msk.f32.gmra.mxu1 %vm886_vm1, %v6890_v37  ;;  %4778 = vmatmul.msk.f32.gmra.mxu2 %vm886_vm1, %v6890_v37 }
 0x163   : > { %4810 = vmatmul.msk.f32.gmra.mxu3 %vm886_vm1, %v6890_v37  ;;  %1507 = vperm.xlu2 %5640, %v9823_v59  }
 0x165   : > { %v777_v23 = vpop.f32.mrf.mxu0 }
 0x166   : > { %v778_v2 = vadd.f32 %v6481_v30, %v777_v23 }
 0x168   : > { %v6908_v36 = vmax.f32 %v778_v2, 0.0  ;;  %4731 = vmatmul.msk.f32.gmra.mxu0 %vm618_vm0, %v579_v9  ;;  %vm5487_vm0 = vcmp.lt.s32.totalorder %v6859_v39, 0 }
 0x16a   : > { %4747 = vmatmul.msk.f32.gmra.mxu1 %vm886_vm1, %v6908_v36  ;;  %4779 = vmatmul.msk.f32.gmra.mxu2 %vm886_vm1, %v6908_v36 }
 0x16b   : > { %4811 = vmatmul.msk.f32.gmra.mxu3 %vm886_vm1, %v6908_v36  ;;  %1516 = vperm.xlu2 %5640, %v9824_v1  }
 0x16d   : > { %v780_v9 = vpop.f32.mrf.mxu0 }
 0x16e   : > { %v781_v23 = vadd.f32 %v6481_v30, %v780_v9 }
 0x16f   : > { %v6926_v2 = vpop.f32.mrf.mxu1 }
 0x170   : > { %9949 = vst [vmem:[#allocation58_spill] sm:$0xff] %v6926_v2  ;;  %v6928_v59 = vmax.f32 %v781_v23, 0.0  ;;  %4828 = vmatmul.msk.f32.vlgmr.msrb.gmra.mxu0 %vm886_vm1, %v6487_v34  ;;  %v5488_v34 = vceil.f32 %v6859_v39  ;;  %v5489_v23 = vfloor.f32 %v6859_v39 }
 0x172   : > { %4748 = vmatmul.msk.f32.gmra.mxu1 %vm886_vm1, %v6928_v59  ;;  %4780 = vmatmul.msk.f32.gmra.mxu2 %vm886_vm1, %v6928_v59 }
 0x173   : > { %4812 = vmatmul.msk.f32.gmra.mxu3 %vm886_vm1, %v6928_v59 }
 0x175   : > { %v783_v4 = vpop.f32.mrf.mxu0 }
 0x176   : > { %v784_v0 = vadd.f32 %v6481_v30, %v783_v4  ;;  %v6954_v4 = vsel %vm5487_vm0, %v5488_v34, %v5489_v23 }
 0x177   : > { %v6939_v58 = vpop.f32.mrf.mxu1  ;;  %9951 = vst [vmem:[#allocation60_spill] sm:$0xff] %v6954_v4 }
 0x178   : > { %9950 = vst [vmem:[#allocation59_spill] sm:$0xff] %v6939_v58  ;;  %v6941_v9 = vmax.f32 %v784_v0, 0.0  ;;  %4829 = vmatmul.msk.f32.gmra.mxu0 %vm886_vm1, %v6501_v38  ;;  %v9827_v0 = vcvt.f32.s32 %v6954_v4  ;;  %v5723_v58 = vld [vmem:[%s6379_s3 + $0x58] sm:$0xff] }
 0x17a   : > { %4749 = vmatmul.msk.f32.gmra.mxu1 %vm886_vm1, %v6941_v9  ;;  %4781 = vmatmul.msk.f32.gmra.mxu2 %vm886_vm1, %v6941_v9 }
 0x17b   : > { %4813 = vmatmul.msk.f32.gmra.mxu3 %vm886_vm1, %v6941_v9  ;;  %1525 = vperm.xlu2 %5640, %v9827_v0  }
 0x17d   : > { %v786_v38 = vpop.f32.mrf.mxu0 }
 0x17e   : > { %v787_v1 = vadd.f32 %v6481_v30, %v786_v38 }
 0x17f   : > { %v6960_v28 = vpop.f32.mrf.mxu1 }
 0x180   : > { %9952 = vst [vmem:[#allocation61_spill] sm:$0xff] %v6960_v28  ;;  %v6962_v56 = vmax.f32 %v787_v1, 0.0  ;;  %4830 = vmatmul.msk.f32.gmra.mxu0 %vm886_vm1, %v6515_v42 }
 0x182   : > { %4750 = vmatmul.msk.f32.gmra.mxu1 %vm886_vm1, %v6962_v56  ;;  %4782 = vmatmul.msk.f32.gmra.mxu2 %vm886_vm1, %v6962_v56 }
 0x183   : > { %4814 = vmatmul.msk.f32.gmra.mxu3 %vm886_vm1, %v6962_v56 }
 0x185   : > { %v789_v39 = vpop.f32.mrf.mxu0 }
 0x186   : > { %v790_v34 = vadd.f32 %v6481_v30, %v789_v39 }
 0x187   : > { %v6973_v23 = vpop.f32.mrf.mxu1 }
 0x188   : > { %9953 = vst [vmem:[#allocation62_spill] sm:$0xff] %v6973_v23  ;;  %v6975_v38 = vmax.f32 %v790_v34, 0.0  ;;  %4831 = vmatmul.msk.f32.gmra.mxu0 %vm886_vm1, %v6545_v55 }
 0x18a   : > { %4751 = vmatmul.msk.f32.gmra.mxu1 %vm886_vm1, %v6975_v38  ;;  %4783 = vmatmul.msk.f32.gmra.mxu2 %vm886_vm1, %v6975_v38 }
 0x18b   : > { %4815 = vmatmul.msk.f32.gmra.mxu3 %vm886_vm1, %v6975_v38 }
 0x18d   : > { %v792_v42 = vpop.f32.mrf.mxu0 }
 0x18e   : > { %v793_v1 = vadd.f32 %v6481_v30, %v792_v42 }
 0x18f   : > { %v6986_v39 = vpop.f32.mrf.mxu1 }
 0x190   : > { %9954 = vst [vmem:[#allocation63_spill] sm:$0xff] %v6986_v39  ;;  %v6988_v0 = vmax.f32 %v793_v1, 0.0  ;;  %4832 = vmatmul.msk.f32.gmra.mxu0 %vm886_vm1, %v6575_v3 }
 0x192   : > { %4752 = vmatmul.msk.f32.gmra.mxu1 %vm886_vm1, %v6988_v0  ;;  %4784 = vmatmul.msk.f32.gmra.mxu2 %vm886_vm1, %v6988_v0 }
 0x193   : > { %4816 = vmatmul.msk.f32.gmra.mxu3 %vm886_vm1, %v6988_v0 }
 0x195   : > { %v795_v55 = vpop.f32.mrf.mxu0 }
 0x196   : > { %v796_v34 = vadd.f32 %v6481_v30, %v795_v55 }
 0x197   : > { %v6999_v42 = vpop.f32.mrf.mxu1 }
 0x198   : > { %9955 = vst [vmem:[#allocation64_spill] sm:$0xff] %v6999_v42  ;;  %v7001_v54 = vmax.f32 %v796_v34, 0.0  ;;  %4833 = vmatmul.msk.f32.gmra.mxu0 %vm886_vm1, %v6605_v8  ;;  %v7024_v8 = vpop.f32.mrf.mxu2  ;;  %v7026_v34 = vpop.f32.mrf.mxu3 }
 0x19a   : > { %4753 = vmatmul.msk.f32.gmra.mxu1 %vm886_vm1, %v7001_v54  ;;  %4785 = vmatmul.msk.f32.gmra.mxu2 %vm886_vm1, %v7001_v54 }
 0x19b   : > { %4817 = vmatmul.msk.f32.gmra.mxu3 %vm886_vm1, %v7001_v54 }
 0x19d   : > { %v798_v3 = vpop.f32.mrf.mxu0 }
 0x19e   : > { %v799_v1 = vadd.f32 %v6481_v30, %v798_v3 }
 0x19f   : > { %v7012_v55 = vpop.f32.mrf.mxu1 }
 0x1a0   : > { %9956 = vst [vmem:[#allocation65_spill] sm:$0xff] %v7012_v55  ;;  %v7014_v6 = vmax.f32 %v799_v1, 0.0  ;;  %4834 = vmatmul.msk.f32.gmra.mxu0 %vm886_vm1, %v6635_v11  ;;  %v7044_v26 = vpop.f32.mrf.mxu3 }
 0x1a2   : > { %4754 = vmatmul.msk.f32.gmra.mxu1 %vm886_vm1, %v7014_v6  ;;  %4786 = vmatmul.msk.f32.gmra.mxu2 %vm886_vm1, %v7014_v6 }
 0x1a3   : > { %4818 = vmatmul.msk.f32.gmra.mxu3 %vm886_vm1, %v7014_v6 }
 0x1a5   : > { %v801_v3 = vpop.f32.mrf.mxu0 }
 0x1a6   : > { %v802_v1 = vadd.f32 %v6481_v30, %v801_v3  ;;  %v7041_v3 = vpop.f32.mrf.mxu2 }
 0x1a7   : > { %v7029_v50 = vpop.f32.mrf.mxu1 }
 0x1a8   : > { %9957 = vst [vmem:[#allocation66_spill] sm:$0xff] %v7029_v50  ;;  %v7031_v11 = vmax.f32 %v802_v1, 0.0  ;;  %4835 = vmatmul.msk.f32.gmra.mxu0 %vm886_vm1, %v6665_v20 }
 0x1aa   : > { %4755 = vmatmul.msk.f32.gmra.mxu1 %vm886_vm1, %v7031_v11  ;;  %4787 = vmatmul.msk.f32.gmra.mxu2 %vm886_vm1, %v7031_v11 }
 0x1ab   : > { %4819 = vmatmul.msk.f32.gmra.mxu3 %vm886_vm1, %v7031_v11 }
 0x1ad   : > { %v804_v7 = vpop.f32.mrf.mxu0 }
 0x1ae   : > { %v805_v1 = vadd.f32 %v6481_v30, %v804_v7  ;;  %v1860_v7 = vpack.c.bf16 %v547_v48, %v546_v15  ;;  %v7065_v47 = vpop.f32.mrf.mxu2  ;;  %v7071_v48 = vpop.f32.mrf.mxu3  ;;  %v542_v15 = vld [vmem:[%s6371_s27 + $0x50] sm:$0xff] }
 0x1af   : > { %v7046_v24 = vpop.f32.mrf.mxu1 }
 0x1b0   : > { %v7048_v20 = vmax.f32 %v805_v1, 0.0  ;;  %4836 = vmatmul.msk.f32.gmra.mxu0 %vm886_vm1, %v6701_v29  ;;  %1861 = vmatpush.bf16.msrb.mxu1 %v1860_v7  ;;  %v543_v7 = vld [vmem:[%s6371_s27 + $0x58] sm:$0xff] }
 0x1b1   : > { %v1858_v61 = vpack.c.bf16 %v543_v7, %v542_v15  ;;  %v538_v15 = vld [vmem:[%s6371_s27 + $0x30] sm:$0xff]  ;;  %v539_v7 = vld [vmem:[%s6371_s27 + $0x38] sm:$0xff] }
 0x1b2   : > { %4756 = vmatmul.msk.f32.gmra.mxu1 %vm886_vm1, %v7048_v20  ;;  %4788 = vmatmul.msk.f32.gmra.mxu2 %vm886_vm1, %v7048_v20 }
 0x1b3   : > { %4820 = vmatmul.msk.f32.gmra.mxu3 %vm886_vm1, %v7048_v20 }
 0x1b4   : > { %1862 = vmatpush.bf16.msrb.mxu1 %v1859_v60  ;;  %v541_v60 = vld [vmem:[%s6371_s27 + $0x48] sm:$0xff] }
 0x1b5   : > { %v807_v1 = vpop.f32.mrf.mxu0 }
 0x1b6   : > { %v808_v29 = vadd.f32 %v6481_v30, %v807_v1  ;;  %v7092_v13 = vpop.f32.mrf.mxu2 }
 0x1b7   : > { %v7063_v53 = vpop.f32.mrf.mxu1 }
 0x1b8   : > { %v7067_v5 = vmax.f32 %v808_v29, 0.0  ;;  %4837 = vmatmul.msk.f32.gmra.mxu0 %vm886_vm1, %v6737_v21  ;;  %1863 = vmatpush.bf16.msrb.mxu1 %v1858_v61  ;;  %v540_v21 = vld [vmem:[%s6371_s27 + $0x40] sm:$0xff]  ;;  %v1856_v61 = vpack.c.bf16 %v539_v7, %v538_v15  ;;  %v534_v15 = vld [vmem:[%s6371_s27 + $0x10] sm:$0xff]  ;;  %v535_v7 = vld [vmem:[%s6371_s27 + $0x18] sm:$0xff] }
 0x1b9   : > { %v1857_v29 = vpack.c.bf16 %v541_v60, %v540_v21  ;;  %v536_v21 = vld [vmem:[%s6371_s27 + $0x20] sm:$0xff]  ;;  %v537_v60 = vld [vmem:[%s6371_s27 + $0x28] sm:$0xff] }
 0x1ba   : > { %4757 = vmatmul.msk.f32.gmra.mxu1 %vm886_vm1, %v7067_v5  ;;  %4789 = vmatmul.msk.f32.gmra.mxu2 %vm886_vm1, %v7067_v5 }
 0x1bb   : > { %4821 = vmatmul.msk.f32.gmra.mxu3 %vm886_vm1, %v7067_v5 }
 0x1bc   : > { %1864 = vmatpush.bf16.msrb.mxu1 %v1857_v29  ;;  %v1855_v29 = vpack.c.bf16 %v537_v60, %v536_v21 }
 0x1bd   : > { %v810_v57 = vpop.f32.mrf.mxu0 }
 0x1be   : > { %v811_v1 = vadd.f32 %v6481_v30, %v810_v57  ;;  %v7098_v57 = vpop.f32.mrf.mxu3 }
 0x1bf   : > { %v7084_v41 = vpop.f32.mrf.mxu1 }
 0x1c0   : > { %v7086_v46 = vmax.f32 %v811_v1, 0.0  ;;  %4838 = vmatmul.msk.f32.gmra.mxu0 %vm886_vm1, %v6774_v22  ;;  %1865 = vmatpush.bf16.msrb.mxu1 %v1856_v61  ;;  %v1854_v61 = vpack.c.bf16 %v535_v7, %v534_v15 }
 0x1c2   : > { %4758 = vmatmul.msk.f32.gmra.mxu1 %vm886_vm1, %v7086_v46  ;;  %4790 = vmatmul.msk.f32.gmra.mxu2 %vm886_vm1, %v7086_v46 }
 0x1c3   : > { %4822 = vmatmul.msk.f32.gmra.mxu3 %vm886_vm1, %v7086_v46 }
 0x1c4   : > { %1866 = vmatpush.bf16.msrb.mxu1 %v1855_v29 }
 0x1c5   : > { %v813_v22 = vpop.f32.mrf.mxu0 }
 0x1c6   : > { %v814_v1 = vadd.f32 %v6481_v30, %v813_v22  ;;  %v7119_v22 = vpop.f32.mrf.mxu2  ;;  %v7121_v21 = vpop.f32.mrf.mxu3 }
 0x1c7   : > { %v7105_v14 = vpop.f32.mrf.mxu1 }
 0x1c8   : > { %9958 = vst [vmem:[#allocation67_spill] sm:$0xff] %v7105_v14  ;;  %v7107_v44 = vmax.f32 %v814_v1, 0.0  ;;  %4839 = vmatmul.msk.f32.gmra.mxu0 %vm886_vm1, %v6807_v25  ;;  %1867 = vmatpush.bf16.msrb.mxu1 %v1854_v61  ;;  %v532_v25 = vld [vmem:[%s6371_s27] sm:$0xff]  ;;  %v533_v1 = vld [vmem:[%s6371_s27 + $0x8] sm:$0xff] }
 0x1c9   : > { %v1853_v17 = vpack.c.bf16 %v533_v1, %v532_v25 }
 0x1ca   : > { %4759 = vmatmul.msk.f32.gmra.mxu1 %vm886_vm1, %v7107_v44  ;;  %4791 = vmatmul.msk.f32.gmra.mxu2 %vm886_vm1, %v7107_v44 }
 0x1cb   : > { %4823 = vmatmul.msk.f32.gmra.mxu3 %vm886_vm1, %v7107_v44 }
 0x1cc   : > { %1868 = vmatpush.bf16.msrb.mxu1 %v1853_v17 }
 0x1cd   : > { %v816_v60 = vpop.f32.mrf.mxu0 }
 0x1ce   : > { %v817_v29 = vadd.f32 %v6481_v30, %v816_v60  ;;  %v7138_v7 = vpop.f32.mrf.mxu2  ;;  %v7141_v60 = vpop.f32.mrf.mxu3 }
 0x1cf   : > { %v7126_v16 = vpop.f32.mrf.mxu1 }
 0x1d0   : > { %9959 = vst [vmem:[#allocation68_spill] sm:$0xff] %v7126_v16  ;;  %v7128_v10 = vmax.f32 %v817_v29, 0.0  ;;  %4840 = vmatmul.msk.f32.gmra.mxu0 %vm886_vm1, %v6836_v43 }
 0x1d2   : > { %4760 = vmatmul.msk.f32.gmra.mxu1 %vm886_vm1, %v7128_v10  ;;  %4792 = vmatmul.msk.f32.gmra.mxu2 %vm886_vm1, %v7128_v10 }
 0x1d3   : > { %4824 = vmatmul.msk.f32.gmra.mxu3 %vm886_vm1, %v7128_v10 }
 0x1d5   : > { %v819_v15 = vpop.f32.mrf.mxu0 }
 0x1d6   : > { %v820_v61 = vadd.f32 %v6481_v30, %v819_v15  ;;  %v7158_v15 = vpop.f32.mrf.mxu2 }
 0x1d7   : > { %v7143_v25 = vpop.f32.mrf.mxu1 }
 0x1d8   : > { %9960 = vst [vmem:[#allocation69_spill] sm:$0xff] %v7143_v25  ;;  %v7145_v43 = vmax.f32 %v820_v61, 0.0  ;;  %4841 = vmatmul.msk.f32.gmra.mxu0 %vm886_vm1, %v6869_v19  ;;  %v7164_v19 = vpop.f32.mrf.mxu3  ;;  %v5724_v25 = vld [vmem:[%s6379_s3 + $0x70] sm:$0xff] }
 0x1da   : > { %4761 = vmatmul.msk.f32.gmra.mxu1 %vm886_vm1, %v7145_v43  ;;  %4793 = vmatmul.msk.f32.gmra.mxu2 %vm886_vm1, %v7145_v43 }
 0x1db   : > { %4825 = vmatmul.msk.f32.gmra.mxu3 %vm886_vm1, %v7145_v43 }
 0x1dd   : > { %v822_v17 = vpop.f32.mrf.mxu0 }
 0x1de   : > { %v823_v1 = vadd.f32 %v6481_v30, %v822_v17  ;;  %v7181_v18 = vpop.f32.mrf.mxu2 }
 0x1df   : > { %v7156_v29 = vpop.f32.mrf.mxu1 }
 0x1e0   : > { %9961 = vst [vmem:[#allocation70_spill] sm:$0xff] %v7156_v29  ;;  %v7160_v61 = vmax.f32 %v823_v1, 0.0  ;;  %4842 = vmatmul.msk.f32.gmra.mxu0 %vm886_vm1, %v6890_v37  ;;  %v7179_v37 = vand.u32 127, %v1435_v62  ;;  %v7187_v45 = vpop.f32.mrf.mxu3 }
 0x1e2   : > { %4762 = vmatmul.msk.f32.gmra.mxu1 %vm886_vm1, %v7160_v61  ;;  %4794 = vmatmul.msk.f32.gmra.mxu2 %vm886_vm1, %v7160_v61  ;;  %9963 = vst [vmem:[#allocation72_spill] sm:$0xff] %v7179_v37  ;;  %vm1533_vm5 = vcmp.eq.s32.totalorder %v7179_v37, %v1439_v33 }
 0x1e3   : > { %4826 = vmatmul.msk.f32.gmra.mxu3 %vm886_vm1, %v7160_v61 }
 0x1e5   : > { %v825_v17 = vpop.f32.mrf.mxu0 }
 0x1e6   : > { %v826_v1 = vadd.f32 %v6481_v30, %v825_v17  ;;  %v1442_v30 = vpop.permute.xlu0 %1441 }
 0x1e7   : > { %v7173_v12 = vpop.f32.mrf.mxu1  ;;  %vm1534_vm6 = vcmp.eq.s32.totalorder %v7179_v37, %v1442_v30  ;;  %v1451_v30 = vpop.permute.xlu2 %1450 }
 0x1e8   : > { %9962 = vst [vmem:[#allocation71_spill] sm:$0xff] %v7173_v12  ;;  %v7175_v35 = vmax.f32 %v826_v1, 0.0  ;;  %4843 = vmatmul.msk.f32.gmra.mxu0 %vm886_vm1, %v6908_v36  ;;  %vm4924_vm7 = vmpackc.low %vm1534_vm6, %vm1533_vm5  ;;  %v9861_v36 = vmov 1.0|1.0   ;;  %v1445_v1 = vpop.permute.xlu1 %1444  ;;  %vm1537_vm11 = vcmp.eq.s32.totalorder %v7179_v37, %v1451_v30 }
 0x1e9   : > { %vm1535_vm8 = vcmp.eq.s32.totalorder %v7179_v37, %v1445_v1 }
 0x1ea   : > { %4763 = vmatmul.msk.f32.gmra.mxu1 %vm886_vm1, %v7175_v35  ;;  %4795 = vmatmul.msk.f32.gmra.mxu2 %vm886_vm1, %v7175_v35 }
 0x1eb   : > { %4827 = vmatmul.msk.f32.gmra.mxu3 %vm886_vm1, %v7175_v35 }
 0x1ed   : > { %v7191_v17 = vpop.f32.mrf.mxu0 }
 0x1ee   : > { %9964 = vst [vmem:[#allocation73_spill] sm:$0xff] %v7191_v17  ;;  %v1457_v32 = vpop.permute.xlu0 %1456 }
 0x1ef   : > { %v7195_v62 = vpop.f32.mrf.mxu1  ;;  %vm1539_vm15 = vcmp.eq.s32.totalorder %v7179_v37, %v1457_v32 }
 0x1f0   : > { %9965 = vst [vmem:[#allocation74_spill] sm:$0xff] %v7195_v62  ;;  %4844 = vmatmul.msk.f32.gmra.mxu0 %vm886_vm1, %v6928_v59  ;;  %v1448_v33 = vpop.permute.xlu1 %1447  ;;  %v5719_v62 = vld [vmem:[%s6379_s3 + $0x48] sm:$0xff] }
 0x1f1   : > { %vm1536_vm9 = vcmp.eq.s32.totalorder %v7179_v37, %v1448_v33  ;;  %v7225_v33 = vpop.f32.mrf.mxu2 }
 0x1f2   : > { %4925 = vmatmul.msk.bf16.vlgmr.msrb.gmra.mxu1 %vm4924_vm7, %v9861_v36  ;;  %vm4926_vm10 = vmpackc.low %vm1536_vm9, %vm1535_vm8 }
 0x1f5   : > { %v7200_v4 = vpop.f32.mrf.mxu0 }
 0x1f6   : > { %9966 = vst [vmem:[#allocation75_spill] sm:$0xff] %v7200_v4  ;;  %v1466_v32 = vpop.permute.xlu0 %1465 }
 0x1f7   : > { %v7202_v31 = vpop.f32.mrf.mxu1  ;;  %vm1542_vm3 = vcmp.eq.s32.totalorder %v7179_v37, %v1466_v32 }
 0x1f8   : > { %9967 = vst [vmem:[#allocation76_spill] sm:$0xff] %v7202_v31  ;;  %4845 = vmatmul.msk.f32.gmra.mxu0 %vm886_vm1, %v6941_v9  ;;  %v1454_v9 = vpop.permute.xlu2 %1453 }
 0x1f9   : > { %vm1538_vm12 = vcmp.eq.s32.totalorder %v7179_v37, %v1454_v9  ;;  %v7238_v40 = vpop.f32.mrf.mxu2  ;;  %v1460_v9 = vpop.permute.xlu1 %1459 }
 0x1fa   : > { %vm4928_vm13 = vmpackc.low %vm1538_vm12, %vm1537_vm11  ;;  %9977 = vst [vmem:[#allocation85_spill] sm:$0xff] %v7238_v40  ;;  %vm1540_vm14 = vcmp.eq.s32.totalorder %v7179_v37, %v1460_v9  ;;  %vm2027_vm11 = vcmask 1043456  }
 0x1fb   : > { %vm4930_vm2 = vmpackc.low %vm1540_vm14, %vm1539_vm15 }
 0x1fd   : > { %v7206_v27 = vpop.f32.mrf.mxu0 }
 0x1fe   : > { %9968 = vst [vmem:[#allocation77_spill] sm:$0xff] %v7206_v27 }
 0x1ff   : > { %v7210_v59 = vpop.f32.mrf.mxu1 }
 0x200   : > { %9969 = vst [vmem:[#allocation78_spill] sm:$0xff] %v7210_v59  ;;  %4846 = vmatmul.msk.f32.gmra.mxu0 %vm886_vm1, %v6962_v56  ;;  %v7227_v56 = vpop.f32.mrf.mxu3  ;;  %v1463_v9 = vpop.permute.xlu2 %1462  ;;  %v5716_v59 = vld [vmem:[%s6379_s3 + $0x20] sm:$0xff] }
 0x201   : > { %v7252_v40 = vpop.f32.mrf.mxu2  ;;  %vm1541_vm4 = vcmp.eq.s32.totalorder %v7179_v37, %v1463_v9  ;;  %v1469_v32 = vpop.permute.xlu1 %1468 }
 0x202   : > { %4927 = vmatmul.msk.bf16.gmra.mxu1 %vm4926_vm10, %v9861_v36  ;;  %vm4932_vm0 = vmpackc.low %vm1542_vm3, %vm1541_vm4  ;;  %vm1543_vm5 = vcmp.eq.s32.totalorder %v7179_v37, %v1469_v32 }
 0x205   : > { %v7215_v52 = vpop.f32.mrf.mxu0 }
 0x206   : > { %9970 = vst [vmem:[#allocation79_spill] sm:$0xff] %v7215_v52 }
 0x207   : > { %v7217_v49 = vpop.f32.mrf.mxu1 }
 0x208   : > { %9971 = vst [vmem:[#allocation80_spill] sm:$0xff] %v7217_v49  ;;  %4847 = vmatmul.msk.f32.gmra.mxu0 %vm886_vm1, %v6975_v38  ;;  %v7242_v30 = vpop.f32.mrf.mxu3  ;;  %v1472_v9 = vpop.permute.xlu2 %1471 }
 0x209   : > { %9978 = vst [vmem:[#allocation86_spill] sm:$0xff] %v7242_v30  ;;  %vm1544_vm6 = vcmp.eq.s32.totalorder %v7179_v37, %v1472_v9 }
 0x20a   : > { %vm4934_vm7 = vmpackc.low %vm1544_vm6, %vm1543_vm5 }
 0x20d   : > { %v7221_v1 = vpop.f32.mrf.mxu0 }
 0x20e   : > { %9972 = vst [vmem:[#allocation81_spill] sm:$0xff] %v7221_v1 }
 0x20f   : > { %v7229_v36 = vpop.f32.mrf.mxu1 }
 0x210   : > { %9973 = vst [vmem:[#allocation82_spill] sm:$0xff] %v7229_v36  ;;  %4848 = vmatmul.msk.f32.gmra.mxu0 %vm886_vm1, %v6988_v0 }
 0x212   : > { %4929 = vmatmul.msk.bf16.gmra.mxu1 %vm4928_vm13, %v9974_v51 }
 0x215   : > { %v7234_v38 = vpop.f32.mrf.mxu0 }
 0x216   : > { %9975 = vst [vmem:[#allocation83_spill] sm:$0xff] %v7234_v38 }
 0x217   : > { %v7236_v63 = vpop.f32.mrf.mxu1 }
 0x218   : > { %9976 = vst [vmem:[#allocation84_spill] sm:$0xff] %v7236_v63  ;;  %4849 = vmatmul.msk.f32.gmra.mxu0 %vm886_vm1, %v7001_v54  ;;  %v7255_v54 = vpop.f32.mrf.mxu3 }
 0x21d   : > { %v7244_v55 = vpop.f32.mrf.mxu0 }
 0x21e   : > { %9979 = vst [vmem:[#allocation87_spill] sm:$0xff] %v7244_v55 }
 0x21f   : > { %v7248_v0 = vpop.f32.mrf.mxu1 }
 0x220   : > { %9980 = vst [vmem:[#allocation88_spill] sm:$0xff] %v7248_v0  ;;  %4850 = vmatmul.msk.f32.gmra.mxu0 %vm886_vm1, %v7014_v6  ;;  %v7263_v0 = vpop.f32.mrf.mxu2  ;;  %v7265_v55 = vpop.f32.mrf.mxu3 }
 0x221   : > { %9983 = vst [vmem:[#allocation91_spill] sm:$0xff] %v7263_v0 }
 0x222   : > { %4931 = vmatmul.msk.bf16.gmra.mxu1 %vm4930_vm2, %v9974_v51  ;;  %9984 = vst [vmem:[#allocation92_spill] sm:$0xff] %v7265_v55 }
 0x225   : > { %v7257_v30 = vpop.f32.mrf.mxu0 }
 0x226   : > { %9981 = vst [vmem:[#allocation89_spill] sm:$0xff] %v7257_v30 }
 0x227   : > { %v7259_v63 = vpop.f32.mrf.mxu1 }
 0x228   : > { %9982 = vst [vmem:[#allocation90_spill] sm:$0xff] %v7259_v63  ;;  %4851 = vmatmul.msk.f32.gmra.mxu0 %vm886_vm1, %v7031_v11  ;;  %v7278_v63 = vpop.f32.mrf.mxu2  ;;  %v7280_v0 = vpop.f32.mrf.mxu3 }
 0x229   : > { %9988 = vst [vmem:[#allocation96_spill] sm:$0xff] %v7278_v63  ;;  %v5725_v63 = vld [vmem:[%s6379_s3 + $0x78] sm:$0xff] }
 0x22a   : > { %9989 = vst [vmem:[#allocation97_spill] sm:$0xff] %v7280_v0  ;;  %v2403_v16 = vpack.c.bf16 %v5725_v63, %v5724_v25  ;;  %v5726_v25 = vld [vmem:[%s6379_s3 + $0x60] sm:$0xff] }
 0x22d   : > { %v7267_v6 = vpop.f32.mrf.mxu0 }
 0x22e   : > { %9985 = vst [vmem:[#allocation93_spill] sm:$0xff] %v7267_v6 }
 0x22f   : > { %v7271_v50 = vpop.f32.mrf.mxu1 }
 0x230   : > { %9986 = vst [vmem:[#allocation94_spill] sm:$0xff] %v7271_v50  ;;  %4852 = vmatmul.msk.f32.gmra.mxu0 %vm886_vm1, %v7048_v20 }
 0x232   : > { %4933 = vmatmul.msk.bf16.gmra.mxu1 %vm4932_vm0, %v9974_v51 }
 0x235   : > { %v7276_v11 = vpop.f32.mrf.mxu0 }
 0x236   : > { %9987 = vst [vmem:[#allocation95_spill] sm:$0xff] %v7276_v11  ;;  %v7292_v11 = vpop.f32.mrf.mxu2 }
 0x237   : > { %v7282_v55 = vpop.f32.mrf.mxu1  ;;  %9993 = vst [vmem:[#allocation101_spill] sm:$0xff] %v7292_v11  ;;  %v1478_v11 = vpop.permute.xlu1 %1477 }
 0x238   : > { %9990 = vst [vmem:[#allocation98_spill] sm:$0xff] %v7282_v55  ;;  %4853 = vmatmul.msk.f32.gmra.mxu0 %vm886_vm1, %v7067_v5  ;;  %v7296_v55 = vpop.f32.mrf.mxu3  ;;  %vm1546_vm8 = vcmp.eq.s32.totalorder %v7179_v37, %v1478_v11 }
 0x239   : > { %9994 = vst [vmem:[#allocation102_spill] sm:$0xff] %v7296_v55 }
 0x23d   : > { %v7286_v50 = vpop.f32.mrf.mxu0 }
 0x23e   : > { %9991 = vst [vmem:[#allocation99_spill] sm:$0xff] %v7286_v50  ;;  %v7305_v32 = vpop.f32.mrf.mxu2 }
 0x23f   : > { %v7290_v20 = vpop.f32.mrf.mxu1  ;;  %9997 = vst [vmem:[#allocation105_spill] sm:$0xff] %v7305_v32 }
 0x240   : > { %9992 = vst [vmem:[#allocation100_spill] sm:$0xff] %v7290_v20  ;;  %4854 = vmatmul.msk.f32.gmra.mxu0 %vm886_vm1, %v7086_v46  ;;  %v7307_v9 = vpop.f32.mrf.mxu3  ;;  %v1475_v20 = vpop.permute.xlu0 %1474 }
 0x241   : > { %9998 = vst [vmem:[#allocation106_spill] sm:$0xff] %v7307_v9  ;;  %vm1545_vm9 = vcmp.eq.s32.totalorder %v7179_v37, %v1475_v20 }
 0x242   : > { %4935 = vmatmul.msk.bf16.gmra.mxu1 %vm4934_vm7, %v9974_v51  ;;  %vm4936_vm10 = vmpackc.low %vm1546_vm8, %vm1545_vm9 }
 0x245   : > { %v7299_v5 = vpop.f32.mrf.mxu0 }
 0x246   : > { %9995 = vst [vmem:[#allocation103_spill] sm:$0xff] %v7299_v5 }
 0x247   : > { %v7301_v6 = vpop.f32.mrf.mxu1 }
 0x248   : > { %9996 = vst [vmem:[#allocation104_spill] sm:$0xff] %v7301_v6  ;;  %4855 = vmatmul.msk.f32.gmra.mxu0 %vm886_vm1, %v7107_v44  ;;  %v1966_v44 = vld [vmem:[#allocation11] sm:$0xff]  ;;  %v7318_v6 = vld [vmem:[#allocation11 + $0x8] sm:$0xff]  ;;  %v7323_v11 = vpop.f32.mrf.mxu3 }
 0x249   : > { %v1970_v55 = vunpack.c.l.b16 %v1966_v44  ;;  %v1971_v5 = vunpack.c.h.b16 %v1966_v44  ;;  %v1972_v30 = vunpack.c.l.b16 %v7318_v6  ;;  %10002 = vst [vmem:[#allocation110_spill] sm:$0xff] %v7323_v11  ;;  %v1484_v11 = vpop.permute.xlu0 %1483 }
 0x24a   : > { %vm1548_vm12 = vcmp.eq.s32.totalorder %v7179_v37, %v1484_v11 }
 0x24b   : > { %v1975_v36 = vpack.c.b16 %v1971_v5, %v1971_v5  ;;  %v1976_v38 = vpack.c.b16 %v1972_v30, %v1972_v30 }
 0x24d   : > { %v7309_v50 = vpop.f32.mrf.mxu0  ;;  %v2032_v49 = vsel %vm2027_vm11, %v1975_v36, 0  ;;  %v2035_v44 = vsel %vm2027_vm11, %v1976_v38, 0  ;;  %v1487_v38 = vpop.permute.xlu1 %1486 }
 0x24e   : > { %9999 = vst [vmem:[#allocation107_spill] sm:$0xff] %v7309_v50  ;;  %v7321_v50 = vpop.f32.mrf.mxu2  ;;  %2136 = vmatpush.bf16.msra.mxu3 %v2032_v49  ;;  %2225 = vmatpush.bf16.msra.mxu0 %v2035_v44  ;;  %vm1549_vm15 = vcmp.eq.s32.totalorder %v7179_v37, %v1487_v38 }
 0x24f   : > { %v7313_v46 = vpop.f32.mrf.mxu1  ;;  %10001 = vst [vmem:[#allocation109_spill] sm:$0xff] %v7321_v50  ;;  %v1481_v50 = vpop.permute.xlu2 %1480 }
 0x250   : > { %10000 = vst [vmem:[#allocation108_spill] sm:$0xff] %v7313_v46  ;;  %4856 = vmatmul.msk.f32.gmra.mxu0 %vm886_vm1, %v7128_v10  ;;  %v1974_v46 = vpack.c.b16 %v1970_v55, %v1970_v55  ;;  %vm1547_vm13 = vcmp.eq.s32.totalorder %v7179_v37, %v1481_v50  ;;  %v7340_v5 = vpop.f32.mrf.mxu3 }
 0x251   : > { %10007 = vst [vmem:[#allocation115_spill] sm:$0xff] %v7340_v5  ;;  %vm4938_vm14 = vmpackc.low %vm1548_vm12, %vm1547_vm13 }
 0x252   : > { %4937 = vmatmul.msk.bf16.gmra.mxu1 %vm4936_vm10, %v9974_v51  ;;  %v2029_v1 = vsel %vm2027_vm11, %v1974_v46, 0 }
 0x253   : > { %2047 = vmatpush.bf16.msra.mxu2 %v2029_v1 }
 0x255   : > { %v7325_v20 = vpop.f32.mrf.mxu0  ;;  %v1496_v38 = vpop.permute.xlu1 %1495 }
 0x256   : > { %10003 = vst [vmem:[#allocation111_spill] sm:$0xff] %v7325_v20  ;;  %v7338_v30 = vpop.f32.mrf.mxu2  ;;  %vm1552_vm4 = vcmp.eq.s32.totalorder %v7179_v37, %v1496_v38 }
 0x257   : > { %v7327_v10 = vpop.f32.mrf.mxu1  ;;  %10006 = vst [vmem:[#allocation114_spill] sm:$0xff] %v7338_v30  ;;  %v1490_v46 = vpop.permute.xlu2 %1489  ;;  %v5718_v30 = vld [vmem:[%s6379_s3 + $0x40] sm:$0xff] }
 0x258   : > { %10004 = vst [vmem:[#allocation112_spill] sm:$0xff] %v7327_v10  ;;  %4857 = vmatmul.msk.f32.gmra.mxu0 %vm886_vm1, %v7145_v43  ;;  %v7355_v50 = vpop.f32.mrf.mxu3  ;;  %vm1550_vm2 = vcmp.eq.s32.totalorder %v7179_v37, %v1490_v46  ;;  %v1493_v46 = vpop.permute.xlu0 %1492  ;;  %v2400_v5 = vpack.c.bf16 %v5719_v62, %v5718_v30  ;;  %v5720_v30 = vld [vmem:[%s6379_s3 + $0x30] sm:$0xff] }
 0x259   : > { %10012 = vst [vmem:[#allocation120_spill] sm:$0xff] %v7355_v50  ;;  %vm4940_vm3 = vmpackc.low %vm1550_vm2, %vm1549_vm15  ;;  %vm1551_vm0 = vcmp.eq.s32.totalorder %v7179_v37, %v1493_v46 }
 0x25a   : > { %vm4942_vm5 = vmpackc.low %vm1552_vm4, %vm1551_vm0 }
 0x25d   : > { %v7334_v55 = vpop.f32.mrf.mxu0 }
 0x25e   : > { %10005 = vst [vmem:[#allocation113_spill] sm:$0xff] %v7334_v55  ;;  %v7351_v1 = vpop.f32.mrf.mxu2 }
 0x25f   : > { %v7342_v36 = vpop.f32.mrf.mxu1  ;;  %10011 = vst [vmem:[#allocation119_spill] sm:$0xff] %v7351_v1  ;;  %v1499_v46 = vpop.permute.xlu2 %1498 }
 0x260   : > { %10008 = vst [vmem:[#allocation116_spill] sm:$0xff] %v7342_v36  ;;  %4858 = vmatmul.msk.f32.gmra.mxu0 %vm886_vm1, %v7160_v61  ;;  %v1502_v38 = vpop.permute.xlu0 %1501  ;;  %vm1553_vm7 = vcmp.eq.s32.totalorder %v7179_v37, %v1499_v46  ;;  %v1505_v46 = vpop.permute.xlu1 %1504 }
 0x261   : > { %vm1554_vm6 = vcmp.eq.s32.totalorder %v7179_v37, %v1502_v38  ;;  %vm1555_vm9 = vcmp.eq.s32.totalorder %v7179_v37, %v1505_v46 }
 0x262   : > { %4939 = vmatmul.msk.bf16.gmra.mxu1 %vm4938_vm14, %v9974_v51  ;;  %vm4944_vm8 = vmpackc.low %vm1554_vm6, %vm1553_vm7 }
 0x265   : > { %v7347_v49 = vpop.f32.mrf.mxu0 }
 0x266   : > { %10009 = vst [vmem:[#allocation117_spill] sm:$0xff] %v7347_v49  ;;  %v7361_v44 = vpop.f32.mrf.mxu2 }
 0x267   : > { %v7349_v43 = vpop.f32.mrf.mxu1  ;;  %10014 = vst [vmem:[#allocation122_spill] sm:$0xff] %v7361_v44 }
 0x268   : > { %10010 = vst [vmem:[#allocation118_spill] sm:$0xff] %v7349_v43  ;;  %4859 = vmatmul.msk.f32.gmra.mxu0 %vm886_vm1, %v7175_v35  ;;  %v7364_v43 = vpop.f32.mrf.mxu3  ;;  %vm1978_vm1 = vcmask 64512   ;;  %v1511_v46 = vpop.permute.xlu0 %1510 }
 0x269   : > { %10015 = vst [vmem:[#allocation123_spill] sm:$0xff] %v7364_v43  ;;  %vm1557_vm14 = vcmp.eq.s32.totalorder %v7179_v37, %v1511_v46  ;;  %v5717_v43 = vld [vmem:[%s6379_s3 + $0x28] sm:$0xff] }
 0x26a   : > { %v2398_v52 = vpack.c.bf16 %v5717_v43, %v5716_v59 }
 0x26c   : > { %2433 = vrot.lane.b32.xlu1 %v2398_v52, %s6133_s11 }
 0x26d   : > { %v7357_v11 = vpop.f32.mrf.mxu0 }
 0x26e   : > { %10013 = vst [vmem:[#allocation121_spill] sm:$0xff] %v7357_v11  ;;  %v7376_v11 = vpop.f32.mrf.mxu2 }
 0x26f   : > { %v1870_v61 = vpop.f32.mrf.mxu1  ;;  %10017 = vst [vmem:[#allocation125_spill] sm:$0xff] %v7376_v11 }
 0x270   : > { %v7378_v36 = vpop.f32.mrf.mxu3 }
 0x271   : > { %10018 = vst [vmem:[#allocation126_spill] sm:$0xff] %v7378_v36 }
 0x272   : > { %4941 = vmatmul.msk.bf16.gmra.mxu1 %vm4940_vm3, %v9974_v51 }
 0x275   : > { %v7366_v1 = vpop.f32.mrf.mxu0 }
 0x276   : > { %10016 = vst [vmem:[#allocation124_spill] sm:$0xff] %v7366_v1  ;;  %v7387_v49 = vpop.f32.mrf.mxu2 }
 0x277   : > { %v1872_v35 = vpop.f32.mrf.mxu1  ;;  %10021 = vst [vmem:[#allocation129_spill] sm:$0xff] %v7387_v49 }
 0x278   : > { %v7368_v50 = vpack.c.bf16 %v1872_v35, %v1870_v61  ;;  %v7389_v10 = vpop.f32.mrf.mxu3 }
 0x279   : > { %10022 = vst [vmem:[#allocation130_spill] sm:$0xff] %v7389_v10 }
 0x27a   : > { %4956 = vmatmul.msk.bf16.vlgmr.msra.gmra.mxu2 %vm1978_vm1, %v7368_v50  ;;  %4972 = vmatmul.msk.bf16.vlgmr.msra.gmra.mxu3 %vm1978_vm1, %v7368_v50 }
 0x27b   : > { %4988 = vmatmul.msk.bf16.vlgmr.msra.gmra.mxu0 %vm1978_vm1, %v7368_v50 }
 0x27d   : > { %v7380_v1 = vpop.f32.mrf.mxu0 }
 0x27e   : > { %10019 = vst [vmem:[#allocation127_spill] sm:$0xff] %v7380_v1 }
 0x27f   : > { %v1875_v61 = vpop.f32.mrf.mxu1 }
 0x282   : > { %4943 = vmatmul.msk.bf16.gmra.mxu1 %vm4942_vm5, %v9974_v51 }
 0x285   : > { %v7385_v35 = vpop.f32.mrf.mxu0 }
 0x286   : > { %10020 = vst [vmem:[#allocation128_spill] sm:$0xff] %v7385_v35 }
 0x287   : > { %v1877_v55 = vpop.f32.mrf.mxu1 }
 0x288   : > { %v7391_v11 = vpack.c.bf16 %v1877_v55, %v1875_v61  ;;  %v7403_v55 = vpop.f32.mrf.mxu2  ;;  %v7405_v61 = vpop.f32.mrf.mxu3 }
 0x289   : > { %10024 = vst [vmem:[#allocation132_spill] sm:$0xff] %v7403_v55 }
 0x28a   : > { %4957 = vmatmul.msk.bf16.gmra.mxu2 %vm1978_vm1, %v7391_v11  ;;  %4973 = vmatmul.msk.bf16.gmra.mxu3 %vm1978_vm1, %v7391_v11  ;;  %10025 = vst [vmem:[#allocation133_spill] sm:$0xff] %v7405_v61  ;;  %v1508_v61 = vpop.permute.xlu2 %1507 }
 0x28b   : > { %4989 = vmatmul.msk.bf16.gmra.mxu0 %vm1978_vm1, %v7391_v11  ;;  %vm1556_vm10 = vcmp.eq.s32.totalorder %v7179_v37, %v1508_v61  ;;  %v1514_v61 = vpop.permute.xlu1 %1513 }
 0x28c   : > { %vm4946_vm12 = vmpackc.low %vm1556_vm10, %vm1555_vm9  ;;  %vm1558_vm13 = vcmp.eq.s32.totalorder %v7179_v37, %v1514_v61  ;;  %vm2516_vm9 = vcmask 1041408   ;;  %vm2467_vm10 = vcmask 31744  }
 0x28d   : > { %v7399_v36 = vpop.f32.mrf.mxu0  ;;  %vm4948_vm15 = vmpackc.low %vm1558_vm13, %vm1557_vm14 }
 0x28e   : > { %10023 = vst [vmem:[#allocation131_spill] sm:$0xff] %v7399_v36 }
 0x28f   : > { %v1880_v35 = vpop.f32.mrf.mxu1 }
 0x290   : > { %v7412_v10 = vpop.f32.mrf.mxu2  ;;  %v7418_v38 = vpop.f32.mrf.mxu3 }
 0x291   : > { %10027 = vst [vmem:[#allocation135_spill] sm:$0xff] %v7412_v10 }
 0x292   : > { %4945 = vmatmul.msk.bf16.gmra.mxu1 %vm4944_vm8, %v9974_v51  ;;  %10028 = vst [vmem:[#allocation136_spill] sm:$0xff] %v7418_v38 }
 0x295   : > { %v7408_v1 = vpop.f32.mrf.mxu0 }
 0x296   : > { %10026 = vst [vmem:[#allocation134_spill] sm:$0xff] %v7408_v1 }
 0x297   : > { %v1882_v20 = vpop.f32.mrf.mxu1 }
 0x298   : > { %v7410_v49 = vpack.c.bf16 %v1882_v20, %v1880_v35  ;;  %v7427_v35 = vpop.f32.mrf.mxu2  ;;  %v7429_v1 = vpop.f32.mrf.mxu3 }
 0x299   : > { %10030 = vst [vmem:[#allocation138_spill] sm:$0xff] %v7427_v35 }
 0x29a   : > { %4958 = vmatmul.msk.bf16.gmra.mxu2 %vm1978_vm1, %v7410_v49  ;;  %4974 = vmatmul.msk.bf16.gmra.mxu3 %vm1978_vm1, %v7410_v49  ;;  %10031 = vst [vmem:[#allocation139_spill] sm:$0xff] %v7429_v1  ;;  %v1973_v1 = vunpack.c.h.b16 %v7318_v6  ;;  %v1517_v6 = vpop.permute.xlu2 %1516 }
 0x29b   : > { %4990 = vmatmul.msk.bf16.gmra.mxu0 %vm1978_vm1, %v7410_v49  ;;  %vm1559_vm2 = vcmp.eq.s32.totalorder %v7179_v37, %v1517_v6 }
 0x29c   : > { %v1977_v35 = vpack.c.b16 %v1973_v1, %v1973_v1  ;;  %v1520_v1 = vpop.permute.xlu0 %1519 }
 0x29d   : > { %v7422_v55 = vpop.f32.mrf.mxu0 }
 0x29e   : > { %10029 = vst [vmem:[#allocation137_spill] sm:$0xff] %v7422_v55  ;;  %v2038_v42 = vsel %vm2027_vm11, %v1977_v35, 0  ;;  %vm1560_vm11 = vcmp.eq.s32.totalorder %v7179_v37, %v1520_v1 }
 0x29f   : > { %v1885_v20 = vpop.f32.mrf.mxu1  ;;  %2314 = vmatpush.bf16.msra.mxu1 %v2038_v42  ;;  %vm4950_vm3 = vmpackc.low %vm1560_vm11, %vm1559_vm2 }
 0x2a2   : > { %4947 = vmatmul.msk.bf16.gmra.mxu1 %vm4946_vm12, %v9974_v51  ;;  %v1526_v6 = vpop.permute.xlu2 %1525 }
 0x2a3   : > { %vm1562_vm0 = vcmp.eq.s32.totalorder %v7179_v37, %v1526_v6 }
 0x2a4   : > { %v1529_v6 = vpop.permute.xlu0 %1528 }
 0x2a5   : > { %v7431_v36 = vpop.f32.mrf.mxu0  ;;  %vm1563_vm7 = vcmp.eq.s32.totalorder %v7179_v37, %v1529_v6 }
 0x2a6   : > { %10032 = vst [vmem:[#allocation140_spill] sm:$0xff] %v7431_v36  ;;  %v7445_v36 = vpop.f32.mrf.mxu2 }
 0x2a7   : > { %v1887_v10 = vpop.f32.mrf.mxu1  ;;  %10034 = vst [vmem:[#allocation142_spill] sm:$0xff] %v7445_v36 }
 0x2a8   : > { %v7433_v38 = vpack.c.bf16 %v1887_v10, %v1885_v20  ;;  %v7447_v10 = vpop.f32.mrf.mxu3 }
 0x2a9   : > { %10035 = vst [vmem:[#allocation143_spill] sm:$0xff] %v7447_v10 }
 0x2aa   : > { %4959 = vmatmul.msk.bf16.gmra.mxu2 %vm1978_vm1, %v7433_v38  ;;  %4975 = vmatmul.msk.bf16.gmra.mxu3 %vm1978_vm1, %v7433_v38 }
 0x2ab   : > { %4991 = vmatmul.msk.bf16.gmra.mxu0 %vm1978_vm1, %v7433_v38 }
 0x2ad   : > { %v7441_v55 = vpop.f32.mrf.mxu0 }
 0x2ae   : > { %10033 = vst [vmem:[#allocation141_spill] sm:$0xff] %v7441_v55  ;;  %v7454_v61 = vpop.f32.mrf.mxu2 }
 0x2af   : > { %v1890_v20 = vpop.f32.mrf.mxu1  ;;  %10037 = vst [vmem:[#allocation145_spill] sm:$0xff] %v7454_v61 }
 0x2b0   : > { %v7458_v36 = vpop.f32.mrf.mxu3 }
 0x2b1   : > { %10038 = vst [vmem:[#allocation146_spill] sm:$0xff] %v7458_v36 }
 0x2b2   : > { %4949 = vmatmul.msk.bf16.gmra.mxu1 %vm4948_vm15, %v9974_v51 }
 0x2b5   : > { %v7451_v39 = vpop.f32.mrf.mxu0 }
 0x2b6   : > { %10036 = vst [vmem:[#allocation144_spill] sm:$0xff] %v7451_v39  ;;  %v7470_v35 = vpop.f32.mrf.mxu2 }
 0x2b7   : > { %v1892_v55 = vpop.f32.mrf.mxu1  ;;  %10040 = vst [vmem:[#allocation148_spill] sm:$0xff] %v7470_v35 }
 0x2b8   : > { %v7456_v46 = vpack.c.bf16 %v1892_v55, %v1890_v20  ;;  %v7473_v20 = vpop.f32.mrf.mxu3 }
 0x2b9   : > { %10041 = vst [vmem:[#allocation149_spill] sm:$0xff] %v7473_v20 }
 0x2ba   : > { %4960 = vmatmul.msk.bf16.gmra.mxu2 %vm1978_vm1, %v7456_v46  ;;  %4976 = vmatmul.msk.bf16.gmra.mxu3 %vm1978_vm1, %v7456_v46 }
 0x2bb   : > { %4992 = vmatmul.msk.bf16.gmra.mxu0 %vm1978_vm1, %v7456_v46 }
 0x2bd   : > { %v7468_v42 = vpop.f32.mrf.mxu0 }
 0x2be   : > { %10039 = vst [vmem:[#allocation147_spill] sm:$0xff] %v7468_v42  ;;  %v7485_v1 = vpop.f32.mrf.mxu2  ;;  %v1523_v42 = vpop.permute.xlu1 %1522 }
 0x2bf   : > { %v1895_v55 = vpop.f32.mrf.mxu1  ;;  %10043 = vst [vmem:[#allocation151_spill] sm:$0xff] %v7485_v1  ;;  %vm1561_vm4 = vcmp.eq.s32.totalorder %v7179_v37, %v1523_v42 }
 0x2c0   : > { %v7487_v35 = vpop.f32.mrf.mxu3  ;;  %vm4952_vm5 = vmpackc.low %vm1562_vm0, %vm1561_vm4 }
 0x2c1   : > { %10044 = vst [vmem:[#allocation152_spill] sm:$0xff] %v7487_v35 }
 0x2c2   : > { %4951 = vmatmul.msk.bf16.gmra.mxu1 %vm4950_vm3, %v9974_v51 }
 0x2c5   : > { %v7475_v36 = vpop.f32.mrf.mxu0 }
 0x2c6   : > { %10042 = vst [vmem:[#allocation150_spill] sm:$0xff] %v7475_v36  ;;  %v7494_v36 = vpop.f32.mrf.mxu2  ;;  %v1532_v42 = vpop.permute.xlu1 %1531 }
 0x2c7   : > { %v1897_v39 = vpop.f32.mrf.mxu1  ;;  %10046 = vst [vmem:[#allocation154_spill] sm:$0xff] %v7494_v36  ;;  %vm1564_vm6 = vcmp.eq.s32.totalorder %v7179_v37, %v1532_v42 }
 0x2c8   : > { %v7477_v61 = vpack.c.bf16 %v1897_v39, %v1895_v55  ;;  %v7496_v20 = vpop.f32.mrf.mxu3  ;;  %vm4954_vm8 = vmpackc.low %vm1564_vm6, %vm1563_vm7 }
 0x2c9   : > { %10047 = vst [vmem:[#allocation155_spill] sm:$0xff] %v7496_v20 }
 0x2ca   : > { %4961 = vmatmul.msk.bf16.gmra.mxu2 %vm1978_vm1, %v7477_v61  ;;  %4977 = vmatmul.msk.bf16.gmra.mxu3 %vm1978_vm1, %v7477_v61 }
 0x2cb   : > { %4993 = vmatmul.msk.bf16.gmra.mxu0 %vm1978_vm1, %v7477_v61 }
 0x2cd   : > { %v7491_v55 = vpop.f32.mrf.mxu0 }
 0x2ce   : > { %10045 = vst [vmem:[#allocation153_spill] sm:$0xff] %v7491_v55 }
 0x2cf   : > { %v1900_v39 = vpop.f32.mrf.mxu1 }
 0x2d2   : > { %4953 = vmatmul.msk.bf16.gmra.mxu1 %vm4952_vm5, %v9974_v51 }
 0x2d5   : > { %v7506_v55 = vpop.f32.mrf.mxu0 }
 0x2d6   : > { %10048 = vst [vmem:[#allocation156_spill] sm:$0xff] %v7506_v55 }
 0x2d7   : > { %v1902_v10 = vpop.f32.mrf.mxu1 }
 0x2d8   : > { %v7498_v44 = vpack.c.bf16 %v1902_v10, %v1900_v39  ;;  %v7510_v10 = vpop.f32.mrf.mxu2  ;;  %v7512_v39 = vpop.f32.mrf.mxu3 }
 0x2d9   : > { %10049 = vst [vmem:[#allocation157_spill] sm:$0xff] %v7510_v10 }
 0x2da   : > { %4962 = vmatmul.msk.bf16.gmra.mxu2 %vm1978_vm1, %v7498_v44  ;;  %4978 = vmatmul.msk.bf16.gmra.mxu3 %vm1978_vm1, %v7498_v44  ;;  %10050 = vst [vmem:[#allocation158_spill] sm:$0xff] %v7512_v39  ;;  %v5713_v39 = vld [vmem:[%s6379_s3 + $0x18] sm:$0xff] }
 0x2db   : > { %4994 = vmatmul.msk.bf16.gmra.mxu0 %vm1978_vm1, %v7498_v44 }
 0x2dd   : > { %v7515_v1 = vpop.f32.mrf.mxu0 }
 0x2de   : > { %10051 = vst [vmem:[#allocation159_spill] sm:$0xff] %v7515_v1  ;;  %v5712_v1 = vld [vmem:[%s6379_s3 + $0x10] sm:$0xff] }
 0x2df   : > { %v1905_v35 = vpop.f32.mrf.mxu1  ;;  %v2397_v10 = vpack.c.bf16 %v5713_v39, %v5712_v1 }
 0x2e0   : > { %v7523_v42 = vpop.f32.mrf.mxu2  ;;  %v7525_v6 = vpop.f32.mrf.mxu3 }
 0x2e1   : > { %10052 = vst [vmem:[#allocation160_spill] sm:$0xff] %v7523_v42  ;;  %2431 = vrot.lane.b32.xlu0 %v2397_v10, %s6133_s11  ;;  %v5714_v10 = vld [vmem:[%s6379_s3] sm:$0xff] }
 0x2e2   : > { %4955 = vmatmul.msk.bf16.gmra.mxu1 %vm4954_vm8, %v9974_v51  ;;  %10053 = vst [vmem:[#allocation161_spill] sm:$0xff] %v7525_v6 }
 0x2e5   : > { %v7529_v51 = vpop.f32.mrf.mxu0 }
 0x2e6   : > { %10054 = vst [vmem:[#allocation162_spill] sm:$0xff] %v7529_v51 }
 0x2e7   : > { %v1907_v36 = vpop.f32.mrf.mxu1 }
 0x2e8   : > { %v7517_v20 = vpack.c.bf16 %v1907_v36, %v1905_v35  ;;  %v7533_v36 = vpop.f32.mrf.mxu2  ;;  %v7535_v35 = vpop.f32.mrf.mxu3 }
 0x2e9   : > { %10055 = vst [vmem:[#allocation163_spill] sm:$0xff] %v7533_v36  ;;  %2437 = vrot.lane.b32.xlu0 %v2400_v5, %s6133_s11 }
 0x2ea   : > { %4963 = vmatmul.msk.bf16.gmra.mxu2 %vm1978_vm1, %v7517_v20  ;;  %4979 = vmatmul.msk.bf16.gmra.mxu3 %vm1978_vm1, %v7517_v20  ;;  %10056 = vst [vmem:[#allocation164_spill] sm:$0xff] %v7535_v35 }
 0x2eb   : > { %4995 = vmatmul.msk.bf16.gmra.mxu0 %vm1978_vm1, %v7517_v20 }
 0x2ef   : > { %v1910_v55 = vpop.f32.mrf.mxu1 }
 0x2f1   : > { %2443 = vrot.lane.b32.xlu0 %v2403_v16, %s6133_s11 }
 0x2f2   : > { %5004 = vmatmul.msk.bf16.vlgmr.msra.gmra.mxu1 %vm1978_vm1, %v7368_v50 }
 0x2f7   : > { %v1912_v37 = vpop.f32.mrf.mxu1 }
 0x2f8   : > { %v7540_v42 = vpack.c.bf16 %v1912_v37, %v1910_v55  ;;  %v7542_v51 = vpop.f32.mrf.mxu0  ;;  %v5715_v37 = vld [vmem:[%s6379_s3 + $0x8] sm:$0xff] }
 0x2f9   : > { %v2396_v55 = vpack.c.bf16 %v5715_v37, %v5714_v10 }
 0x2fa   : > { %4964 = vmatmul.msk.bf16.gmra.mxu2 %vm1978_vm1, %v7540_v42  ;;  %4980 = vmatmul.msk.bf16.gmra.mxu3 %vm1978_vm1, %v7540_v42 }
 0x2fb   : > { %4996 = vmatmul.msk.bf16.gmra.mxu0 %vm1978_vm1, %v7540_v42  ;;  %2429 = vrot.lane.b32.xlu2 %v2396_v55, %s6133_s11 }
 0x2fd   : > { %v7550_v50 = vpop.f32.mrf.mxu2  ;;  %v7552_v1 = vpop.f32.mrf.mxu3 }
 0x2fe   : > { %10057 = vst [vmem:[#allocation165_spill] sm:$0xff] %v7550_v50  ;;  %v5722_v50 = vld [vmem:[%s6379_s3 + $0x50] sm:$0xff] }
 0x2ff   : > { %v1915_v39 = vpop.f32.mrf.mxu1 }
 0x300   : > { %v7557_v35 = vpop.f32.mrf.mxu0 }
 0x302   : > { %5005 = vmatmul.msk.bf16.gmra.mxu1 %vm1978_vm1, %v7391_v11 }
 0x305   : > { %v7561_v36 = vpop.f32.mrf.mxu2  ;;  %v7563_v6 = vpop.f32.mrf.mxu3 }
 0x306   : > { %10058 = vst [vmem:[#allocation166_spill] sm:$0xff] %v7561_v36 }
 0x307   : > { %v1917_v27 = vpop.f32.mrf.mxu1 }
 0x308   : > { %v7568_v31 = vpack.c.bf16 %v1917_v27, %v1915_v39  ;;  %v7570_v10 = vpop.f32.mrf.mxu0 }
 0x30a   : > { %4965 = vmatmul.msk.bf16.gmra.mxu2 %vm1978_vm1, %v7568_v31  ;;  %4981 = vmatmul.msk.bf16.gmra.mxu3 %vm1978_vm1, %v7568_v31 }
 0x30b   : > { %4997 = vmatmul.msk.bf16.gmra.mxu0 %vm1978_vm1, %v7568_v31 }
 0x30d   : > { %v7578_v11 = vpop.f32.mrf.mxu2  ;;  %v7580_v37 = vpop.f32.mrf.mxu3 }
 0x30e   : > { %10059 = vst [vmem:[#allocation167_spill] sm:$0xff] %v7578_v11 }
 0x30f   : > { %v1920_v59 = vpop.f32.mrf.mxu1 }
 0x310   : > { %v7582_v43 = vpop.f32.mrf.mxu0 }
 0x312   : > { %5006 = vmatmul.msk.bf16.gmra.mxu1 %vm1978_vm1, %v7410_v49 }
 0x315   : > { %v7586_v52 = vpop.f32.mrf.mxu2  ;;  %v7588_v27 = vpop.f32.mrf.mxu3 }
 0x316   : > { %10060 = vst [vmem:[#allocation168_spill] sm:$0xff] %v7586_v52 }
 0x317   : > { %v1922_v55 = vpop.f32.mrf.mxu1 }
 0x318   : > { %v7590_v39 = vpack.c.bf16 %v1922_v55, %v1920_v59  ;;  %v7592_v28 = vpop.f32.mrf.mxu0 }
 0x31a   : > { %4966 = vmatmul.msk.bf16.gmra.mxu2 %vm1978_vm1, %v7590_v39  ;;  %4982 = vmatmul.msk.bf16.gmra.mxu3 %vm1978_vm1, %v7590_v39 }
 0x31b   : > { %4998 = vmatmul.msk.bf16.gmra.mxu0 %vm1978_vm1, %v7590_v39 }
 0x31d   : > { %v7600_v49 = vpop.f32.mrf.mxu2  ;;  %v7602_v11 = vpop.f32.mrf.mxu3 }
 0x31e   : > { %10061 = vst [vmem:[#allocation169_spill] sm:$0xff] %v7600_v49 }
 0x31f   : > { %v1925_v23 = vpop.f32.mrf.mxu1 }
 0x320   : > { %v7604_v52 = vpop.f32.mrf.mxu0 }
 0x322   : > { %5007 = vmatmul.msk.bf16.gmra.mxu1 %vm1978_vm1, %v7433_v38 }
 0x325   : > { %v7608_v59 = vpop.f32.mrf.mxu2  ;;  %v7610_v55 = vpop.f32.mrf.mxu3 }
 0x326   : > { %10062 = vst [vmem:[#allocation170_spill] sm:$0xff] %v7608_v59 }
 0x327   : > { %v1927_v4 = vpop.f32.mrf.mxu1 }
 0x328   : > { %v7615_v49 = vpack.c.bf16 %v1927_v4, %v1925_v23  ;;  %v7617_v17 = vpop.f32.mrf.mxu0  ;;  %v5721_v4 = vld [vmem:[%s6379_s3 + $0x38] sm:$0xff] }
 0x329   : > { %v2399_v23 = vpack.c.bf16 %v5721_v4, %v5720_v30 }
 0x32a   : > { %4967 = vmatmul.msk.bf16.gmra.mxu2 %vm1978_vm1, %v7615_v49  ;;  %4983 = vmatmul.msk.bf16.gmra.mxu3 %vm1978_vm1, %v7615_v49 }
 0x32b   : > { %4999 = vmatmul.msk.bf16.gmra.mxu0 %vm1978_vm1, %v7615_v49  ;;  %2435 = vrot.lane.b32.xlu2 %v2399_v23, %s6133_s11 }
 0x32d   : > { %v7625_v38 = vpop.f32.mrf.mxu2  ;;  %v7627_v62 = vpop.f32.mrf.mxu3 }
 0x32e   : > { %10063 = vst [vmem:[#allocation171_spill] sm:$0xff] %v7625_v38  ;;  %v2401_v38 = vpack.c.bf16 %v5723_v58, %v5722_v50 }
 0x32f   : > { %v1930_v5 = vpop.f32.mrf.mxu1 }
 0x330   : > { %v7632_v59 = vpop.f32.mrf.mxu0  ;;  %2439 = vrot.lane.b32.xlu1 %v2401_v38, %s6133_s11 }
 0x332   : > { %5008 = vmatmul.msk.bf16.gmra.mxu1 %vm1978_vm1, %v7456_v46 }
 0x335   : > { %v7636_v12 = vpop.f32.mrf.mxu2  ;;  %v7638_v2 = vpop.f32.mrf.mxu3 }
 0x336   : > { %10064 = vst [vmem:[#allocation172_spill] sm:$0xff] %v7636_v12 }
 0x337   : > { %v1932_v36 = vpop.f32.mrf.mxu1 }
 0x338   : > { %v7643_v32 = vpack.c.bf16 %v1932_v36, %v1930_v5  ;;  %v7645_v30 = vpop.f32.mrf.mxu0 }
 0x33a   : > { %4968 = vmatmul.msk.bf16.gmra.mxu2 %vm1978_vm1, %v7643_v32  ;;  %4984 = vmatmul.msk.bf16.gmra.mxu3 %vm1978_vm1, %v7643_v32 }
 0x33b   : > { %5000 = vmatmul.msk.bf16.gmra.mxu0 %vm1978_vm1, %v7643_v32 }
 0x33d   : > { %v7653_v46 = vpop.f32.mrf.mxu2  ;;  %v7655_v4 = vpop.f32.mrf.mxu3 }
 0x33f   : > { %v1935_v58 = vpop.f32.mrf.mxu1 }
 0x340   : > { %v7657_v50 = vpop.f32.mrf.mxu0 }
 0x341   : > { %10065 = vst [vmem:[#allocation173_spill] sm:$0xff] %v7657_v50 }
 0x342   : > { %5009 = vmatmul.msk.bf16.gmra.mxu1 %vm1978_vm1, %v7477_v61 }
 0x345   : > { %v7661_v36 = vpop.f32.mrf.mxu2  ;;  %v7663_v38 = vpop.f32.mrf.mxu3 }
 0x346   : > { %10066 = vst [vmem:[#allocation174_spill] sm:$0xff] %v7663_v38  ;;  %v2412_v38 = vld [vmem:[#allocation13] sm:$0xff] }
 0x347   : > { %v1937_v23 = vpop.f32.mrf.mxu1  ;;  %2462 = vst [vmem:[#allocation1] ss:$4 sm:$0xff] %v2412_v38 }
 0x348   : > { %v7665_v5 = vpack.c.bf16 %v1937_v23, %v1935_v58  ;;  %v7667_v12 = vpop.f32.mrf.mxu0 }
 0x34a   : > { %4969 = vmatmul.msk.bf16.gmra.mxu2 %vm1978_vm1, %v7665_v5  ;;  %4985 = vmatmul.msk.bf16.gmra.mxu3 %vm1978_vm1, %v7665_v5 }
 0x34b   : > { %5001 = vmatmul.msk.bf16.gmra.mxu0 %vm1978_vm1, %v7665_v5 }
 0x34d   : > { %v7675_v61 = vpop.f32.mrf.mxu2  ;;  %v7677_v50 = vpop.f32.mrf.mxu3 }
 0x34e   : > { %10067 = vst [vmem:[#allocation175_spill] sm:$0xff] %v7675_v61  ;;  %v2465_v0 = vld.sshfl [vmem:[#allocation1 + $0x10] sm:$0xff pattern:$0x73625140] }
 0x34f   : > { %10068 = vst [vmem:[#allocation176_spill] sm:$0xff] %v7677_v50  ;;  %v1940_v29 = vpop.f32.mrf.mxu1  ;;  %v2463_v14 = vld.sshfl [vmem:[#allocation1] sm:$0xff pattern:$0x73625140]  ;;  %v2521_v50 = vsel %vm2516_vm9, %v2465_v0, 0 }
 0x350   : > { %v7679_v58 = vpop.f32.mrf.mxu0  ;;  %v2517_v38 = vsel %vm2516_vm9, %v2463_v14, 0  ;;  %2710 = vmatpush.bf16.msrb.mxu0 %v2521_v50 }
 0x351   : > { %10069 = vst [vmem:[#allocation177_spill] sm:$0xff] %v7679_v58  ;;  %2532 = vmatpush.bf16.msra.mxu2 %v2517_v38 }
 0x352   : > { %5010 = vmatmul.msk.bf16.gmra.mxu1 %vm1978_vm1, %v7498_v44  ;;  %v2464_v44 = vld.sshfl [vmem:[#allocation1 + $0x8] sm:$0xff pattern:$0x73625140] }
 0x353   : > { %v2519_v63 = vsel %vm2516_vm9, %v2464_v44, 0 }
 0x354   : > { %2621 = vmatpush.bf16.msra.mxu3 %v2519_v63  ;;  %v5728_v63 = vld [vmem:[%s6379_s3 + $0x80] sm:$0xff] }
 0x355   : > { %v7683_v23 = vpop.f32.mrf.mxu2  ;;  %v7685_v9 = vpop.f32.mrf.mxu3 }
 0x356   : > { %10070 = vst [vmem:[#allocation178_spill] sm:$0xff] %v7683_v23 }
 0x357   : > { %10071 = vst [vmem:[#allocation179_spill] sm:$0xff] %v7685_v9  ;;  %v1942_v61 = vpop.f32.mrf.mxu1  ;;  %v5729_v9 = vld [vmem:[%s6379_s3 + $0x88] sm:$0xff] }
 0x358   : > { %v7692_v58 = vpack.c.bf16 %v1942_v61, %v1940_v29  ;;  %v7694_v23 = vpop.f32.mrf.mxu0  ;;  %v5727_v29 = vld [vmem:[%s6379_s3 + $0x68] sm:$0xff] }
 0x359   : > { %10072 = vst [vmem:[#allocation180_spill] sm:$0xff] %v7694_v23  ;;  %v2402_v0 = vpack.c.bf16 %v5727_v29, %v5726_v25 }
 0x35a   : > { %4970 = vmatmul.msk.bf16.gmra.mxu2 %vm1978_vm1, %v7692_v58  ;;  %4986 = vmatmul.msk.bf16.gmra.mxu3 %vm1978_vm1, %v7692_v58 }
 0x35b   : > { %5002 = vmatmul.msk.bf16.gmra.mxu0 %vm1978_vm1, %v7692_v58  ;;  %2441 = vrot.lane.b32.xlu2 %v2402_v0, %s6133_s11 }
 0x35d   : > { %v7703_v16 = vpop.f32.mrf.mxu2  ;;  %v7705_v14 = vpop.f32.mrf.mxu3 }
 0x35e   : > { %10073 = vst [vmem:[#allocation181_spill] sm:$0xff] %v7703_v16  ;;  %v2404_v16 = vpack.c.bf16 %v5729_v9, %v5728_v63  ;;  %v7747_v63 = vpop.permute.xlu2 %2429 }
 0x35f   : > { %10074 = vst [vmem:[#allocation182_spill] sm:$0xff] %v7705_v14  ;;  %v1945_v50 = vpop.f32.mrf.mxu1 }
 0x360   : > { %v7710_v61 = vpop.f32.mrf.mxu0  ;;  %2445 = vrot.lane.b32.xlu1 %v2404_v16, %s6133_s11 }
 0x361   : > { %10075 = vst [vmem:[#allocation183_spill] sm:$0xff] %v7710_v61 }
 0x362   : > { %5011 = vmatmul.msk.bf16.gmra.mxu1 %vm1978_vm1, %v7517_v20 }
 0x365   : > { %v7714_v38 = vpop.f32.mrf.mxu2  ;;  %v7716_v44 = vpop.f32.mrf.mxu3 }
 0x366   : > { %10076 = vst [vmem:[#allocation184_spill] sm:$0xff] %v7714_v38  ;;  %v7807_v38 = vpop.permute.xlu1 %2433 }
 0x367   : > { %10077 = vst [vmem:[#allocation185_spill] sm:$0xff] %v7716_v44  ;;  %v1947_v23 = vpop.f32.mrf.mxu1 }
 0x368   : > { %v7721_v14 = vpack.c.bf16 %v1947_v23, %v1945_v50  ;;  %v7723_v25 = vpop.f32.mrf.mxu0 }
 0x369   : > { %10078 = vst [vmem:[#allocation186_spill] sm:$0xff] %v7723_v25 }
 0x36a   : > { %4971 = vmatmul.msk.bf16.gmra.mxu2 %vm1978_vm1, %v7721_v14  ;;  %4987 = vmatmul.msk.bf16.gmra.mxu3 %vm1978_vm1, %v7721_v14 }
 0x36b   : > { %5003 = vmatmul.msk.bf16.gmra.mxu0 %vm1978_vm1, %v7721_v14 }
 0x36d   : > { %v7731_v20 = vpop.f32.mrf.mxu2  ;;  %v7733_v29 = vpop.f32.mrf.mxu3 }
 0x36e   : > { %10079 = vst [vmem:[#allocation187_spill] sm:$0xff] %v7731_v20 }
 0x36f   : > { %10080 = vst [vmem:[#allocation188_spill] sm:$0xff] %v7733_v29  ;;  %v7735_v9 = vpop.f32.mrf.mxu1 }
 0x370   : > { %10081 = vst [vmem:[#allocation189_spill] sm:$0xff] %v7735_v9  ;;  %v7737_v16 = vpop.f32.mrf.mxu0  ;;  %v5731_v9 = vld [vmem:[%s6379_s3 + $0xa8] sm:$0xff] }
 0x371   : > { %10082 = vst [vmem:[#allocation190_spill] sm:$0xff] %v7737_v16 }
 0x372   : > { %5012 = vmatmul.msk.bf16.gmra.mxu1 %vm1978_vm1, %v7540_v42 }
 0x375   : > { %v7741_v23 = vpop.f32.mrf.mxu2  ;;  %v7743_v0 = vpop.f32.mrf.mxu3 }
 0x376   : > { %10083 = vst [vmem:[#allocation191_spill] sm:$0xff] %v7741_v23  ;;  %v5730_v23 = vld [vmem:[%s6379_s3 + $0xa0] sm:$0xff] }
 0x377   : > { %10084 = vst [vmem:[#allocation192_spill] sm:$0xff] %v7743_v0  ;;  %v7745_v50 = vpop.f32.mrf.mxu1  ;;  %v2406_v29 = vpack.c.bf16 %v5731_v9, %v5730_v23  ;;  %v5732_v23 = vld [vmem:[%s6379_s3 + $0x90] sm:$0xff] }
 0x378   : > { %10085 = vst [vmem:[#allocation193_spill] sm:$0xff] %v7745_v50  ;;  %v7749_v61 = vpop.f32.mrf.mxu0 }
 0x379   : > { %10086 = vst [vmem:[#allocation194_spill] sm:$0xff] %v7749_v61  ;;  %2449 = vrot.lane.b32.xlu0 %v2406_v29, %s6133_s11 }
 0x37a   : > { %5020 = vmatmul.msk.bf16.vlgmr.msra.gmra.mxu2 %vm2467_vm10, %v7747_v63  ;;  %5036 = vmatmul.msk.bf16.vlgmr.msra.gmra.mxu3 %vm2467_vm10, %v7747_v63 }
 0x37b   : > { %5052 = vmatmul.msk.bf16.vlgmr.msrb.gmra.mxu0 %vm2467_vm10, %v7747_v63 }
 0x37d   : > { %v7757_v42 = vpop.f32.mrf.mxu2  ;;  %v7759_v16 = vpop.f32.mrf.mxu3 }
 0x37e   : > { %10087 = vst [vmem:[#allocation195_spill] sm:$0xff] %v7757_v42  ;;  %v7775_v42 = vpop.permute.xlu0 %2431 }
 0x37f   : > { %10088 = vst [vmem:[#allocation196_spill] sm:$0xff] %v7759_v16  ;;  %v7761_v0 = vpop.f32.mrf.mxu1  ;;  %v5734_v16 = vld [vmem:[%s6379_s3 + $0xb0] sm:$0xff] }
 0x380   : > { %10089 = vst [vmem:[#allocation197_spill] sm:$0xff] %v7761_v0  ;;  %v7763_v44 = vpop.f32.mrf.mxu0 }
 0x381   : > { %10090 = vst [vmem:[#allocation198_spill] sm:$0xff] %v7763_v44 }
 0x382   : > { %5013 = vmatmul.msk.bf16.gmra.mxu1 %vm1978_vm1, %v7568_v31 }
 0x385   : > { %v7767_v61 = vpop.f32.mrf.mxu2  ;;  %v7769_v50 = vpop.f32.mrf.mxu3 }
 0x386   : > { %10091 = vst [vmem:[#allocation199_spill] sm:$0xff] %v7767_v61 }
 0x387   : > { %10092 = vst [vmem:[#allocation200_spill] sm:$0xff] %v7769_v50  ;;  %v7773_v20 = vpop.f32.mrf.mxu1  ;;  %v5733_v50 = vld [vmem:[%s6379_s3 + $0x98] sm:$0xff] }
 0x388   : > { %10093 = vst [vmem:[#allocation201_spill] sm:$0xff] %v7773_v20  ;;  %v7778_v44 = vpop.f32.mrf.mxu0  ;;  %v2405_v29 = vpack.c.bf16 %v5733_v50, %v5732_v23 }
 0x389   : > { %10094 = vst [vmem:[#allocation202_spill] sm:$0xff] %v7778_v44 }
 0x38a   : > { %5021 = vmatmul.msk.bf16.gmra.mxu2 %vm2467_vm10, %v7775_v42  ;;  %5037 = vmatmul.msk.bf16.gmra.mxu3 %vm2467_vm10, %v7775_v42 }
 0x38b   : > { %5053 = vmatmul.msk.bf16.gmra.mxu0 %vm2467_vm10, %v7775_v42  ;;  %2447 = vrot.lane.b32.xlu2 %v2405_v29, %s6133_s11 }
 0x38d   : > { %v7786_v31 = vpop.f32.mrf.mxu2  ;;  %v7788_v9 = vpop.f32.mrf.mxu3 }
 0x38e   : > { %10095 = vst [vmem:[#allocation203_spill] sm:$0xff] %v7786_v31  ;;  %v5735_v31 = vld [vmem:[%s6379_s3 + $0xb8] sm:$0xff] }
 0x38f   : > { %10096 = vst [vmem:[#allocation204_spill] sm:$0xff] %v7788_v9  ;;  %v7792_v20 = vpop.f32.mrf.mxu1  ;;  %v2407_v25 = vpack.c.bf16 %v5735_v31, %v5734_v16 }
 0x390   : > { %10097 = vst [vmem:[#allocation205_spill] sm:$0xff] %v7792_v20  ;;  %v7795_v44 = vpop.f32.mrf.mxu0 }
 0x391   : > { %10098 = vst [vmem:[#allocation206_spill] sm:$0xff] %v7795_v44  ;;  %2451 = vrot.lane.b32.xlu1 %v2407_v25, %s6133_s11 }
 0x392   : > { %5014 = vmatmul.msk.bf16.gmra.mxu1 %vm1978_vm1, %v7590_v39 }
 0x395   : > { %v7799_v61 = vpop.f32.mrf.mxu2  ;;  %v7801_v0 = vpop.f32.mrf.mxu3 }
 0x396   : > { %10099 = vst [vmem:[#allocation207_spill] sm:$0xff] %v7799_v61 }
 0x397   : > { %10100 = vst [vmem:[#allocation208_spill] sm:$0xff] %v7801_v0  ;;  %v7805_v9 = vpop.f32.mrf.mxu1  ;;  %v7834_v0 = vpop.permute.xlu2 %2435 }
 0x398   : > { %10101 = vst [vmem:[#allocation209_spill] sm:$0xff] %v7805_v9  ;;  %v7810_v50 = vpop.f32.mrf.mxu0 }
 0x399   : > { %10102 = vst [vmem:[#allocation210_spill] sm:$0xff] %v7810_v50  ;;  %v5737_v50 = vld [vmem:[%s6379_s3 + $0xd8] sm:$0xff] }
 0x39a   : > { %5022 = vmatmul.msk.bf16.gmra.mxu2 %vm2467_vm10, %v7807_v38  ;;  %5038 = vmatmul.msk.bf16.gmra.mxu3 %vm2467_vm10, %v7807_v38 }
 0x39b   : > { %5054 = vmatmul.msk.bf16.gmra.mxu0 %vm2467_vm10, %v7807_v38 }
 0x39d   : > { %v7818_v39 = vpop.f32.mrf.mxu2  ;;  %v7820_v16 = vpop.f32.mrf.mxu3 }
 0x39e   : > { %10103 = vst [vmem:[#allocation211_spill] sm:$0xff] %v7818_v39 }
 0x39f   : > { %10104 = vst [vmem:[#allocation212_spill] sm:$0xff] %v7820_v16  ;;  %v7822_v31 = vpop.f32.mrf.mxu1 }
 0x3a0   : > { %10105 = vst [vmem:[#allocation213_spill] sm:$0xff] %v7822_v31  ;;  %v7824_v23 = vpop.f32.mrf.mxu0 }
 0x3a1   : > { %10106 = vst [vmem:[#allocation214_spill] sm:$0xff] %v7824_v23 }
 0x3a2   : > { %5015 = vmatmul.msk.bf16.gmra.mxu1 %vm1978_vm1, %v7615_v49  ;;  %v7895_v20 = vpop.permute.xlu1 %2439 }
 0x3a5   : > { %v7828_v25 = vpop.f32.mrf.mxu2  ;;  %v7830_v29 = vpop.f32.mrf.mxu3 }
 0x3a6   : > { %10107 = vst [vmem:[#allocation215_spill] sm:$0xff] %v7828_v25 }
 0x3a7   : > { %10108 = vst [vmem:[#allocation216_spill] sm:$0xff] %v7830_v29  ;;  %v7832_v44 = vpop.f32.mrf.mxu1 }
 0x3a8   : > { %10109 = vst [vmem:[#allocation217_spill] sm:$0xff] %v7832_v44  ;;  %v7836_v39 = vpop.f32.mrf.mxu0 }
 0x3a9   : > { %10110 = vst [vmem:[#allocation218_spill] sm:$0xff] %v7836_v39  ;;  %v2466_v39 = vld.sshfl [vmem:[#allocation1 + $0x18] sm:$0xff pattern:$0x73625140] }
 0x3aa   : > { %5023 = vmatmul.msk.bf16.gmra.mxu2 %vm2467_vm10, %v7834_v0  ;;  %5039 = vmatmul.msk.bf16.gmra.mxu3 %vm2467_vm10, %v7834_v0  ;;  %v2523_v25 = vsel %vm2516_vm9, %v2466_v39, 0 }
 0x3ab   : > { %5055 = vmatmul.msk.bf16.gmra.mxu0 %vm2467_vm10, %v7834_v0  ;;  %2799 = vmatpush.bf16.msrb.mxu1 %v2523_v25  ;;  %v5738_v25 = vld [vmem:[%s6379_s3 + $0xc0] sm:$0xff] }
 0x3ad   : > { %v7844_v49 = vpop.f32.mrf.mxu2  ;;  %v7846_v23 = vpop.f32.mrf.mxu3 }
 0x3ae   : > { %10111 = vst [vmem:[#allocation219_spill] sm:$0xff] %v7844_v49  ;;  %v5736_v49 = vld [vmem:[%s6379_s3 + $0xd0] sm:$0xff] }
 0x3af   : > { %10112 = vst [vmem:[#allocation220_spill] sm:$0xff] %v7846_v23  ;;  %v7848_v29 = vpop.f32.mrf.mxu1  ;;  %v2409_v23 = vpack.c.bf16 %v5737_v50, %v5736_v49  ;;  %v5739_v49 = vld [vmem:[%s6379_s3 + $0xc8] sm:$0xff] }
 0x3b0   : > { %10113 = vst [vmem:[#allocation221_spill] sm:$0xff] %v7848_v29  ;;  %v7850_v44 = vpop.f32.mrf.mxu0  ;;  %v7863_v29 = vpop.permute.xlu0 %2437 }
 0x3b1   : > { %10114 = vst [vmem:[#allocation222_spill] sm:$0xff] %v7850_v44  ;;  %2455 = vrot.lane.b32.xlu0 %v2409_v23, %s6133_s11  ;;  %v2408_v23 = vpack.c.bf16 %v5739_v49, %v5738_v25 }
 0x3b2   : > { %5016 = vmatmul.msk.bf16.gmra.mxu1 %vm1978_vm1, %v7643_v32 }
 0x3b3   : > { %2453 = vrot.lane.b32.xlu2 %v2408_v23, %s6133_s11 }
 0x3b5   : > { %v7855_v31 = vpop.f32.mrf.mxu2  ;;  %v7857_v16 = vpop.f32.mrf.mxu3 }
 0x3b6   : > { %10115 = vst [vmem:[#allocation223_spill] sm:$0xff] %v7855_v31  ;;  %v5740_v31 = vld [vmem:[%s6379_s3 + $0xe0] sm:$0xff] }
 0x3b7   : > { %10116 = vst [vmem:[#allocation224_spill] sm:$0xff] %v7857_v16  ;;  %v7861_v9 = vpop.f32.mrf.mxu1 }
 0x3b8   : > { %10117 = vst [vmem:[#allocation225_spill] sm:$0xff] %v7861_v9  ;;  %v7866_v32 = vpop.f32.mrf.mxu0 }
 0x3b9   : > { %10118 = vst [vmem:[#allocation226_spill] sm:$0xff] %v7866_v32 }
 0x3ba   : > { %5024 = vmatmul.msk.bf16.gmra.mxu2 %vm2467_vm10, %v7863_v29  ;;  %5040 = vmatmul.msk.bf16.gmra.mxu3 %vm2467_vm10, %v7863_v29 }
 0x3bb   : > { %5056 = vmatmul.msk.bf16.gmra.mxu0 %vm2467_vm10, %v7863_v29 }
 0x3bd   : > { %v7874_v50 = vpop.f32.mrf.mxu2  ;;  %v7876_v39 = vpop.f32.mrf.mxu3 }
 0x3be   : > { %10119 = vst [vmem:[#allocation227_spill] sm:$0xff] %v7874_v50  ;;  %v5741_v50 = vld [vmem:[%s6379_s3 + $0xe8] sm:$0xff] }
 0x3bf   : > { %10120 = vst [vmem:[#allocation228_spill] sm:$0xff] %v7876_v39  ;;  %v7880_v44 = vpop.f32.mrf.mxu1  ;;  %v2410_v61 = vpack.c.bf16 %v5741_v50, %v5740_v31 }
 0x3c0   : > { %10121 = vst [vmem:[#allocation229_spill] sm:$0xff] %v7880_v44  ;;  %v7883_v16 = vpop.f32.mrf.mxu0 }
 0x3c1   : > { %10122 = vst [vmem:[#allocation230_spill] sm:$0xff] %v7883_v16  ;;  %2457 = vrot.lane.b32.xlu1 %v2410_v61, %s6133_s11 }
 0x3c2   : > { %5017 = vmatmul.msk.bf16.gmra.mxu1 %vm1978_vm1, %v7665_v5 }
 0x3c5   : > { %v7887_v32 = vpop.f32.mrf.mxu2  ;;  %v7889_v9 = vpop.f32.mrf.mxu3 }
 0x3c6   : > { %10123 = vst [vmem:[#allocation231_spill] sm:$0xff] %v7887_v32 }
 0x3c7   : > { %10124 = vst [vmem:[#allocation232_spill] sm:$0xff] %v7889_v9  ;;  %v7893_v39 = vpop.f32.mrf.mxu1  ;;  %v7922_v9 = vpop.permute.xlu2 %2441 }
 0x3c8   : > { %10125 = vst [vmem:[#allocation233_spill] sm:$0xff] %v7893_v39  ;;  %v7898_v25 = vpop.f32.mrf.mxu0 }
 0x3c9   : > { %10126 = vst [vmem:[#allocation234_spill] sm:$0xff] %v7898_v25 }
 0x3ca   : > { %5025 = vmatmul.msk.bf16.gmra.mxu2 %vm2467_vm10, %v7895_v20  ;;  %5041 = vmatmul.msk.bf16.gmra.mxu3 %vm2467_vm10, %v7895_v20 }
 0x3cb   : > { %5057 = vmatmul.msk.bf16.gmra.mxu0 %vm2467_vm10, %v7895_v20 }
 0x3cd   : > { %v7906_v5 = vpop.f32.mrf.mxu2  ;;  %v7908_v31 = vpop.f32.mrf.mxu3 }
 0x3ce   : > { %10127 = vst [vmem:[#allocation235_spill] sm:$0xff] %v7906_v5 }
 0x3cf   : > { %10128 = vst [vmem:[#allocation236_spill] sm:$0xff] %v7908_v31  ;;  %v7910_v50 = vpop.f32.mrf.mxu1  ;;  %v7948_v31 = vpop.permute.xlu0 %2443 }
 0x3d0   : > { %10129 = vst [vmem:[#allocation237_spill] sm:$0xff] %v7910_v50  ;;  %v7912_v49 = vpop.f32.mrf.mxu0 }
 0x3d1   : > { %10130 = vst [vmem:[#allocation238_spill] sm:$0xff] %v7912_v49 }
 0x3d2   : > { %5018 = vmatmul.msk.bf16.gmra.mxu1 %vm1978_vm1, %v7692_v58 }
 0x3d5   : > { %v7916_v61 = vpop.f32.mrf.mxu2  ;;  %v7918_v23 = vpop.f32.mrf.mxu3 }
 0x3d6   : > { %10131 = vst [vmem:[#allocation239_spill] sm:$0xff] %v7916_v61 }
 0x3d7   : > { %10132 = vst [vmem:[#allocation240_spill] sm:$0xff] %v7918_v23  ;;  %v7920_v16 = vpop.f32.mrf.mxu1 }
 0x3d8   : > { %10133 = vst [vmem:[#allocation241_spill] sm:$0xff] %v7920_v16  ;;  %v7924_v25 = vpop.f32.mrf.mxu0 }
 0x3d9   : > { %10134 = vst [vmem:[#allocation242_spill] sm:$0xff] %v7924_v25 }
 0x3da   : > { %5026 = vmatmul.msk.bf16.gmra.mxu2 %vm2467_vm10, %v7922_v9  ;;  %5042 = vmatmul.msk.bf16.gmra.mxu3 %vm2467_vm10, %v7922_v9 }
 0x3db   : > { %5058 = vmatmul.msk.bf16.gmra.mxu0 %vm2467_vm10, %v7922_v9 }
 0x3dd   : > { %v7932_v58 = vpop.f32.mrf.mxu2  ;;  %v7934_v49 = vpop.f32.mrf.mxu3 }
 0x3de   : > { %10135 = vst [vmem:[#allocation243_spill] sm:$0xff] %v7932_v58 }
 0x3df   : > { %10136 = vst [vmem:[#allocation244_spill] sm:$0xff] %v7934_v49  ;;  %v7936_v23 = vpop.f32.mrf.mxu1 }
 0x3e0   : > { %10137 = vst [vmem:[#allocation245_spill] sm:$0xff] %v7936_v23  ;;  %v7938_v16 = vpop.f32.mrf.mxu0 }
 0x3e1   : > { %10138 = vst [vmem:[#allocation246_spill] sm:$0xff] %v7938_v16 }
 0x3e2   : > { %5019 = vmatmul.msk.bf16.gmra.mxu1 %vm1978_vm1, %v7721_v14 }
 0x3e5   : > { %v7942_v25 = vpop.f32.mrf.mxu2  ;;  %v7944_v61 = vpop.f32.mrf.mxu3 }
 0x3e6   : > { %10139 = vst [vmem:[#allocation247_spill] sm:$0xff] %v7942_v25  ;;  %v5743_v25 = vld [vmem:[%s6379_s3 + $0xf0] sm:$0xff] }
 0x3e7   : > { %10140 = vst [vmem:[#allocation248_spill] sm:$0xff] %v7944_v61  ;;  %v7946_v50 = vpop.f32.mrf.mxu1  ;;  %v5742_v61 = vld [vmem:[%s6379_s3 + $0xf8] sm:$0xff] }
 0x3e8   : > { %10141 = vst [vmem:[#allocation249_spill] sm:$0xff] %v7946_v50  ;;  %v7950_v5 = vpop.f32.mrf.mxu0  ;;  %v2411_v50 = vpack.c.bf16 %v5742_v61, %v5743_v25 }
 0x3e9   : > { %10142 = vst [vmem:[#allocation250_spill] sm:$0xff] %v7950_v5  ;;  %v7974_v5 = vld [vmem:[%s9790_s5] sm:$0xf] }
 0x3ea   : > { %5027 = vmatmul.msk.bf16.gmra.mxu2 %vm2467_vm10, %v7948_v31  ;;  %5043 = vmatmul.msk.bf16.gmra.mxu3 %vm2467_vm10, %v7948_v31  ;;  %v7991_v58 = vperm.slane %v7974_v5, 1 }
 0x3eb   : > { %5059 = vmatmul.msk.bf16.gmra.mxu0 %vm2467_vm10, %v7948_v31  ;;  %2459 = vrot.lane.b32.xlu2 %v2411_v50, %s6133_s11 }
 0x3ed   : > { %v7958_v14 = vpop.f32.mrf.mxu2  ;;  %v7960_v16 = vpop.f32.mrf.mxu3 }
 0x3ee   : > { %10143 = vst [vmem:[#allocation251_spill] sm:$0xff] %v7958_v14  ;;  %v7977_v14 = vperm.slane %v7974_v5, 2 }
 0x3ef   : > { %10144 = vst [vmem:[#allocation252_spill] sm:$0xff] %v7960_v16  ;;  %v7964_v23 = vpop.f32.mrf.mxu1 }
 0x3f0   : > { %10145 = vst [vmem:[#allocation253_spill] sm:$0xff] %v7964_v23  ;;  %v7966_v49 = vpop.f32.mrf.mxu0 }
 0x3f1   : > { %10146 = vst [vmem:[#allocation254_spill] sm:$0xff] %v7966_v49  ;;  %v7985_v49 = vpop.permute.xlu1 %2445 }
 0x3f2   : > { %5068 = vmatmul.msk.bf16.vlgmr.msrb.gmra.mxu1 %vm2467_vm10, %v7747_v63  ;;  %10150 = vst [vmem:[#allocation258_spill] sm:$0xff] %v7985_v49  ;;  %v1227_v63 = vadd.f32 %v7026_v34, %v7977_v14 }
 0x3f5   : > { %v7979_v16 = vpop.f32.mrf.mxu2  ;;  %v7981_v25 = vpop.f32.mrf.mxu3 }
 0x3f6   : > { %10147 = vst [vmem:[#allocation255_spill] sm:$0xff] %v7979_v16 }
 0x3f7   : > { %10148 = vst [vmem:[#allocation256_spill] sm:$0xff] %v7981_v25  ;;  %v7983_v61 = vpop.f32.mrf.mxu1 }
 0x3f8   : > { %10149 = vst [vmem:[#allocation257_spill] sm:$0xff] %v7983_v61  ;;  %v2712_v50 = vpop.f32.mrf.mxu0 }
 0x3f9   : > { %v2883_v23 = vmul.f32 %v2712_v50, %v7542_v51  ;;  %v1114_v51 = vadd.f32 %v7024_v8, %v7991_v58 }
 0x3fa   : > { %5028 = vmatmul.msk.bf16.gmra.mxu2 %vm2467_vm10, %v7985_v49  ;;  %5044 = vmatmul.msk.bf16.gmra.mxu3 %vm2467_vm10, %v7985_v49 }
 0x3fb   : > { %v7997_v25 = vmul.f32 %v2883_v23, %v1227_v63  ;;  %5060 = vmatmul.msk.bf16.gmra.mxu0 %vm2467_vm10, %v7985_v49  ;;  %v1230_v23 = vadd.f32 %v7044_v26, %v7977_v14  ;;  %v8026_v26 = vpop.permute.xlu2 %2447 }
 0x3fd   : > { %v8001_v61 = vpop.f32.mrf.mxu2  ;;  %v2623_v16 = vpop.f32.mrf.mxu3 }
 0x3fe   : > { %v2882_v34 = vmul.f32 %v2623_v16, %v7552_v1  ;;  %v1117_v16 = vadd.f32 %v7041_v3, %v7991_v58 }
 0x3ff   : > { %v8006_v50 = vpop.f32.mrf.mxu1 }
 0x400   : > { %10151 = vst [vmem:[#allocation259_spill] sm:$0xff] %v8006_v50  ;;  %v8008_v39 = vmul.f32 %v2882_v34, %v1114_v51  ;;  %v2714_v32 = vpop.f32.mrf.mxu0 }
 0x401   : > { %v2887_v63 = vmul.f32 %v2714_v32, %v7557_v35  ;;  %v1233_v32 = vadd.f32 %v7071_v48, %v7977_v14  ;;  %v1120_v48 = vadd.f32 %v7065_v47, %v7991_v58 }
 0x402   : > { %5069 = vmatmul.msk.bf16.gmra.mxu1 %vm2467_vm10, %v7775_v42 }
 0x403   : > { %v8015_v44 = vmul.f32 %v2887_v63, %v1230_v23 }
 0x405   : > { %v8019_v49 = vpop.f32.mrf.mxu2  ;;  %v2625_v1 = vpop.f32.mrf.mxu3 }
 0x406   : > { %v2886_v51 = vmul.f32 %v2625_v1, %v7563_v6 }
 0x407   : > { %v8024_v34 = vpop.f32.mrf.mxu1 }
 0x408   : > { %10152 = vst [vmem:[#allocation260_spill] sm:$0xff] %v8024_v34  ;;  %v8028_v35 = vmul.f32 %v2886_v51, %v1117_v16  ;;  %v2717_v42 = vpop.f32.mrf.mxu0 }
 0x409   : > { %v2891_v23 = vmul.f32 %v2717_v42, %v7570_v10 }
 0x40a   : > { %5029 = vmatmul.msk.bf16.gmra.mxu2 %vm2467_vm10, %v8026_v26  ;;  %5045 = vmatmul.msk.bf16.gmra.mxu3 %vm2467_vm10, %v8026_v26 }
 0x40b   : > { %v8039_v3 = vmul.f32 %v2891_v23, %v1233_v32  ;;  %5061 = vmatmul.msk.bf16.gmra.mxu0 %vm2467_vm10, %v8026_v26  ;;  %v1236_v32 = vadd.f32 %v7098_v57, %v7977_v14  ;;  %v8068_v57 = vpop.permute.xlu0 %2449 }
 0x40d   : > { %v8043_v6 = vpop.f32.mrf.mxu2  ;;  %v2628_v1 = vpop.f32.mrf.mxu3 }
 0x40e   : > { %v2890_v10 = vmul.f32 %v2628_v1, %v7580_v37  ;;  %v1123_v1 = vadd.f32 %v7092_v13, %v7991_v58 }
 0x40f   : > { %v8048_v16 = vpop.f32.mrf.mxu1 }
 0x410   : > { %10153 = vst [vmem:[#allocation261_spill] sm:$0xff] %v8048_v16  ;;  %v8050_v51 = vmul.f32 %v2890_v10, %v1120_v48  ;;  %v2719_v42 = vpop.f32.mrf.mxu0 }
 0x411   : > { %v2895_v23 = vmul.f32 %v2719_v42, %v7582_v43  ;;  %v1239_v42 = vadd.f32 %v7121_v21, %v7977_v14 }
 0x412   : > { %5070 = vmatmul.msk.bf16.gmra.mxu1 %vm2467_vm10, %v7807_v38 }
 0x413   : > { %v8057_v8 = vmul.f32 %v2895_v23, %v1236_v32 }
 0x415   : > { %v8059_v63 = vpop.f32.mrf.mxu2  ;;  %v2630_v47 = vpop.f32.mrf.mxu3 }
 0x416   : > { %v2894_v48 = vmul.f32 %v2630_v47, %v7588_v27 }
 0x417   : > { %v8066_v10 = vpop.f32.mrf.mxu1 }
 0x418   : > { %10154 = vst [vmem:[#allocation262_spill] sm:$0xff] %v8066_v10  ;;  %v8070_v43 = vmul.f32 %v2894_v48, %v1123_v1  ;;  %v2722_v38 = vpop.f32.mrf.mxu0 }
 0x419   : > { %v2899_v32 = vmul.f32 %v2722_v38, %v7592_v28  ;;  %v1126_v28 = vadd.f32 %v7119_v22, %v7991_v58 }
 0x41a   : > { %5030 = vmatmul.msk.bf16.gmra.mxu2 %vm2467_vm10, %v8068_v57  ;;  %5046 = vmatmul.msk.bf16.gmra.mxu3 %vm2467_vm10, %v8068_v57 }
 0x41b   : > { %v8081_v27 = vmul.f32 %v2899_v32, %v1239_v42  ;;  %5062 = vmatmul.msk.bf16.gmra.mxu0 %vm2467_vm10, %v8068_v57  ;;  %v1242_v42 = vadd.f32 %v7141_v60, %v7977_v14  ;;  %v8110_v60 = vpop.permute.xlu1 %2451 }
 0x41d   : > { %v8085_v23 = vpop.f32.mrf.mxu2  ;;  %v2633_v47 = vpop.f32.mrf.mxu3 }
 0x41e   : > { %v2898_v21 = vmul.f32 %v2633_v47, %v7602_v11  ;;  %v1129_v47 = vadd.f32 %v7138_v7, %v7991_v58 }
 0x41f   : > { %v8090_v1 = vpop.f32.mrf.mxu1 }
 0x420   : > { %10155 = vst [vmem:[#allocation263_spill] sm:$0xff] %v8090_v1  ;;  %v8092_v48 = vmul.f32 %v2898_v21, %v1126_v28  ;;  %v2724_v38 = vpop.f32.mrf.mxu0  ;;  %v10171_v1 = vld [vmem:[#allocation180_spill] sm:$0xff] }
 0x421   : > { %v2903_v32 = vmul.f32 %v2724_v38, %v7604_v52  ;;  %v1245_v38 = vadd.f32 %v7164_v19, %v7977_v14  ;;  %v1132_v19 = vadd.f32 %v7158_v15, %v7991_v58 }
 0x422   : > { %5071 = vmatmul.msk.bf16.gmra.mxu1 %vm2467_vm10, %v7834_v0 }
 0x423   : > { %v8099_v37 = vmul.f32 %v2903_v32, %v1242_v42 }
 0x425   : > { %v8101_v13 = vpop.f32.mrf.mxu2  ;;  %v2635_v22 = vpop.f32.mrf.mxu3 }
 0x426   : > { %v2902_v28 = vmul.f32 %v2635_v22, %v7610_v55 }
 0x427   : > { %v8108_v21 = vpop.f32.mrf.mxu1 }
 0x428   : > { %10156 = vst [vmem:[#allocation264_spill] sm:$0xff] %v8108_v21  ;;  %v8112_v52 = vmul.f32 %v2902_v28, %v1129_v47  ;;  %v2727_v0 = vpop.f32.mrf.mxu0 }
 0x429   : > { %v2907_v42 = vmul.f32 %v2727_v0, %v7617_v17 }
 0x42a   : > { %5031 = vmatmul.msk.bf16.gmra.mxu2 %vm2467_vm10, %v8110_v60  ;;  %5047 = vmatmul.msk.bf16.gmra.mxu3 %vm2467_vm10, %v8110_v60 }
 0x42b   : > { %v8123_v55 = vmul.f32 %v2907_v42, %v1245_v38  ;;  %5063 = vmatmul.msk.bf16.gmra.mxu0 %vm2467_vm10, %v8110_v60  ;;  %v1248_v38 = vadd.f32 %v7187_v45, %v7977_v14  ;;  %v8152_v45 = vpop.permute.xlu2 %2453 }
 0x42d   : > { %v8127_v32 = vpop.f32.mrf.mxu2  ;;  %v2638_v22 = vpop.f32.mrf.mxu3 }
 0x42e   : > { %v2906_v17 = vmul.f32 %v2638_v22, %v7627_v62  ;;  %v1135_v22 = vadd.f32 %v7181_v18, %v7991_v58  ;;  %v5228_v18 = vld [vmem:[#allocation14 + $0x38] sm:$0xff]  ;;  %v1138_v62 = vadd.f32 %v7225_v33, %v7991_v58  ;;  %v5234_v33 = vld [vmem:[#allocation14 + $0x68] sm:$0xff] }
 0x42f   : > { %v8132_v47 = vpop.f32.mrf.mxu1  ;;  %3460 = vmatpush.bf16.msra.mxu2 %v5228_v18 }
 0x430   : > { %10157 = vst [vmem:[#allocation265_spill] sm:$0xff] %v8132_v47  ;;  %v8134_v28 = vmul.f32 %v2906_v17, %v1132_v19  ;;  %v2729_v0 = vpop.f32.mrf.mxu0  ;;  %v5243_v47 = vld [vmem:[#allocation14 + $0xb0] sm:$0xff] }
 0x431   : > { %v2911_v42 = vmul.f32 %v2729_v0, %v7632_v59  ;;  %v1251_v0 = vadd.f32 %v7227_v56, %v7977_v14  ;;  %v8170_v56 = vperm.slane %v7974_v5, 0 }
 0x432   : > { %5072 = vmatmul.msk.bf16.gmra.mxu1 %vm2467_vm10, %v7863_v29 }
 0x433   : > { %v8141_v11 = vmul.f32 %v2911_v42, %v1248_v38  ;;  %v5244_v42 = vld [vmem:[#allocation14 + $0xb8] sm:$0xff] }
 0x434   : > { %3638 = vmatpush.bf16.msra.mxu0 %v5244_v42 }
 0x435   : > { %v8143_v7 = vpop.f32.mrf.mxu2  ;;  %v2640_v15 = vpop.f32.mrf.mxu3 }
 0x436   : > { %v2910_v19 = vmul.f32 %v2640_v15, %v7638_v2  ;;  %v5236_v2 = vld [vmem:[#allocation14 + $0x78] sm:$0xff]  ;;  %v5227_v15 = vld [vmem:[#allocation14 + $0x30] sm:$0xff] }
 0x437   : > { %v8150_v17 = vpop.f32.mrf.mxu1  ;;  %3549 = vmatpush.bf16.msra.mxu3 %v5236_v2  ;;  %3461 = vmatpush.bf16.msra.mxu2 %v5227_v15  ;;  %v5225_v15 = vld [vmem:[#allocation14 + $0x20] sm:$0xff] }
 0x438   : > { %10158 = vst [vmem:[#allocation266_spill] sm:$0xff] %v8150_v17  ;;  %v8154_v59 = vmul.f32 %v2910_v19, %v1135_v22  ;;  %v2732_v29 = vpop.f32.mrf.mxu0  ;;  %v5235_v17 = vld [vmem:[#allocation14 + $0x70] sm:$0xff]  ;;  %3639 = vmatpush.bf16.msra.mxu0 %v5243_v47  ;;  %v5241_v47 = vld [vmem:[#allocation14 + $0xa0] sm:$0xff] }
 0x439   : > { %v2915_v38 = vmul.f32 %v2732_v29, %v7645_v30  ;;  %v1025_v29 = vadd.f32 %v7046_v24, %v8170_v56  ;;  %v5226_v24 = vld [vmem:[#allocation14 + $0x28] sm:$0xff] }
 0x43a   : > { %5032 = vmatmul.msk.bf16.gmra.mxu2 %vm2467_vm10, %v8152_v45  ;;  %5048 = vmatmul.msk.bf16.gmra.mxu3 %vm2467_vm10, %v8152_v45 }
 0x43b   : > { %v8165_v22 = vmul.f32 %v2915_v38, %v1251_v0  ;;  %5064 = vmatmul.msk.bf16.gmra.mxu0 %vm2467_vm10, %v8152_v45  ;;  %3550 = vmatpush.bf16.msra.mxu3 %v5235_v17  ;;  %v5233_v17 = vld [vmem:[#allocation14 + $0x60] sm:$0xff] }
 0x43c   : > { %3462 = vmatpush.bf16.msra.mxu2 %v5226_v24  ;;  %v1257_v24 = vadd.f32 %v7255_v54, %v7977_v14 }
 0x43d   : > { %v2554_v30 = vpop.f32.mrf.mxu2  ;;  %v2643_v19 = vpop.f32.mrf.mxu3 }
 0x43e   : > { %v2913_v0 = vmul.f32 %v2554_v30, %v7653_v46  ;;  %v2914_v38 = vmul.f32 %v2643_v19, %v7655_v4  ;;  %v5242_v46 = vld [vmem:[#allocation14 + $0xa8] sm:$0xff] }
 0x43f   : > { %v8178_v21 = vpop.f32.mrf.mxu1  ;;  %3551 = vmatpush.bf16.msra.mxu3 %v5234_v33  ;;  %3640 = vmatpush.bf16.msra.mxu0 %v5242_v46  ;;  %v5240_v46 = vld [vmem:[#allocation14 + $0x98] sm:$0xff] }
 0x440   : > { %10159 = vst [vmem:[#allocation267_spill] sm:$0xff] %v8178_v21  ;;  %v8180_v18 = vmul.f32 %v2913_v0, %v1025_v29  ;;  %v8182_v2 = vmul.f32 %v2914_v38, %v1138_v62  ;;  %v8184_v42 = vpop.f32.mrf.mxu0  ;;  %v1028_v62 = vadd.f32 %v7063_v53, %v8170_v56  ;;  %3463 = vmatpush.bf16.msra.mxu2 %v5225_v15  ;;  %v5224_v53 = vld [vmem:[#allocation14 + $0x18] sm:$0xff] }
 0x441   : > { %v1144_v15 = vadd.f32 %v7252_v40, %v7991_v58  ;;  %v5230_v40 = vld [vmem:[#allocation14 + $0x48] sm:$0xff] }
 0x442   : > { %5073 = vmatmul.msk.bf16.gmra.mxu1 %vm2467_vm10, %v7895_v20  ;;  %v8195_v20 = vpop.permute.xlu0 %2455 }
 0x443   : > { %3552 = vmatpush.bf16.msra.mxu3 %v5233_v17  ;;  %3641 = vmatpush.bf16.msra.mxu0 %v5241_v47  ;;  %v10161_v17 = vld [vmem:[#allocation175_spill] sm:$0xff] }
 0x444   : > { %3464 = vmatpush.bf16.msra.mxu2 %v5224_v53 }
 0x445   : > { %v2556_v4 = vpop.f32.mrf.mxu2  ;;  %v8188_v30 = vpop.f32.mrf.mxu3 }
 0x446   : > { %v2917_v19 = vmul.f32 %v2556_v4, %v7661_v36  ;;  %v5232_v36 = vld [vmem:[#allocation14 + $0x58] sm:$0xff] }
 0x447   : > { %v8193_v29 = vpop.f32.mrf.mxu1  ;;  %3553 = vmatpush.bf16.msra.mxu3 %v5232_v36  ;;  %3642 = vmatpush.bf16.msra.mxu0 %v5240_v46 }
 0x448   : > { %10160 = vst [vmem:[#allocation268_spill] sm:$0xff] %v8193_v29  ;;  %v8197_v0 = vmul.f32 %v2917_v19, %v1028_v62  ;;  %v2737_v38 = vpop.f32.mrf.mxu0  ;;  %v1031_v19 = vadd.f32 %v7084_v41, %v8170_v56  ;;  %v5239_v29 = vld [vmem:[#allocation14 + $0x90] sm:$0xff]  ;;  %v5222_v41 = vld [vmem:[#allocation14 + $0x8] sm:$0xff] }
 0x449   : > { %v2923_v33 = vmul.f32 %v2737_v38, %v7667_v12  ;;  %v10162_v38 = vld [vmem:[#allocation176_spill] sm:$0xff] }
 0x44a   : > { %5033 = vmatmul.msk.bf16.gmra.mxu2 %vm2467_vm10, %v8195_v20  ;;  %5049 = vmatmul.msk.bf16.gmra.mxu3 %vm2467_vm10, %v8195_v20 }
 0x44b   : > { %v8208_v62 = vmul.f32 %v2923_v33, %v1257_v24  ;;  %5065 = vmatmul.msk.bf16.gmra.mxu0 %vm2467_vm10, %v8195_v20  ;;  %v5223_v24 = vld [vmem:[#allocation14 + $0x10] sm:$0xff] }
 0x44c   : > { %v5231_v33 = vld [vmem:[#allocation14 + $0x50] sm:$0xff]  ;;  %3465 = vmatpush.bf16.msra.mxu2 %v5223_v24  ;;  %3643 = vmatpush.bf16.msra.mxu0 %v5239_v29  ;;  %v5229_v24 = vld [vmem:[#allocation14 + $0x40] sm:$0xff] }
 0x44d   : > { %v2559_v12 = vpop.f32.mrf.mxu2  ;;  %v2648_v54 = vpop.f32.mrf.mxu3  ;;  %3554 = vmatpush.bf16.msra.mxu3 %v5231_v33  ;;  %v5237_v29 = vld [vmem:[#allocation14 + $0x80] sm:$0xff] }
 0x44e   : > { %v2921_v47 = vmul.f32 %v2559_v12, %v10161_v17  ;;  %v2922_v4 = vmul.f32 %v2648_v54, %v10162_v38  ;;  %v5238_v12 = vld [vmem:[#allocation14 + $0x88] sm:$0xff]  ;;  %v5221_v38 = vld [vmem:[#allocation14] sm:$0xff] }
 0x44f   : > { %v8218_v21 = vpop.f32.mrf.mxu1 }
 0x450   : > { %10163 = vst [vmem:[#allocation175_spill] sm:$0xff] %v8218_v21  ;;  %v8220_v53 = vmul.f32 %v2921_v47, %v1031_v19  ;;  %v8222_v36 = vmul.f32 %v2922_v4, %v1144_v15  ;;  %v8224_v46 = vpop.f32.mrf.mxu0  ;;  %3466 = vmatpush.bf16.msra.mxu2 %v5222_v41  ;;  %3644 = vmatpush.bf16.msra.mxu0 %v5238_v12  ;;  %v10165_v4 = vld [vmem:[#allocation67_spill] sm:$0xff]  ;;  %v10166_v15 = vld [vmem:[#allocation178_spill] sm:$0xff] }
 0x451   : > { %3555 = vmatpush.bf16.msra.mxu3 %v5230_v40  ;;  %v1034_v19 = vadd.f32 %v10165_v4, %v8170_v56  ;;  %v10170_v40 = vld [vmem:[#allocation97_spill] sm:$0xff] }
 0x452   : > { %10164 = vst [vmem:[#allocation176_spill] sm:$0xff] %v8220_v53  ;;  %5074 = vmatmul.msk.bf16.gmra.mxu1 %vm2467_vm10, %v7922_v9  ;;  %v8235_v9 = vpop.permute.xlu1 %2457  ;;  %v1263_v12 = vadd.f32 %v10170_v40, %v7977_v14  ;;  %v10176_v40 = vld [vmem:[#allocation182_spill] sm:$0xff] }
 0x453   : > { %10168 = vst [vmem:[#allocation178_spill] sm:$0xff] %v8235_v9 }
 0x454   : > { %3467 = vmatpush.bf16.msra.mxu2 %v5221_v38  ;;  %3645 = vmatpush.bf16.msra.mxu0 %v5237_v29  ;;  %v10174_v38 = vld [vmem:[#allocation96_spill] sm:$0xff]  ;;  %v10175_v29 = vld [vmem:[#allocation181_spill] sm:$0xff] }
 0x455   : > { %v2561_v54 = vpop.f32.mrf.mxu2  ;;  %v8228_v17 = vpop.f32.mrf.mxu3  ;;  %3556 = vmatpush.bf16.msra.mxu3 %v5229_v24  ;;  %v1150_v24 = vadd.f32 %v10174_v38, %v7991_v58  ;;  %v10182_v38 = vld [vmem:[#allocation69_spill] sm:$0xff] }
 0x456   : > { %v2925_v47 = vmul.f32 %v2561_v54, %v10166_v15  ;;  %v1040_v50 = vadd.f32 %v10182_v38, %v8170_v56 }
 0x457   : > { %v8233_v33 = vpop.f32.mrf.mxu1 }
 0x458   : > { %10167 = vst [vmem:[#allocation67_spill] sm:$0xff] %v8233_v33  ;;  %v8237_v21 = vmul.f32 %v2925_v47, %v1034_v19  ;;  %v2742_v41 = vpop.f32.mrf.mxu0  ;;  %v10173_v47 = vld [vmem:[#allocation68_spill] sm:$0xff] }
 0x459   : > { %v2931_v10 = vmul.f32 %v2742_v41, %v10171_v1  ;;  %v1037_v1 = vadd.f32 %v10173_v47, %v8170_v56 }
 0x45a   : > { %10169 = vst [vmem:[#allocation269_spill] sm:$0xff] %v8237_v21  ;;  %5034 = vmatmul.msk.bf16.gmra.mxu2 %vm2467_vm10, %v8235_v9  ;;  %5050 = vmatmul.msk.bf16.gmra.mxu3 %vm2467_vm10, %v8235_v9 }
 0x45b   : > { %v8248_v4 = vmul.f32 %v2931_v10, %v1263_v12  ;;  %5066 = vmatmul.msk.bf16.gmra.mxu0 %vm2467_vm10, %v8235_v9 }
 0x45d   : > { %10172 = vst [vmem:[#allocation97_spill] sm:$0xff] %v8248_v4  ;;  %v2564_v19 = vpop.f32.mrf.mxu2  ;;  %v2653_v15 = vpop.f32.mrf.mxu3 }
 0x45e   : > { %v2929_v41 = vmul.f32 %v2564_v19, %v10175_v29  ;;  %v2930_v33 = vmul.f32 %v2653_v15, %v10176_v40  ;;  %v10183_v19 = vld [vmem:[#allocation184_spill] sm:$0xff]  ;;  %v8275_v40 = vpop.permute.xlu2 %2459 }
 0x45f   : > { %v8258_v16 = vpop.f32.mrf.mxu1  ;;  %10185 = vst [vmem:[#allocation184_spill] sm:$0xff] %v8275_v40 }
 0x460   : > { %10177 = vst [vmem:[#allocation180_spill] sm:$0xff] %v8258_v16  ;;  %v8260_v54 = vmul.f32 %v2929_v41, %v1037_v1  ;;  %v8262_v10 = vmul.f32 %v2930_v33, %v1150_v24  ;;  %v8264_v12 = vpop.f32.mrf.mxu0  ;;  %v10187_v24 = vld [vmem:[#allocation106_spill] sm:$0xff] }
 0x461   : > { %10180 = vst [vmem:[#allocation181_spill] sm:$0xff] %v8264_v12  ;;  %v1269_v41 = vadd.f32 %v10187_v24, %v7977_v14  ;;  %v10188_v16 = vld [vmem:[#allocation186_spill] sm:$0xff] }
 0x462   : > { %10178 = vst [vmem:[#allocation68_spill] sm:$0xff] %v8260_v54  ;;  %5075 = vmatmul.msk.bf16.gmra.mxu1 %vm2467_vm10, %v7948_v31  ;;  %v10198_v54 = vld [vmem:[#allocation165_spill] sm:$0xff] }
 0x463   : > { %10179 = vst [vmem:[#allocation96_spill] sm:$0xff] %v8262_v10  ;;  %v10193_v10 = vld [vmem:[#allocation188_spill] sm:$0xff] }
 0x465   : > { %v2566_v34 = vpop.f32.mrf.mxu2  ;;  %v8268_v47 = vpop.f32.mrf.mxu3 }
 0x466   : > { %10181 = vst [vmem:[#allocation182_spill] sm:$0xff] %v8268_v47  ;;  %v2933_v29 = vmul.f32 %v2566_v34, %v10183_v19  ;;  %v10194_v47 = vld [vmem:[#allocation166_spill] sm:$0xff] }
 0x467   : > { %v8273_v15 = vpop.f32.mrf.mxu1 }
 0x468   : > { %10184 = vst [vmem:[#allocation69_spill] sm:$0xff] %v8273_v15  ;;  %v8277_v1 = vmul.f32 %v2933_v29, %v1040_v50  ;;  %v2747_v33 = vpop.f32.mrf.mxu0  ;;  %v10190_v29 = vld [vmem:[#allocation70_spill] sm:$0xff]  ;;  %v10192_v15 = vld [vmem:[#allocation187_spill] sm:$0xff] }
 0x469   : > { %v2939_v31 = vmul.f32 %v2747_v33, %v10188_v16  ;;  %v1043_v24 = vadd.f32 %v10190_v29, %v8170_v56  ;;  %v10191_v16 = vld [vmem:[#allocation105_spill] sm:$0xff] }
 0x46a   : > { %10186 = vst [vmem:[#allocation270_spill] sm:$0xff] %v8277_v1  ;;  %5035 = vmatmul.msk.bf16.gmra.mxu2 %vm2467_vm10, %v8275_v40  ;;  %5051 = vmatmul.msk.bf16.gmra.mxu3 %vm2467_vm10, %v8275_v40  ;;  %v1156_v33 = vadd.f32 %v10191_v16, %v7991_v58  ;;  %v2881_v16 = vmul.f32 %v8001_v61, %v10198_v54  ;;  %v10199_v1 = vld [vmem:[#allocation258_spill] sm:$0xff]  ;;  %v10204_v61 = vld [vmem:[#allocation191_spill] sm:$0xff] }
 0x46b   : > { %v8288_v38 = vmul.f32 %v2939_v31, %v1269_v41  ;;  %5067 = vmatmul.msk.bf16.gmra.mxu0 %vm2467_vm10, %v8275_v40  ;;  %v2885_v41 = vmul.f32 %v8019_v49, %v10194_v47  ;;  %v10197_v40 = vld [vmem:[#allocation59_spill] sm:$0xff]  ;;  %v10200_v49 = vld [vmem:[#allocation58_spill] sm:$0xff] }
 0x46c   : > { %v1004_v29 = vadd.f32 %v10197_v40, %v8170_v56 }
 0x46d   : > { %10189 = vst [vmem:[#allocation106_spill] sm:$0xff] %v8288_v38  ;;  %v2569_v50 = vpop.f32.mrf.mxu2  ;;  %v2658_v19 = vpop.f32.mrf.mxu3 }
 0x46e   : > { %v2937_v4 = vmul.f32 %v2569_v50, %v10192_v15  ;;  %v2938_v9 = vmul.f32 %v2658_v19, %v10193_v10  ;;  %v8313_v10 = vperm.slane %v7974_v5, 3  ;;  %v3013_v47 = vmul.f32 %v2885_v41, %v1004_v29  ;;  %v10202_v50 = vld [vmem:[#allocation71_spill] sm:$0xff] }
 0x46f   : > { %v2801_v12 = vpop.f32.mrf.mxu1  ;;  %v1046_v19 = vadd.f32 %v10202_v50, %v8170_v56  ;;  %v10208_v50 = vld [vmem:[#allocation115_spill] sm:$0xff] }
 0x470   : > { %v8300_v31 = vmul.f32 %v2937_v4, %v1043_v24  ;;  %v8302_v34 = vmul.f32 %v2938_v9, %v1156_v33  ;;  %v8304_v38 = vpop.f32.mrf.mxu0  ;;  %v1001_v4 = vadd.f32 %v10200_v49, %v8170_v56  ;;  %v10203_v24 = vld [vmem:[#allocation189_spill] sm:$0xff] }
 0x471   : > { %10196 = vst [vmem:[#allocation70_spill] sm:$0xff] %v8304_v38  ;;  %v2884_v33 = vmul.f32 %v2801_v12, %v10203_v24  ;;  %v10206_v38 = vld [vmem:[#allocation75_spill] sm:$0xff] }
 0x472   : > { %10195 = vst [vmem:[#allocation186_spill] sm:$0xff] %v8302_v34  ;;  %5076 = vmatmul.msk.bf16.gmra.mxu1 %vm2467_vm10, %v10199_v1  ;;  %v3009_v40 = vmul.f32 %v2881_v16, %v1001_v4  ;;  %v10205_v1 = vld [vmem:[#allocation73_spill] sm:$0xff]  ;;  %v1343_v53 = vadd.f32 %v10206_v38, %v8313_v10  ;;  %v1275_v16 = vadd.f32 %v10208_v50, %v7977_v14  ;;  %v10209_v4 = vld [vmem:[#allocation194_spill] sm:$0xff] }
 0x473   : > { %v1340_v34 = vadd.f32 %v10205_v1, %v8313_v10  ;;  %v10216_v1 = vld [vmem:[#allocation196_spill] sm:$0xff] }
 0x474   : > { %v3137_v49 = vpack.c.bf16 %v3013_v47, %v3009_v40 }
 0x475   : > { %v2571_v9 = vpop.f32.mrf.mxu2  ;;  %v8317_v15 = vpop.f32.mrf.mxu3  ;;  %v8333_v24 = vmul.f32 %v2884_v33, %v1340_v34  ;;  %v10215_v33 = vld [vmem:[#allocation195_spill] sm:$0xff] }
 0x476   : > { %10201 = vst [vmem:[#allocation105_spill] sm:$0xff] %v8317_v15  ;;  %v2941_v54 = vmul.f32 %v2571_v9, %v10204_v61  ;;  %v10207_v15 = vld [vmem:[#allocation193_spill] sm:$0xff]  ;;  %v10210_v61 = vpack.c.bf16 %v8028_v35, %v8008_v39  ;;  %v10214_v39 = vld [vmem:[#allocation114_spill] sm:$0xff] }
 0x477   : > { %v2803_v5 = vpop.f32.mrf.mxu1  ;;  %v1162_v35 = vadd.f32 %v10214_v39, %v7991_v58  ;;  %v10221_v39 = vld [vmem:[#allocation76_spill] sm:$0xff] }
 0x478   : > { %v8327_v41 = vmul.f32 %v2941_v54, %v1046_v19  ;;  %v2752_v29 = vpop.f32.mrf.mxu0  ;;  %v2888_v21 = vmul.f32 %v2803_v5, %v10207_v15  ;;  %v10212_v15 = vpack.c.bf16 %v8015_v44, %v7997_v25 }
 0x479   : > { %v2947_v12 = vmul.f32 %v2752_v29, %v10209_v4  ;;  %v10217_v29 = vld [vmem:[#allocation168_spill] sm:$0xff]  ;;  %v10218_v4 = vld [vmem:[#allocation62_spill] sm:$0xff] }
 0x47a   : > { %v8335_v9 = vmul.f32 %v2888_v21, %v1343_v53  ;;  %3468 = vmatmul.bf16.vlgmr.msra.gmra.mxu2 %v3137_v49  ;;  %3557 = vmatmul.bf16.vlgmr.msra.gmra.mxu3 %v10210_v61  ;;  %v10213_v53 = vld [vmem:[#allocation74_spill] sm:$0xff]  ;;  %v2893_v44 = vmul.f32 %v8059_v63, %v10217_v29  ;;  %v10219_v61 = vld [vmem:[#allocation167_spill] sm:$0xff] }
 0x47b   : > { %v8342_v47 = vmul.f32 %v2947_v12, %v1275_v16  ;;  %3646 = vmatmul.bf16.vlgmr.msra.gmra.mxu0 %v10212_v15  ;;  %v1049_v40 = vadd.f32 %v10213_v53, %v8170_v56  ;;  %v1010_v12 = vadd.f32 %v10218_v4, %v8170_v56  ;;  %v2889_v15 = vmul.f32 %v8043_v6, %v10219_v61  ;;  %v10224_v6 = vld [vmem:[#allocation77_spill] sm:$0xff] }
 0x47c   : > { %v1346_v4 = vadd.f32 %v10224_v6, %v8313_v10  ;;  %v10234_v6 = vld [vmem:[#allocation203_spill] sm:$0xff] }
 0x47d   : > { %10211 = vst [vmem:[#allocation187_spill] sm:$0xff] %v8342_v47  ;;  %v2574_v19 = vpop.f32.mrf.mxu2  ;;  %v2663_v21 = vpop.f32.mrf.mxu3  ;;  %v3021_v53 = vmul.f32 %v2893_v44, %v1010_v12  ;;  %v10226_v12 = vld [vmem:[#allocation201_spill] sm:$0xff] }
 0x47e   : > { %v2945_v54 = vmul.f32 %v2574_v19, %v10215_v33  ;;  %v2946_v5 = vmul.f32 %v2663_v21, %v10216_v1  ;;  %v10220_v19 = vld [vmem:[#allocation61_spill] sm:$0xff] }
 0x47f   : > { %v2806_v49 = vpop.f32.mrf.mxu1  ;;  %v1007_v21 = vadd.f32 %v10220_v19, %v8170_v56 }
 0x480   : > { %v8357_v25 = vmul.f32 %v2945_v54, %v1049_v40  ;;  %v8359_v50 = vmul.f32 %v2946_v5, %v1162_v35  ;;  %v8361_v16 = vpop.f32.mrf.mxu0  ;;  %v1052_v35 = vadd.f32 %v10221_v39, %v8170_v56  ;;  %v10222_v54 = vld [vmem:[#allocation197_spill] sm:$0xff]  ;;  %v10223_v5 = vld [vmem:[#allocation199_spill] sm:$0xff] }
 0x481   : > { %v3017_v33 = vmul.f32 %v2889_v15, %v1007_v21  ;;  %v2892_v1 = vmul.f32 %v2806_v49, %v10222_v54  ;;  %v10227_v39 = vld [vmem:[#allocation123_spill] sm:$0xff]  ;;  %v10228_v21 = vld [vmem:[#allocation202_spill] sm:$0xff] }
 0x482   : > { %5077 = vmatmul.msk.bf16.gmra.mxu1 %vm2467_vm10, %v8026_v26  ;;  %v10225_v26 = vld [vmem:[#allocation79_spill] sm:$0xff]  ;;  %v1281_v15 = vadd.f32 %v10227_v39, %v7977_v14 }
 0x483   : > { %v1349_v34 = vadd.f32 %v10225_v26, %v8313_v10  ;;  %v3141_v47 = vpack.c.bf16 %v3021_v53, %v3017_v33  ;;  %v8387_v54 = vmul.f32 %v2892_v1, %v1346_v4  ;;  %v10231_v53 = vpack.c.bf16 %v8057_v8, %v8039_v3 }
 0x485   : > { %v2576_v63 = vpop.f32.mrf.mxu2  ;;  %v8371_v40 = vpop.f32.mrf.mxu3 }
 0x486   : > { %v2949_v29 = vmul.f32 %v2576_v63, %v10223_v5  ;;  %v10229_v5 = vpack.c.bf16 %v8070_v43, %v8050_v51  ;;  %v10233_v51 = vld [vmem:[#allocation122_spill] sm:$0xff] }
 0x487   : > { %v2808_v61 = vpop.f32.mrf.mxu1  ;;  %v1168_v43 = vadd.f32 %v10233_v51, %v7991_v58  ;;  %v10240_v51 = vld [vmem:[#allocation80_spill] sm:$0xff] }
 0x488   : > { %v8381_v19 = vmul.f32 %v2949_v29, %v1052_v35  ;;  %v2757_v44 = vpop.f32.mrf.mxu0  ;;  %v2896_v38 = vmul.f32 %v2808_v61, %v10226_v12  ;;  %v10235_v61 = vld [vmem:[#allocation204_spill] sm:$0xff]  ;;  %v10236_v12 = vld [vmem:[#allocation170_spill] sm:$0xff] }
 0x489   : > { %v2955_v49 = vmul.f32 %v2757_v44, %v10228_v21  ;;  %v2901_v8 = vmul.f32 %v8101_v13, %v10236_v12  ;;  %v10237_v21 = vld [vmem:[#allocation64_spill] sm:$0xff] }
 0x48a   : > { %v8389_v63 = vmul.f32 %v2896_v38, %v1349_v34  ;;  %3473 = vmatmul.bf16.gmra.mxu2 %v3141_v47  ;;  %3562 = vmatmul.bf16.gmra.mxu3 %v10229_v5  ;;  %v10232_v47 = vld [vmem:[#allocation78_spill] sm:$0xff]  ;;  %v10238_v5 = vld [vmem:[#allocation169_spill] sm:$0xff] }
 0x48b   : > { %v8396_v29 = vmul.f32 %v2955_v49, %v1281_v15  ;;  %3651 = vmatmul.bf16.gmra.mxu0 %v10231_v53  ;;  %v1055_v34 = vadd.f32 %v10232_v47, %v8170_v56  ;;  %v1016_v49 = vadd.f32 %v10237_v21, %v8170_v56  ;;  %v2897_v53 = vmul.f32 %v8085_v23, %v10238_v5  ;;  %v10243_v23 = vld [vmem:[#allocation81_spill] sm:$0xff] }
 0x48c   : > { %v1352_v21 = vadd.f32 %v10243_v23, %v8313_v10  ;;  %v10253_v23 = vld [vmem:[#allocation211_spill] sm:$0xff] }
 0x48d   : > { %10230 = vst [vmem:[#allocation188_spill] sm:$0xff] %v8396_v29  ;;  %v2579_v1 = vpop.f32.mrf.mxu2  ;;  %v2668_v38 = vpop.f32.mrf.mxu3  ;;  %v3029_v47 = vmul.f32 %v2901_v8, %v1016_v49  ;;  %v10245_v49 = vld [vmem:[#allocation209_spill] sm:$0xff] }
 0x48e   : > { %v2953_v4 = vmul.f32 %v2579_v1, %v10234_v6  ;;  %v2954_v26 = vmul.f32 %v2668_v38, %v10235_v61  ;;  %v10239_v1 = vld [vmem:[#allocation63_spill] sm:$0xff] }
 0x48f   : > { %v2811_v44 = vpop.f32.mrf.mxu1  ;;  %v1013_v38 = vadd.f32 %v10239_v1, %v8170_v56 }
 0x490   : > { %v8411_v3 = vmul.f32 %v2953_v4, %v1055_v34  ;;  %v8413_v39 = vmul.f32 %v2954_v26, %v1168_v43  ;;  %v8415_v15 = vpop.f32.mrf.mxu0  ;;  %v1058_v43 = vadd.f32 %v10240_v51, %v8170_v56  ;;  %v10241_v4 = vld [vmem:[#allocation205_spill] sm:$0xff]  ;;  %v10242_v26 = vld [vmem:[#allocation207_spill] sm:$0xff]  ;;  %v10246_v51 = vld [vmem:[#allocation130_spill] sm:$0xff] }
 0x491   : > { %v3025_v6 = vmul.f32 %v2897_v53, %v1013_v38  ;;  %v2900_v61 = vmul.f32 %v2811_v44, %v10241_v4  ;;  %v1287_v53 = vadd.f32 %v10246_v51, %v7977_v14  ;;  %v10247_v38 = vld [vmem:[#allocation210_spill] sm:$0xff] }
 0x492   : > { %5078 = vmatmul.msk.bf16.gmra.mxu1 %vm2467_vm10, %v8068_v57  ;;  %v10244_v57 = vld [vmem:[#allocation83_spill] sm:$0xff] }
 0x493   : > { %v1355_v33 = vadd.f32 %v10244_v57, %v8313_v10  ;;  %v3145_v29 = vpack.c.bf16 %v3029_v47, %v3025_v6  ;;  %v8441_v4 = vmul.f32 %v2900_v61, %v1352_v21  ;;  %v10250_v47 = vpack.c.bf16 %v8099_v37, %v8081_v27 }
 0x495   : > { %v2581_v13 = vpop.f32.mrf.mxu2  ;;  %v8425_v34 = vpop.f32.mrf.mxu3 }
 0x496   : > { %v2957_v12 = vmul.f32 %v2581_v13, %v10242_v26  ;;  %v10248_v26 = vpack.c.bf16 %v8112_v52, %v8092_v48  ;;  %v10252_v48 = vld [vmem:[#allocation129_spill] sm:$0xff] }
 0x497   : > { %v2813_v5 = vpop.f32.mrf.mxu1  ;;  %v1174_v52 = vadd.f32 %v10252_v48, %v7991_v58  ;;  %v10259_v48 = vld [vmem:[#allocation84_spill] sm:$0xff] }
 0x498   : > { %v8435_v1 = vmul.f32 %v2957_v12, %v1058_v43  ;;  %v2762_v8 = vpop.f32.mrf.mxu0  ;;  %v2904_v35 = vmul.f32 %v2813_v5, %v10245_v49  ;;  %v10254_v5 = vld [vmem:[#allocation212_spill] sm:$0xff] }
 0x499   : > { %v2963_v44 = vmul.f32 %v2762_v8, %v10247_v38  ;;  %v10255_v49 = vld [vmem:[#allocation172_spill] sm:$0xff]  ;;  %v10256_v38 = vld [vmem:[#allocation66_spill] sm:$0xff] }
 0x49a   : > { %v8443_v13 = vmul.f32 %v2904_v35, %v1355_v33  ;;  %3478 = vmatmul.bf16.gmra.mxu2 %v3145_v29  ;;  %3567 = vmatmul.bf16.gmra.mxu3 %v10248_v26  ;;  %v10251_v29 = vld [vmem:[#allocation82_spill] sm:$0xff]  ;;  %v2909_v37 = vmul.f32 %v8143_v7, %v10255_v49  ;;  %v10257_v26 = vld [vmem:[#allocation171_spill] sm:$0xff] }
 0x49b   : > { %v8450_v12 = vmul.f32 %v2963_v44, %v1287_v53  ;;  %3656 = vmatmul.bf16.gmra.mxu0 %v10250_v47  ;;  %v1061_v33 = vadd.f32 %v10251_v29, %v8170_v56  ;;  %v1022_v44 = vadd.f32 %v10256_v38, %v8170_v56  ;;  %v2905_v47 = vmul.f32 %v8127_v32, %v10257_v26  ;;  %v10262_v32 = vld [vmem:[#allocation87_spill] sm:$0xff] }
 0x49c   : > { %v1358_v38 = vadd.f32 %v10262_v32, %v8313_v10  ;;  %v10271_v32 = vld [vmem:[#allocation219_spill] sm:$0xff] }
 0x49d   : > { %10249 = vst [vmem:[#allocation166_spill] sm:$0xff] %v8450_v12  ;;  %v2584_v61 = vpop.f32.mrf.mxu2  ;;  %v2673_v35 = vpop.f32.mrf.mxu3  ;;  %v3037_v29 = vmul.f32 %v2909_v37, %v1022_v44  ;;  %v10264_v44 = vld [vmem:[#allocation217_spill] sm:$0xff] }
 0x49e   : > { %v2961_v21 = vmul.f32 %v2584_v61, %v10253_v23  ;;  %v2962_v57 = vmul.f32 %v2673_v35, %v10254_v5  ;;  %v10258_v61 = vld [vmem:[#allocation65_spill] sm:$0xff] }
 0x49f   : > { %v2816_v8 = vpop.f32.mrf.mxu1  ;;  %v1019_v35 = vadd.f32 %v10258_v61, %v8170_v56 }
 0x4a0   : > { %v8465_v27 = vmul.f32 %v2961_v21, %v1061_v33  ;;  %v8467_v51 = vmul.f32 %v2962_v57, %v1174_v52  ;;  %v8469_v53 = vpop.f32.mrf.mxu0  ;;  %v1064_v52 = vadd.f32 %v10259_v48, %v8170_v56  ;;  %v10260_v21 = vld [vmem:[#allocation213_spill] sm:$0xff]  ;;  %v10261_v57 = vld [vmem:[#allocation215_spill] sm:$0xff]  ;;  %v10265_v48 = vld [vmem:[#allocation136_spill] sm:$0xff] }
 0x4a1   : > { %v3033_v23 = vmul.f32 %v2905_v47, %v1019_v35  ;;  %v2908_v5 = vmul.f32 %v2816_v8, %v10260_v21  ;;  %v1293_v47 = vadd.f32 %v10265_v48, %v7977_v14  ;;  %v10266_v35 = vld [vmem:[#allocation218_spill] sm:$0xff] }
 0x4a2   : > { %5079 = vmatmul.msk.bf16.gmra.mxu1 %vm2467_vm10, %v8110_v60  ;;  %v10263_v60 = vld [vmem:[#allocation89_spill] sm:$0xff] }
 0x4a3   : > { %v1361_v6 = vadd.f32 %v10263_v60, %v8313_v10  ;;  %v3149_v12 = vpack.c.bf16 %v3037_v29, %v3033_v23  ;;  %v8495_v21 = vmul.f32 %v2908_v5, %v1358_v38  ;;  %v10268_v29 = vpack.c.bf16 %v8141_v11, %v8123_v55  ;;  %v10274_v55 = vld [vmem:[#allocation174_spill] sm:$0xff] }
 0x4a4   : > { %v2918_v48 = vmul.f32 %v8188_v30, %v10274_v55  ;;  %v5252_v30 = vld [vmem:[#allocation14 + $0xf8] sm:$0xff]  ;;  %v10280_v55 = vld [vmem:[#allocation223_spill] sm:$0xff] }
 0x4a5   : > { %v2586_v7 = vpop.f32.mrf.mxu2  ;;  %v8479_v33 = vpop.f32.mrf.mxu3  ;;  %3727 = vmatpush.bf16.msra.mxu1 %v5252_v30 }
 0x4a6   : > { %v2965_v49 = vmul.f32 %v2586_v7, %v10261_v57  ;;  %v10267_v57 = vpack.c.bf16 %v8154_v59, %v8134_v28  ;;  %v10270_v28 = vld [vmem:[#allocation135_spill] sm:$0xff] }
 0x4a7   : > { %v2818_v26 = vpop.f32.mrf.mxu1  ;;  %v1180_v59 = vadd.f32 %v10270_v28, %v7991_v58 }
 0x4a8   : > { %v8489_v61 = vmul.f32 %v2965_v49, %v1064_v52  ;;  %v2767_v37 = vpop.f32.mrf.mxu0  ;;  %v2912_v43 = vmul.f32 %v2818_v26, %v10264_v44  ;;  %v10272_v26 = vld [vmem:[#allocation220_spill] sm:$0xff] }
 0x4a9   : > { %v2971_v8 = vmul.f32 %v2767_v37, %v10266_v35  ;;  %v10273_v37 = vld [vmem:[#allocation93_spill] sm:$0xff] }
 0x4aa   : > { %v8497_v7 = vmul.f32 %v2912_v43, %v1361_v6  ;;  %3483 = vmatmul.bf16.gmra.mxu2 %v3149_v12  ;;  %3572 = vmatmul.bf16.gmra.mxu3 %v10267_v57  ;;  %v10269_v12 = vld [vmem:[#allocation88_spill] sm:$0xff]  ;;  %v1364_v44 = vadd.f32 %v10273_v37, %v8313_v10  ;;  %v10275_v57 = vld [vmem:[#allocation221_spill] sm:$0xff] }
 0x4ab   : > { %v8504_v49 = vmul.f32 %v2971_v8, %v1293_v47  ;;  %3661 = vmatmul.bf16.gmra.mxu0 %v10268_v29  ;;  %v1067_v6 = vadd.f32 %v10269_v12, %v8170_v56  ;;  %v10276_v12 = vld [vmem:[#allocation173_spill] sm:$0xff] }
 0x4ad   : > { %v2589_v5 = vpop.f32.mrf.mxu2  ;;  %v2678_v43 = vpop.f32.mrf.mxu3 }
 0x4ae   : > { %v2969_v38 = vmul.f32 %v2589_v5, %v10271_v32  ;;  %v2970_v60 = vmul.f32 %v2678_v43, %v10272_v26  ;;  %v2919_v5 = vmul.f32 %v8184_v42, %v10276_v12  ;;  %v10277_v43 = vld [vmem:[#allocation85_spill] sm:$0xff]  ;;  %v10279_v42 = vld [vmem:[#allocation90_spill] sm:$0xff]  ;;  %v10281_v12 = vld [vmem:[#allocation95_spill] sm:$0xff] }
 0x4af   : > { %v2821_v11 = vpop.f32.mrf.mxu1  ;;  %v1141_v28 = vadd.f32 %v10277_v43, %v7991_v58 }
 0x4b0   : > { %v8521_v47 = vmul.f32 %v2969_v38, %v1067_v6  ;;  %v8523_v35 = vmul.f32 %v2970_v60, %v1180_v59  ;;  %v8525_v8 = vpop.f32.mrf.mxu0  ;;  %v2916_v29 = vmul.f32 %v2821_v11, %v10275_v57  ;;  %v10278_v6 = vld [vmem:[#allocation86_spill] sm:$0xff]  ;;  %v1070_v11 = vadd.f32 %v10279_v42, %v8170_v56 }
 0x4b1   : > { %v1254_v59 = vadd.f32 %v10278_v6, %v7977_v14  ;;  %v3046_v38 = vmul.f32 %v2918_v48, %v1141_v28  ;;  %v10282_v6 = vld [vmem:[#allocation225_spill] sm:$0xff]  ;;  %v10283_v28 = vld [vmem:[#allocation143_spill] sm:$0xff] }
 0x4b2   : > { %v8532_v32 = vmul.f32 %v2916_v29, %v1364_v44  ;;  %5080 = vmatmul.msk.bf16.gmra.mxu1 %vm2467_vm10, %v8152_v45  ;;  %v5251_v44 = vld [vmem:[#allocation14 + $0xf0] sm:$0xff]  ;;  %v1367_v45 = vadd.f32 %v10281_v12, %v8313_v10  ;;  %v1299_v30 = vadd.f32 %v10283_v28, %v7977_v14  ;;  %v10285_v12 = vpack.c.bf16 %v8197_v0, %v8180_v18  ;;  %v10288_v18 = vld [vmem:[#allocation142_spill] sm:$0xff]  ;;  %v10291_v28 = vld [vmem:[#allocation99_spill] sm:$0xff] }
 0x4b3   : > { %v3047_v26 = vmul.f32 %v2919_v5, %v1254_v59  ;;  %v3154_v5 = vpack.c.bf16 %v3046_v38, %v8182_v2  ;;  %3728 = vmatpush.bf16.msra.mxu1 %v5251_v44  ;;  %v10284_v59 = vld [vmem:[#allocation226_spill] sm:$0xff]  ;;  %v1186_v0 = vadd.f32 %v10288_v18, %v7991_v58 }
 0x4b5   : > { %v2591_v60 = vpop.f32.mrf.mxu2  ;;  %v8538_v37 = vpop.f32.mrf.mxu3 }
 0x4b6   : > { %v2973_v57 = vmul.f32 %v2591_v60, %v10280_v55  ;;  %v3155_v60 = vpack.c.bf16 %v3047_v26, %v8165_v22  ;;  %v10287_v26 = vld [vmem:[#allocation94_spill] sm:$0xff] }
 0x4b7   : > { %v2823_v29 = vpop.f32.mrf.mxu1  ;;  %v1073_v44 = vadd.f32 %v10287_v26, %v8170_v56 }
 0x4b8   : > { %v8545_v43 = vmul.f32 %v2973_v57, %v1070_v11  ;;  %v2772_v23 = vpop.f32.mrf.mxu0  ;;  %v2920_v48 = vmul.f32 %v2823_v29, %v10282_v6  ;;  %v5250_v11 = vld [vmem:[#allocation14 + $0xe8] sm:$0xff]  ;;  %v10289_v29 = vld [vmem:[#allocation227_spill] sm:$0xff] }
 0x4b9   : > { %v2979_v42 = vmul.f32 %v2772_v23, %v10284_v59  ;;  %3729 = vmatpush.bf16.msra.mxu1 %v5250_v11  ;;  %v10290_v6 = vld [vmem:[#allocation228_spill] sm:$0xff]  ;;  %v10295_v23 = vld [vmem:[#allocation229_spill] sm:$0xff] }
 0x4ba   : > { %v8553_v55 = vmul.f32 %v2920_v48, %v1367_v45  ;;  %3488 = vmatmul.bf16.gmra.mxu2 %v10285_v12  ;;  %3577 = vmatmul.bf16.gmra.mxu3 %v3154_v5  ;;  %v5249_v5 = vld [vmem:[#allocation14 + $0xe0] sm:$0xff] }
 0x4bb   : > { %v8560_v2 = vmul.f32 %v2979_v42, %v1299_v30  ;;  %3666 = vmatmul.bf16.gmra.mxu0 %v3155_v60  ;;  %v1370_v30 = vadd.f32 %v10291_v28, %v8313_v10  ;;  %v10292_v42 = vld [vmem:[#allocation179_spill] sm:$0xff] }
 0x4bc   : > { %v2926_v60 = vmul.f32 %v8228_v17, %v10292_v42  ;;  %v5248_v17 = vld [vmem:[#allocation14 + $0xd8] sm:$0xff]  ;;  %v10301_v42 = vld [vmem:[#allocation231_spill] sm:$0xff] }
 0x4bd   : > { %10286 = vst [vmem:[#allocation59_spill] sm:$0xff] %v8560_v2  ;;  %v2594_v38 = vpop.f32.mrf.mxu2  ;;  %v2683_v22 = vpop.f32.mrf.mxu3  ;;  %3730 = vmatpush.bf16.msra.mxu1 %v5249_v5  ;;  %v10308_v2 = vld [vmem:[#allocation269_spill] sm:$0xff] }
 0x4be   : > { %v2977_v45 = vmul.f32 %v2594_v38, %v10289_v29  ;;  %v2978_v48 = vmul.f32 %v2683_v22, %v10290_v6  ;;  %v10296_v38 = vld [vmem:[#allocation177_spill] sm:$0xff]  ;;  %v10297_v29 = vld [vmem:[#allocation91_spill] sm:$0xff] }
 0x4bf   : > { %v2826_v59 = vpop.f32.mrf.mxu1  ;;  %v2927_v22 = vmul.f32 %v8224_v46, %v10296_v38  ;;  %v1147_v6 = vadd.f32 %v10297_v29, %v7991_v58  ;;  %v10300_v46 = vld [vmem:[#allocation98_spill] sm:$0xff]  ;;  %v10302_v29 = vld [vmem:[#allocation103_spill] sm:$0xff] }
 0x4c0   : > { %v8574_v12 = vmul.f32 %v2977_v45, %v1073_v44  ;;  %v8576_v11 = vmul.f32 %v2978_v48, %v1186_v0  ;;  %v8578_v26 = vpop.f32.mrf.mxu0  ;;  %v2924_v18 = vmul.f32 %v2826_v59, %v10295_v23  ;;  %v10299_v44 = vld [vmem:[#allocation92_spill] sm:$0xff]  ;;  %v1076_v59 = vadd.f32 %v10300_v46, %v8170_v56 }
 0x4c1   : > { %v1260_v0 = vadd.f32 %v10299_v44, %v7977_v14  ;;  %v3054_v45 = vmul.f32 %v2926_v60, %v1147_v6  ;;  %3731 = vmatpush.bf16.msra.mxu1 %v5248_v17  ;;  %v10304_v44 = vld [vmem:[#allocation233_spill] sm:$0xff] }
 0x4c2   : > { %10293 = vst [vmem:[#allocation165_spill] sm:$0xff] %v8574_v12  ;;  %v8585_v28 = vmul.f32 %v2924_v18, %v1370_v30  ;;  %5081 = vmatmul.msk.bf16.gmra.mxu1 %vm2467_vm10, %v8195_v20  ;;  %v5247_v30 = vld [vmem:[#allocation14 + $0xd0] sm:$0xff]  ;;  %v1373_v20 = vadd.f32 %v10302_v29, %v8313_v10 }
 0x4c3   : > { %10294 = vst [vmem:[#allocation258_spill] sm:$0xff] %v8576_v11  ;;  %v3055_v48 = vmul.f32 %v2927_v22, %v1260_v0  ;;  %v3158_v22 = vpack.c.bf16 %v3054_v45, %v8222_v36  ;;  %v10305_v6 = vld [vmem:[#allocation149_spill] sm:$0xff]  ;;  %v10306_v0 = vld [vmem:[#allocation234_spill] sm:$0xff]  ;;  %v10309_v11 = vld [vmem:[#allocation176_spill] sm:$0xff] }
 0x4c4   : > { %10298 = vst [vmem:[#allocation58_spill] sm:$0xff] %v8585_v28  ;;  %v1305_v17 = vadd.f32 %v10305_v6, %v7977_v14  ;;  %v10310_v29 = vpack.c.bf16 %v10308_v2, %v10309_v11  ;;  %v10313_v2 = vld [vmem:[#allocation148_spill] sm:$0xff]  ;;  %v10316_v6 = vld [vmem:[#allocation107_spill] sm:$0xff]  ;;  %v10327_v28 = vld [vmem:[#allocation178_spill] sm:$0xff] }
 0x4c5   : > { %v2596_v23 = vpop.f32.mrf.mxu2  ;;  %v8591_v5 = vpop.f32.mrf.mxu3  ;;  %3732 = vmatpush.bf16.msra.mxu1 %v5247_v30  ;;  %v1192_v11 = vadd.f32 %v10313_v2, %v7991_v58 }
 0x4c6   : > { %v2981_v38 = vmul.f32 %v2596_v23, %v10301_v42  ;;  %v3159_v23 = vpack.c.bf16 %v3055_v48, %v8208_v62  ;;  %v10312_v48 = vld [vmem:[#allocation100_spill] sm:$0xff] }
 0x4c7   : > { %v2828_v18 = vpop.f32.mrf.mxu1  ;;  %v1079_v30 = vadd.f32 %v10312_v48, %v8170_v56 }
 0x4c8   : > { %v8598_v57 = vmul.f32 %v2981_v38, %v1076_v59  ;;  %v2777_v52 = vpop.f32.mrf.mxu0  ;;  %v2928_v60 = vmul.f32 %v2828_v18, %v10304_v44  ;;  %v5246_v59 = vld [vmem:[#allocation14 + $0xc8] sm:$0xff]  ;;  %v10314_v18 = vld [vmem:[#allocation235_spill] sm:$0xff]  ;;  %v10322_v38 = vld [vmem:[#allocation237_spill] sm:$0xff] }
 0x4c9   : > { %v2987_v46 = vmul.f32 %v2777_v52, %v10306_v0  ;;  %3733 = vmatpush.bf16.msra.mxu1 %v5246_v59  ;;  %v10315_v44 = vld [vmem:[#allocation236_spill] sm:$0xff] }
 0x4ca   : > { %10303 = vst [vmem:[#allocation71_spill] sm:$0xff] %v8598_v57  ;;  %v8606_v42 = vmul.f32 %v2928_v60, %v1373_v20  ;;  %3493 = vmatmul.bf16.gmra.mxu2 %v10310_v29  ;;  %3582 = vmatmul.bf16.gmra.mxu3 %v3158_v22  ;;  %v5245_v22 = vld [vmem:[#allocation14 + $0xc0] sm:$0xff] }
 0x4cb   : > { %v8613_v36 = vmul.f32 %v2987_v46, %v1305_v17  ;;  %3671 = vmatmul.bf16.gmra.mxu0 %v3159_v23  ;;  %v1376_v17 = vadd.f32 %v10316_v6, %v8313_v10  ;;  %v10317_v46 = vld [vmem:[#allocation185_spill] sm:$0xff]  ;;  %v10318_v23 = vld [vmem:[#allocation182_spill] sm:$0xff] }
 0x4cc   : > { %10307 = vst [vmem:[#allocation189_spill] sm:$0xff] %v8606_v42  ;;  %v2934_v29 = vmul.f32 %v10318_v23, %v10317_v46 }
 0x4cd   : > { %10311 = vst [vmem:[#allocation191_spill] sm:$0xff] %v8613_v36  ;;  %v2599_v45 = vpop.f32.mrf.mxu2  ;;  %v2688_v62 = vpop.f32.mrf.mxu3  ;;  %3734 = vmatpush.bf16.msra.mxu1 %v5245_v22 }
 0x4ce   : > { %v2985_v20 = vmul.f32 %v2599_v45, %v10314_v18  ;;  %v2986_v60 = vmul.f32 %v2688_v62, %v10315_v44  ;;  %v10323_v45 = vld [vmem:[#allocation183_spill] sm:$0xff]  ;;  %v10324_v18 = vld [vmem:[#allocation181_spill] sm:$0xff] }
 0x4cf   : > { %v2831_v0 = vpop.f32.mrf.mxu1  ;;  %v2935_v62 = vmul.f32 %v10324_v18, %v10323_v45  ;;  %v10325_v44 = vld [vmem:[#allocation101_spill] sm:$0xff] }
 0x4d0   : > { %v8627_v59 = vmul.f32 %v2985_v20, %v1079_v30  ;;  %v8629_v52 = vmul.f32 %v2986_v60, %v1192_v11  ;;  %v8631_v48 = vpop.f32.mrf.mxu0  ;;  %v2932_v2 = vmul.f32 %v2831_v0, %v10322_v38  ;;  %v1153_v36 = vadd.f32 %v10325_v44, %v7991_v58  ;;  %v10328_v30 = vld [vmem:[#allocation102_spill] sm:$0xff]  ;;  %v10330_v38 = vld [vmem:[#allocation104_spill] sm:$0xff]  ;;  %v10331_v0 = vld [vmem:[#allocation239_spill] sm:$0xff] }
 0x4d1   : > { %10321 = vst [vmem:[#allocation193_spill] sm:$0xff] %v8631_v48  ;;  %v1266_v11 = vadd.f32 %v10328_v30, %v7977_v14  ;;  %v1082_v22 = vadd.f32 %v10330_v38, %v8170_v56  ;;  %v10334_v30 = vld [vmem:[#allocation96_spill] sm:$0xff] }
 0x4d2   : > { %10319 = vst [vmem:[#allocation73_spill] sm:$0xff] %v8627_v59  ;;  %v8638_v6 = vmul.f32 %v2932_v2, %v1376_v17  ;;  %5082 = vmatmul.msk.bf16.gmra.mxu1 %vm2467_vm10, %v10327_v28  ;;  %v3062_v20 = vmul.f32 %v2934_v29, %v1153_v36  ;;  %v10332_v17 = vld [vmem:[#allocation111_spill] sm:$0xff] }
 0x4d3   : > { %10320 = vst [vmem:[#allocation75_spill] sm:$0xff] %v8629_v52  ;;  %v3063_v60 = vmul.f32 %v2935_v62, %v1266_v11  ;;  %v1379_v2 = vadd.f32 %v10332_v17, %v8313_v10  ;;  %v10333_v52 = vld [vmem:[#allocation241_spill] sm:$0xff]  ;;  %v10335_v29 = vld [vmem:[#allocation155_spill] sm:$0xff]  ;;  %v10336_v11 = vld [vmem:[#allocation242_spill] sm:$0xff] }
 0x4d4   : > { %10326 = vst [vmem:[#allocation115_spill] sm:$0xff] %v8638_v6  ;;  %v3162_v36 = vpack.c.bf16 %v3062_v20, %v10334_v30  ;;  %v1311_v62 = vadd.f32 %v10335_v29, %v7977_v14  ;;  %v10362_v6 = vld [vmem:[#allocation249_spill] sm:$0xff] }
 0x4d5   : > { %v2601_v46 = vpop.f32.mrf.mxu2  ;;  %v8644_v23 = vpop.f32.mrf.mxu3 }
 0x4d6   : > { %10329 = vst [vmem:[#allocation194_spill] sm:$0xff] %v8644_v23  ;;  %v2989_v45 = vmul.f32 %v2601_v46, %v10331_v0  ;;  %v10337_v23 = vld [vmem:[#allocation97_spill] sm:$0xff]  ;;  %v10339_v46 = vld [vmem:[#allocation270_spill] sm:$0xff]  ;;  %v10340_v0 = vld [vmem:[#allocation68_spill] sm:$0xff] }
 0x4d7   : > { %v2833_v18 = vpop.f32.mrf.mxu1  ;;  %v3163_v38 = vpack.c.bf16 %v3063_v60, %v10337_v23  ;;  %v10341_v57 = vpack.c.bf16 %v10339_v46, %v10340_v0  ;;  %v10343_v60 = vld [vmem:[#allocation108_spill] sm:$0xff]  ;;  %v10344_v23 = vld [vmem:[#allocation154_spill] sm:$0xff] }
 0x4d8   : > { %v8651_v44 = vmul.f32 %v2989_v45, %v1082_v22  ;;  %v2782_v28 = vpop.f32.mrf.mxu0  ;;  %v2936_v42 = vmul.f32 %v2833_v18, %v10333_v52  ;;  %v1198_v17 = vadd.f32 %v10344_v23, %v7991_v58  ;;  %v10353_v23 = vld [vmem:[#allocation190_spill] sm:$0xff] }
 0x4d9   : > { %v2995_v48 = vmul.f32 %v2782_v28, %v10336_v11  ;;  %v10346_v28 = vld [vmem:[#allocation244_spill] sm:$0xff]  ;;  %v10349_v11 = vld [vmem:[#allocation105_spill] sm:$0xff] }
 0x4da   : > { %v8659_v12 = vmul.f32 %v2936_v42, %v1379_v2  ;;  %3498 = vmatmul.bf16.gmra.mxu2 %v10341_v57  ;;  %3587 = vmatmul.bf16.gmra.mxu3 %v3162_v36  ;;  %v1085_v42 = vadd.f32 %v10343_v60, %v8170_v56  ;;  %v10345_v2 = vld [vmem:[#allocation243_spill] sm:$0xff]  ;;  %v10347_v36 = vld [vmem:[#allocation113_spill] sm:$0xff] }
 0x4db   : > { %v8666_v52 = vmul.f32 %v2995_v48, %v1311_v62  ;;  %3676 = vmatmul.bf16.gmra.mxu0 %v3163_v38  ;;  %v1382_v48 = vadd.f32 %v10347_v36, %v8313_v10  ;;  %v10348_v62 = vld [vmem:[#allocation192_spill] sm:$0xff]  ;;  %v10352_v60 = vld [vmem:[#allocation245_spill] sm:$0xff] }
 0x4dc   : > { %10338 = vst [vmem:[#allocation74_spill] sm:$0xff] %v8659_v12  ;;  %v2942_v38 = vmul.f32 %v10349_v11, %v10348_v62  ;;  %v10356_v36 = vld [vmem:[#allocation184_spill] sm:$0xff] }
 0x4dd   : > { %10342 = vst [vmem:[#allocation114_spill] sm:$0xff] %v8666_v52  ;;  %v2604_v45 = vpop.f32.mrf.mxu2  ;;  %v2693_v18 = vpop.f32.mrf.mxu3  ;;  %v10354_v52 = vld [vmem:[#allocation70_spill] sm:$0xff] }
 0x4de   : > { %v2993_v57 = vmul.f32 %v2604_v45, %v10345_v2  ;;  %v2994_v30 = vmul.f32 %v2693_v18, %v10346_v28  ;;  %v2943_v45 = vmul.f32 %v10354_v52, %v10353_v23  ;;  %v10355_v18 = vld [vmem:[#allocation109_spill] sm:$0xff]  ;;  %v10360_v52 = vld [vmem:[#allocation247_spill] sm:$0xff] }
 0x4df   : > { %v2836_v29 = vpop.f32.mrf.mxu1  ;;  %v1159_v2 = vadd.f32 %v10355_v18, %v7991_v58 }
 0x4e0   : > { %v8680_v46 = vmul.f32 %v2993_v57, %v1085_v42  ;;  %v8682_v0 = vmul.f32 %v2994_v30, %v1198_v17  ;;  %v8684_v20 = vpop.f32.mrf.mxu0  ;;  %v2940_v22 = vmul.f32 %v2836_v29, %v10352_v60  ;;  %v10357_v42 = vld [vmem:[#allocation110_spill] sm:$0xff]  ;;  %v10359_v29 = vld [vmem:[#allocation112_spill] sm:$0xff] }
 0x4e1   : > { %10351 = vst [vmem:[#allocation196_spill] sm:$0xff] %v8684_v20  ;;  %v1272_v57 = vadd.f32 %v10357_v42, %v7977_v14  ;;  %v3070_v17 = vmul.f32 %v2942_v38, %v1159_v2  ;;  %v1088_v60 = vadd.f32 %v10359_v29, %v8170_v56  ;;  %v10363_v42 = vld [vmem:[#allocation186_spill] sm:$0xff] }
 0x4e2   : > { %10350 = vst [vmem:[#allocation195_spill] sm:$0xff] %v8682_v0  ;;  %v8691_v28 = vmul.f32 %v2940_v22, %v1382_v48  ;;  %5083 = vmatmul.msk.bf16.gmra.mxu1 %vm2467_vm10, %v10356_v36  ;;  %v10361_v22 = vld [vmem:[#allocation117_spill] sm:$0xff] }
 0x4e3   : > { %v3071_v30 = vmul.f32 %v2943_v45, %v1272_v57  ;;  %v1385_v48 = vadd.f32 %v10361_v22, %v8313_v10  ;;  %v3166_v38 = vpack.c.bf16 %v3070_v17, %v10363_v42  ;;  %v10364_v45 = vld [vmem:[#allocation161_spill] sm:$0xff]  ;;  %v10365_v57 = vld [vmem:[#allocation250_spill] sm:$0xff]  ;;  %v10371_v22 = vld [vmem:[#allocation252_spill] sm:$0xff] }
 0x4e4   : > { %v1317_v2 = vadd.f32 %v10364_v45, %v7977_v14 }
 0x4e5   : > { %v2606_v62 = vpop.f32.mrf.mxu2  ;;  %v8697_v11 = vpop.f32.mrf.mxu3 }
 0x4e6   : > { %10358 = vst [vmem:[#allocation168_spill] sm:$0xff] %v8697_v11  ;;  %v2997_v23 = vmul.f32 %v2606_v62, %v10360_v52  ;;  %v10366_v11 = vld [vmem:[#allocation106_spill] sm:$0xff]  ;;  %v10367_v62 = vpack.c.bf16 %v8327_v41, %v8300_v31  ;;  %v10370_v31 = vld [vmem:[#allocation251_spill] sm:$0xff] }
 0x4e7   : > { %v2838_v0 = vpop.f32.mrf.mxu1  ;;  %v3167_v29 = vpack.c.bf16 %v3071_v30, %v10366_v11  ;;  %v10368_v30 = vld [vmem:[#allocation116_spill] sm:$0xff] }
 0x4e8   : > { %v8704_v18 = vmul.f32 %v2997_v23, %v1088_v60  ;;  %v2787_v36 = vpop.f32.mrf.mxu0  ;;  %v2944_v12 = vmul.f32 %v2838_v0, %v10362_v6  ;;  %v10369_v11 = vld [vmem:[#allocation160_spill] sm:$0xff] }
 0x4e9   : > { %v3003_v20 = vmul.f32 %v2787_v36, %v10365_v57  ;;  %v1204_v23 = vadd.f32 %v10369_v11, %v7991_v58  ;;  %v10372_v36 = vld [vmem:[#allocation200_spill] sm:$0xff]  ;;  %v10375_v11 = vld [vmem:[#allocation119_spill] sm:$0xff] }
 0x4ea   : > { %v8712_v59 = vmul.f32 %v2944_v12, %v1385_v48  ;;  %3503 = vmatmul.bf16.gmra.mxu2 %v10367_v62  ;;  %3592 = vmatmul.bf16.gmra.mxu3 %v3166_v38  ;;  %v1091_v12 = vadd.f32 %v10368_v30, %v8170_v56  ;;  %v10373_v38 = vld [vmem:[#allocation121_spill] sm:$0xff] }
 0x4eb   : > { %v8719_v6 = vmul.f32 %v3003_v20, %v1317_v2  ;;  %3681 = vmatmul.bf16.gmra.mxu0 %v3167_v29  ;;  %v2950_v20 = vmul.f32 %v8371_v40, %v10372_v36  ;;  %v1388_v45 = vadd.f32 %v10373_v38, %v8313_v10  ;;  %v10374_v62 = vld [vmem:[#allocation253_spill] sm:$0xff]  ;;  %v10377_v40 = vpack.c.bf16 %v8335_v9, %v8333_v24 }
 0x4ed   : > { %v2609_v17 = vpop.f32.mrf.mxu2  ;;  %v2698_v52 = vpop.f32.mrf.mxu3 }
 0x4ee   : > { %v3001_v41 = vmul.f32 %v2609_v17, %v10370_v31  ;;  %v3002_v48 = vmul.f32 %v2698_v52, %v10371_v22  ;;  %v1165_v17 = vadd.f32 %v10375_v11, %v7991_v58  ;;  %v10376_v31 = vld [vmem:[#allocation198_spill] sm:$0xff]  ;;  %v10380_v11 = vld [vmem:[#allocation255_spill] sm:$0xff] }
 0x4ef   : > { %v2841_v42 = vpop.f32.mrf.mxu1  ;;  %v2951_v52 = vmul.f32 %v8361_v16, %v10376_v31  ;;  %v10381_v16 = vld [vmem:[#allocation124_spill] sm:$0xff]  ;;  %v10382_v31 = vld [vmem:[#allocation257_spill] sm:$0xff] }
 0x4f0   : > { %v8733_v2 = vmul.f32 %v3001_v41, %v1091_v12  ;;  %v8735_v57 = vmul.f32 %v3002_v48, %v1204_v23  ;;  %v8737_v29 = vpop.f32.mrf.mxu0  ;;  %v2948_v30 = vmul.f32 %v2841_v42, %v10374_v62  ;;  %v10378_v12 = vld [vmem:[#allocation120_spill] sm:$0xff]  ;;  %v3078_v41 = vmul.f32 %v2950_v20, %v1165_v17  ;;  %v10379_v42 = vld [vmem:[#allocation118_spill] sm:$0xff] }
 0x4f1   : > { %v1278_v23 = vadd.f32 %v10378_v12, %v7977_v14  ;;  %v1094_v62 = vadd.f32 %v10379_v42, %v8170_v56  ;;  %v10383_v17 = vld [vmem:[#allocation72_spill] sm:$0xff]  ;;  %v10385_v56 = vpack.c.bf16 %v8381_v19, %v8357_v25  ;;  %v10386_v25 = vld [vmem:[#allocation127_spill] sm:$0xff] }
 0x4f2   : > { %v8744_v22 = vmul.f32 %v2948_v30, %v1388_v45  ;;  %3735 = vmatmul.bf16.vlgmr.msra.gmra.mxu1 %v10377_v40  ;;  %v1391_v45 = vadd.f32 %v10381_v16, %v8313_v10  ;;  %v3170_v24 = vpack.c.bf16 %v3078_v41, %v8359_v50  ;;  %vm3265_vm1 = vcmp.eq.s32.totalorder %v10383_v17, 16  ;;  %v10387_v16 = vld [vmem:[#allocation208_spill] sm:$0xff] }
 0x4f3   : > { %v3079_v48 = vmul.f32 %v2951_v52, %v1278_v23  ;;  %v10384_v52 = vld [vmem:[#allocation187_spill] sm:$0xff]  ;;  %v9884_v50 = vmov 0.0   ;;  %v1394_v19 = vadd.f32 %v10386_v25, %v8313_v10 }
 0x4f5   : > { %v2611_v36 = vpop.f32.mrf.mxu2  ;;  %v8751_v38 = vpop.f32.mrf.mxu3  ;;  %v3171_v12 = vpack.c.bf16 %v3079_v48, %v10384_v52  ;;  %v10389_v52 = vld [vmem:[#allocation206_spill] sm:$0xff] }
 0x4f6   : > { %v3005_v0 = vmul.f32 %v2611_v36, %v10380_v11  ;;  %v10394_v36 = vld [vmem:[#allocation260_spill] sm:$0xff] }
 0x4f7   : > { %v2843_v30 = vpop.f32.mrf.mxu1 }
 0x4f8   : > { %v8759_v9 = vmul.f32 %v3005_v0, %v1094_v62  ;;  %v2952_v40 = vmul.f32 %v2843_v30, %v10382_v31  ;;  %v3647_v20 = vpop.f32.mrf.mxu0  ;;  %v8772_v0 = vsel %vm3265_vm1, 1.0, %v9884_v50 }
 0x4fa   : > { %v8764_v23 = vmul.f32 %v2952_v40, %v1391_v45  ;;  %3508 = vmatmul.bf16.gmra.mxu2 %v10385_v56  ;;  %3597 = vmatmul.bf16.gmra.mxu3 %v3170_v24  ;;  %v2958_v45 = vmul.f32 %v8425_v34, %v10387_v16  ;;  %v10388_v24 = vld [vmem:[#allocation259_spill] sm:$0xff]  ;;  %v10390_v56 = vld [vmem:[#allocation125_spill] sm:$0xff]  ;;  %v10392_v34 = vld [vmem:[#allocation126_spill] sm:$0xff] }
 0x4fb   : > { %3686 = vmatmul.bf16.gmra.mxu0 %v3171_v12  ;;  %v2959_v12 = vmul.f32 %v8415_v15, %v10389_v52  ;;  %v1171_v50 = vadd.f32 %v10390_v56, %v7991_v58  ;;  %v10393_v56 = vld [vmem:[#allocation128_spill] sm:$0xff] }
 0x4fd   : > { %v3469_v42 = vpop.f32.mrf.mxu2  ;;  %v3558_v48 = vpop.f32.mrf.mxu3 }
 0x4fe   : > { %v3470_v62 = vadd.f32 %v8772_v0, %v3469_v42  ;;  %v10391_v42 = vpack.c.bf16 %v8389_v63, %v8387_v54 }
 0x4ff   : > { %v2846_v11 = vpop.f32.mrf.mxu1 }
 0x500   : > { %v3559_v30 = vadd.f32 %v3558_v48, %v3470_v62  ;;  %v2956_v31 = vmul.f32 %v2846_v11, %v10388_v24  ;;  %v3649_v40 = vpop.f32.mrf.mxu0  ;;  %v1284_v48 = vadd.f32 %v10392_v34, %v7977_v14  ;;  %v3086_v62 = vmul.f32 %v2958_v45, %v1171_v50 }
 0x501   : > { %v10396_v50 = vpack.c.bf16 %v8435_v1, %v8411_v3  ;;  %v10399_v1 = vld [vmem:[#allocation261_spill] sm:$0xff] }
 0x502   : > { %v8786_v41 = vmul.f32 %v2956_v31, %v1394_v19  ;;  %3740 = vmatmul.bf16.gmra.mxu1 %v10391_v42  ;;  %v8791_v25 = vadd.f32 %v3647_v20, %v3559_v30  ;;  %v3087_v11 = vmul.f32 %v2959_v12, %v1284_v48  ;;  %v1397_v19 = vadd.f32 %v10393_v56, %v8313_v10  ;;  %v10395_v20 = vld [vmem:[#allocation188_spill] sm:$0xff] }
 0x503   : > { %v3174_v63 = vpack.c.bf16 %v3086_v62, %v8413_v39  ;;  %v10397_v62 = vld [vmem:[#allocation131_spill] sm:$0xff]  ;;  %v10401_v56 = vld [vmem:[#allocation132_spill] sm:$0xff] }
 0x504   : > { %v3175_v30 = vpack.c.bf16 %v3087_v11, %v10395_v20  ;;  %v10398_v11 = vld [vmem:[#allocation216_spill] sm:$0xff] }
 0x505   : > { %v3471_v16 = vpop.f32.mrf.mxu2  ;;  %v3560_v24 = vpop.f32.mrf.mxu3 }
 0x506   : > { %v3472_v15 = vadd.f32 %v8772_v0, %v3471_v16  ;;  %v2966_v16 = vmul.f32 %v8479_v33, %v10398_v11  ;;  %v10403_v33 = vld [vmem:[#allocation133_spill] sm:$0xff] }
 0x507   : > { %v2848_v52 = vpop.f32.mrf.mxu1 }
 0x508   : > { %v3561_v31 = vadd.f32 %v3560_v24, %v3472_v15  ;;  %v2960_v60 = vmul.f32 %v2848_v52, %v10394_v36  ;;  %v3652_v54 = vpop.f32.mrf.mxu0  ;;  %v10400_v15 = vld [vmem:[#allocation214_spill] sm:$0xff] }
 0x509   : > { %v2967_v52 = vmul.f32 %v8469_v53, %v10400_v15 }
 0x50a   : > { %v8801_v42 = vmul.f32 %v2960_v60, %v1397_v19  ;;  %3513 = vmatmul.bf16.gmra.mxu2 %v10396_v50  ;;  %3602 = vmatmul.bf16.gmra.mxu3 %v3174_v63  ;;  %v8806_v45 = vadd.f32 %v3649_v40, %v3561_v31  ;;  %v1400_v60 = vadd.f32 %v10397_v62, %v8313_v10  ;;  %v10404_v62 = vld [vmem:[#allocation134_spill] sm:$0xff] }
 0x50b   : > { %3691 = vmatmul.bf16.gmra.mxu0 %v3175_v30  ;;  %v1177_v19 = vadd.f32 %v10401_v56, %v7991_v58  ;;  %v10402_v63 = vpack.c.bf16 %v8443_v13, %v8441_v4  ;;  %v1290_v30 = vadd.f32 %v10403_v33, %v7977_v14  ;;  %v10406_v13 = vld [vmem:[#allocation166_spill] sm:$0xff] }
 0x50c   : > { %v3176_v12 = vpack.c.bf16 %v8801_v42, %v8786_v41 }
 0x50d   : > { %v3474_v34 = vpop.f32.mrf.mxu2  ;;  %v3563_v36 = vpop.f32.mrf.mxu3  ;;  %v3094_v50 = vmul.f32 %v2966_v16, %v1177_v19  ;;  %v10407_v16 = vpack.c.bf16 %v8489_v61, %v8465_v27  ;;  %v10410_v61 = vld [vmem:[#allocation263_spill] sm:$0xff] }
 0x50e   : > { %v3475_v48 = vadd.f32 %v8772_v0, %v3474_v34  ;;  %v3095_v34 = vmul.f32 %v2967_v52, %v1290_v30  ;;  %v10408_v30 = vld [vmem:[#allocation137_spill] sm:$0xff] }
 0x50f   : > { %v2851_v39 = vpop.f32.mrf.mxu1  ;;  %v3178_v4 = vpack.c.bf16 %v3094_v50, %v8467_v51  ;;  %v1406_v50 = vadd.f32 %v10408_v30, %v8313_v10 }
 0x510   : > { %v3564_v3 = vadd.f32 %v3563_v36, %v3475_v48  ;;  %v2964_v24 = vmul.f32 %v2851_v39, %v10399_v1  ;;  %v3654_v40 = vpop.f32.mrf.mxu0  ;;  %v10405_v1 = vld [vmem:[#allocation262_spill] sm:$0xff] }
 0x512   : > { %v8820_v31 = vmul.f32 %v2964_v24, %v1400_v60  ;;  %3745 = vmatmul.bf16.gmra.mxu1 %v10402_v63  ;;  %v8825_v20 = vadd.f32 %v3652_v54, %v3564_v3  ;;  %v1403_v60 = vadd.f32 %v10404_v62, %v8313_v10  ;;  %v3179_v54 = vpack.c.bf16 %v3095_v34, %v10406_v13  ;;  %v10409_v34 = vld [vmem:[#allocation224_spill] sm:$0xff] }
 0x515   : > { %v3476_v36 = vpop.f32.mrf.mxu2  ;;  %v3565_v48 = vpop.f32.mrf.mxu3 }
 0x516   : > { %v3477_v53 = vadd.f32 %v8772_v0, %v3476_v36  ;;  %v2974_v36 = vmul.f32 %v8538_v37, %v10409_v34 }
 0x517   : > { %v2853_v39 = vpop.f32.mrf.mxu1 }
 0x518   : > { %v3566_v11 = vadd.f32 %v3565_v48, %v3477_v53  ;;  %v2968_v24 = vmul.f32 %v2853_v39, %v10405_v1  ;;  %v3657_v15 = vpop.f32.mrf.mxu0  ;;  %v10412_v39 = vld [vmem:[#allocation138_spill] sm:$0xff] }
 0x519   : > { %v1183_v62 = vadd.f32 %v10412_v39, %v7991_v58 }
 0x51a   : > { %v8835_v3 = vmul.f32 %v2968_v24, %v1403_v60  ;;  %3518 = vmatmul.bf16.gmra.mxu2 %v10407_v16  ;;  %3607 = vmatmul.bf16.gmra.mxu3 %v3178_v4  ;;  %v8840_v52 = vadd.f32 %v3654_v40, %v3566_v11  ;;  %v10411_v40 = vld [vmem:[#allocation222_spill] sm:$0xff]  ;;  %v10413_v11 = vpack.c.bf16 %v8497_v7, %v8495_v21  ;;  %v10414_v24 = vld [vmem:[#allocation139_spill] sm:$0xff] }
 0x51b   : > { %3696 = vmatmul.bf16.gmra.mxu0 %v3179_v54  ;;  %v2975_v53 = vmul.f32 %v8525_v8, %v10411_v40  ;;  %v1296_v37 = vadd.f32 %v10414_v24, %v7977_v14  ;;  %v3102_v4 = vmul.f32 %v2974_v36, %v1183_v62  ;;  %v10417_v36 = vpack.c.bf16 %v8545_v43, %v8521_v47  ;;  %v10420_v24 = vld [vmem:[#allocation265_spill] sm:$0xff] }
 0x51c   : > { %v3180_v56 = vpack.c.bf16 %v8835_v3, %v8820_v31 }
 0x51d   : > { %v3479_v19 = vpop.f32.mrf.mxu2  ;;  %v3568_v63 = vpop.f32.mrf.mxu3  ;;  %v3103_v54 = vmul.f32 %v2975_v53, %v1296_v37  ;;  %v3182_v7 = vpack.c.bf16 %v3102_v4, %v8523_v35  ;;  %v10421_v4 = vld [vmem:[#allocation230_spill] sm:$0xff] }
 0x51e   : > { %v3480_v51 = vadd.f32 %v8772_v0, %v3479_v19 }
 0x51f   : > { %v2856_v33 = vpop.f32.mrf.mxu1 }
 0x520   : > { %v3569_v27 = vadd.f32 %v3568_v63, %v3480_v51  ;;  %v2972_v48 = vmul.f32 %v2856_v33, %v10410_v61  ;;  %v3659_v13 = vpop.f32.mrf.mxu0  ;;  %v10415_v51 = vld [vmem:[#allocation140_spill] sm:$0xff] }
 0x521   : > { %v1409_v33 = vadd.f32 %v10415_v51, %v8313_v10  ;;  %v10424_v51 = vld [vmem:[#allocation146_spill] sm:$0xff] }
 0x522   : > { %v8854_v60 = vmul.f32 %v2972_v48, %v1406_v50  ;;  %3750 = vmatmul.bf16.gmra.mxu1 %v10413_v11  ;;  %v8859_v1 = vadd.f32 %v3657_v15, %v3569_v27  ;;  %v10416_v50 = vld [vmem:[#allocation264_spill] sm:$0xff]  ;;  %v3183_v15 = vpack.c.bf16 %v3103_v54, %v8504_v49  ;;  %v10418_v49 = vld [vmem:[#allocation141_spill] sm:$0xff] }
 0x523   : > { %v1412_v62 = vadd.f32 %v10418_v49, %v8313_v10  ;;  %v10419_v11 = vld [vmem:[#allocation232_spill] sm:$0xff]  ;;  %v10422_v54 = vld [vmem:[#allocation145_spill] sm:$0xff] }
 0x524   : > { %v2982_v47 = vmul.f32 %v8591_v5, %v10419_v11  ;;  %v1302_v5 = vadd.f32 %v10424_v51, %v7977_v14 }
 0x525   : > { %v3481_v16 = vpop.f32.mrf.mxu2  ;;  %v3570_v19 = vpop.f32.mrf.mxu3 }
 0x526   : > { %v3482_v8 = vadd.f32 %v8772_v0, %v3481_v16  ;;  %v1189_v16 = vadd.f32 %v10422_v54, %v7991_v58  ;;  %v10435_v54 = vld [vmem:[#allocation71_spill] sm:$0xff] }
 0x527   : > { %v2858_v63 = vpop.f32.mrf.mxu1 }
 0x528   : > { %v3571_v30 = vadd.f32 %v3570_v19, %v3482_v8  ;;  %v2976_v21 = vmul.f32 %v2858_v63, %v10416_v50  ;;  %v3662_v35 = vpop.f32.mrf.mxu0  ;;  %v10423_v8 = vpack.c.bf16 %v8553_v55, %v8532_v32  ;;  %v10425_v50 = vld [vmem:[#allocation39_spill] sm:$0xff]  ;;  %v10429_v55 = vld [vmem:[#allocation54_spill] sm:$0xff] }
 0x52a   : > { %v8869_v34 = vmul.f32 %v2976_v21, %v1409_v33  ;;  %3523 = vmatmul.bf16.gmra.mxu2 %v10417_v36  ;;  %3612 = vmatmul.bf16.gmra.mxu3 %v3182_v7  ;;  %v8874_v27 = vadd.f32 %v3659_v13, %v3571_v30  ;;  %v2983_v13 = vmul.f32 %v8578_v26, %v10421_v4  ;;  %v6135_v33 = vmov 21   ;;  %v10427_v21 = vld [vmem:[#allocation49_spill] sm:$0xff] }
 0x52b   : > { %3701 = vmatmul.bf16.gmra.mxu0 %v3183_v15  ;;  %5642 = vset.pattern.permute.xlu1 %v6135_v33  ;;  %v3110_v30 = vmul.f32 %v2982_v47, %v1189_v16  ;;  %v10426_v26 = vcvt.f32.s32 %v10425_v50  ;;  %v10428_v7 = vcvt.f32.s32 %v10427_v21  ;;  %v10433_v47 = vld [vmem:[#allocation258_spill] sm:$0xff]  ;;  %v10436_v16 = vld [vmem:[#allocation165_spill] sm:$0xff]  ;;  %v10442_v21 = vld [vmem:[#allocation36_spill] sm:$0xff] }
 0x52c   : > { %v3184_v61 = vpack.c.bf16 %v8869_v34, %v8854_v60  ;;  %5641 = vset.pattern.permute.xlu0 %v6135_v33  ;;  %v3111_v15 = vmul.f32 %v2983_v13, %v1302_v5  ;;  %5643 = vset.pattern.permute.xlu2 %v6135_v33  ;;  %v10438_v5 = vld [vmem:[#allocation53_spill] sm:$0xff] }
 0x52d   : > { %v3484_v48 = vpop.f32.mrf.mxu2  ;;  %v3573_v40 = vpop.f32.mrf.mxu3  ;;  %1691 = vperm.xlu1 %5642, %v10426_v26   ;;  %1688 = vperm.xlu0 %5641, %v10428_v7   ;;  %v10439_v33 = vcvt.f32.s32 %v10438_v5  ;;  %v10443_v7 = vcvt.f32.s32 %v10442_v21  ;;  %v10455_v5 = vld [vmem:[#allocation50_spill] sm:$0xff] }
 0x52e   : > { %v3485_v53 = vadd.f32 %v8772_v0, %v3484_v48  ;;  %v10430_v48 = vcvt.f32.s32 %v10429_v55  ;;  %v10445_v55 = vld [vmem:[#allocation240_spill] sm:$0xff] }
 0x52f   : > { %v2861_v39 = vpop.f32.mrf.mxu1 }
 0x530   : > { %v3574_v43 = vadd.f32 %v3573_v40, %v3485_v53  ;;  %v2980_v37 = vmul.f32 %v2861_v39, %v10420_v24  ;;  %1736 = vperm.xlu2 %5643, %v10430_v48   ;;  %v3664_v24 = vpop.f32.mrf.mxu0  ;;  %v10446_v48 = vld [vmem:[#allocation194_spill] sm:$0xff] }
 0x532   : > { %v8888_v19 = vmul.f32 %v2980_v37, %v1412_v62  ;;  %3755 = vmatmul.bf16.gmra.mxu1 %v10423_v8  ;;  %v8893_v63 = vadd.f32 %v3662_v35, %v3574_v43  ;;  %v10431_v35 = vld [vmem:[#allocation144_spill] sm:$0xff]  ;;  %v10432_v62 = vld [vmem:[#allocation266_spill] sm:$0xff]  ;;  %v3186_v43 = vpack.c.bf16 %v3110_v30, %v10433_v47  ;;  %v10434_v37 = vld [vmem:[#allocation59_spill] sm:$0xff]  ;;  %v10437_v8 = vpack.c.bf16 %v10435_v54, %v10436_v16 }
 0x533   : > { %v1415_v39 = vadd.f32 %v10431_v35, %v8313_v10  ;;  %v3187_v4 = vpack.c.bf16 %v3111_v15, %v10434_v37  ;;  %v10440_v30 = vld [vmem:[#allocation35_spill] sm:$0xff]  ;;  %v10452_v37 = vld [vmem:[#allocation58_spill] sm:$0xff]  ;;  %v10454_v54 = vld [vmem:[#allocation152_spill] sm:$0xff] }
 0x534   : > { %v10441_v26 = vcvt.f32.s32 %v10440_v30  ;;  %v1308_v16 = vadd.f32 %v10454_v54, %v7977_v14  ;;  %v10457_v30 = vld [vmem:[#allocation33_spill] sm:$0xff]  ;;  %v10469_v54 = vld [vmem:[#allocation51_spill] sm:$0xff] }
 0x535   : > { %v3486_v36 = vpop.f32.mrf.mxu2  ;;  %v3575_v40 = vpop.f32.mrf.mxu3  ;;  %1739 = vperm.xlu1 %5642, %v10439_v33   ;;  %v10456_v33 = vcvt.f32.s32 %v10455_v5 }
 0x536   : > { %v3487_v32 = vadd.f32 %v8772_v0, %v3486_v36  ;;  %1685 = vperm.xlu0 %5641, %v10441_v26   ;;  %v10444_v36 = vld [vmem:[#allocation147_spill] sm:$0xff]  ;;  %v10458_v26 = vcvt.f32.s32 %v10457_v30  ;;  %v10473_v30 = vld [vmem:[#allocation153_spill] sm:$0xff] }
 0x537   : > { %v2863_v53 = vpop.f32.mrf.mxu1 }
 0x538   : > { %v3576_v49 = vadd.f32 %v3575_v40, %v3487_v32  ;;  %v2984_v11 = vmul.f32 %v2863_v53, %v10432_v62  ;;  %1682 = vperm.xlu2 %5643, %v10443_v7   ;;  %v1418_v32 = vadd.f32 %v10444_v36, %v8313_v10  ;;  %v2990_v40 = vmul.f32 %v10446_v48, %v10445_v55  ;;  %v10447_v53 = vld [vmem:[#allocation267_spill] sm:$0xff]  ;;  %v10459_v7 = vld [vmem:[#allocation60_spill] sm:$0xff] }
 0x539   : > { %v10462_v48 = vld [vmem:[#allocation268_spill] sm:$0xff] }
 0x53a   : > { %v8909_v13 = vmul.f32 %v2984_v11, %v1415_v39  ;;  %3528 = vmatmul.bf16.gmra.mxu2 %v10437_v8  ;;  %3617 = vmatmul.bf16.gmra.mxu3 %v3186_v43  ;;  %v8914_v51 = vadd.f32 %v3664_v24, %v3576_v49  ;;  %v10448_v39 = vld [vmem:[#allocation238_spill] sm:$0xff]  ;;  %v10449_v49 = vld [vmem:[#allocation193_spill] sm:$0xff]  ;;  %v10450_v11 = vld [vmem:[#allocation151_spill] sm:$0xff] }
 0x53b   : > { %3706 = vmatmul.bf16.gmra.mxu0 %v3187_v4  ;;  %v2991_v62 = vmul.f32 %v10449_v49, %v10448_v39  ;;  %v1195_v47 = vadd.f32 %v10450_v11, %v7991_v58  ;;  %v10451_v24 = vld [vmem:[#allocation189_spill] sm:$0xff]  ;;  %v10464_v49 = vld [vmem:[#allocation191_spill] sm:$0xff] }
 0x53c   : > { %v3188_v50 = vpack.c.bf16 %v8909_v13, %v8888_v19  ;;  %v10453_v4 = vpack.c.bf16 %v10451_v24, %v10452_v37 }
 0x53d   : > { %v3118_v8 = vmul.f32 %v2990_v40, %v1195_v47  ;;  %1730 = vperm.xlu1 %5642, %v10456_v33   ;;  %v3119_v21 = vmul.f32 %v2991_v62, %v1308_v16  ;;  %v10465_v47 = vld [vmem:[#allocation73_spill] sm:$0xff]  ;;  %v10467_v62 = vld [vmem:[#allocation46_spill] sm:$0xff]  ;;  %v10470_v16 = vcvt.f32.s32 %v10469_v54  ;;  %v10484_v54 = vld [vmem:[#allocation43_spill] sm:$0xff] }
 0x53e   : > { %1676 = vperm.xlu0 %5641, %v10458_v26   ;;  %v10466_v24 = vpack.c.bf16 %v8651_v44, %v10465_v47  ;;  %v10468_v37 = vcvt.f32.s32 %v10467_v62  ;;  %v1424_v26 = vadd.f32 %v10473_v30, %v8313_v10  ;;  %v10474_v44 = vld [vmem:[#allocation248_spill] sm:$0xff]  ;;  %v10488_v30 = vld [vmem:[#allocation34_spill] sm:$0xff] }
 0x53f   : > { %v2866_v15 = vpop.f32.mrf.mxu1  ;;  %v3191_v40 = vpack.c.bf16 %v3119_v21, %v10464_v49  ;;  %v10475_v21 = vld [vmem:[#allocation168_spill] sm:$0xff]  ;;  %v10480_v49 = vld [vmem:[#allocation74_spill] sm:$0xff] }
 0x540   : > { %v2988_v35 = vmul.f32 %v2866_v15, %v10447_v53  ;;  %v10460_v15 = vcvt.f32.s32 %v10459_v7  ;;  %v2998_v7 = vmul.f32 %v10475_v21, %v10474_v44  ;;  %v10489_v44 = vcvt.f32.s32 %v10488_v30  ;;  %v10490_v21 = vld [vmem:[#allocation156_spill] sm:$0xff] }
 0x541   : > { %v10503_v30 = vld [vmem:[#allocation180_spill] sm:$0xff] }
 0x542   : > { %v8933_v43 = vmul.f32 %v2988_v35, %v1418_v32  ;;  %3760 = vmatmul.bf16.gmra.mxu1 %v10453_v4  ;;  %1733 = vperm.xlu2 %5643, %v10460_v15   ;;  %v10461_v32 = vld [vmem:[#allocation150_spill] sm:$0xff]  ;;  %v10463_v35 = vld [vmem:[#allocation75_spill] sm:$0xff] }
 0x543   : > { %v1421_v55 = vadd.f32 %v10461_v32, %v8313_v10  ;;  %v3190_v39 = vpack.c.bf16 %v3118_v8, %v10463_v35  ;;  %v10471_v8 = vld [vmem:[#allocation57_spill] sm:$0xff]  ;;  %v10476_v15 = vld [vmem:[#allocation175_spill] sm:$0xff]  ;;  %v10477_v32 = vld [vmem:[#allocation246_spill] sm:$0xff] }
 0x544   : > { %v10472_v5 = vcvt.f32.s32 %v10471_v8  ;;  %v10486_v8 = vld [vmem:[#allocation48_spill] sm:$0xff] }
 0x545   : > { %1679 = vperm.xlu1 %5642, %v10468_v37  }
 0x546   : > { %1727 = vperm.xlu0 %5641, %v10470_v16   ;;  %v10485_v16 = vcvt.f32.s32 %v10484_v54 }
 0x547   : > { %v2868_v36 = vpop.f32.mrf.mxu1 }
 0x548   : > { %v2992_v53 = vmul.f32 %v2868_v36, %v10462_v48 }
 0x54a   : > { %v8951_v11 = vmul.f32 %v2992_v53, %v1421_v55  ;;  %3533 = vmatmul.bf16.gmra.mxu2 %v10466_v24  ;;  %3622 = vmatmul.bf16.gmra.mxu3 %v3190_v39  ;;  %v10478_v55 = vld [vmem:[#allocation196_spill] sm:$0xff]  ;;  %v10479_v53 = vld [vmem:[#allocation157_spill] sm:$0xff]  ;;  %v10483_v24 = vld [vmem:[#allocation158_spill] sm:$0xff] }
 0x54b   : > { %3711 = vmatmul.bf16.gmra.mxu0 %v3191_v40  ;;  %1724 = vperm.xlu2 %5643, %v10472_v5   ;;  %v2999_v48 = vmul.f32 %v10478_v55, %v10477_v32  ;;  %v1201_v35 = vadd.f32 %v10479_v53, %v7991_v58  ;;  %v10481_v40 = vld [vmem:[#allocation115_spill] sm:$0xff]  ;;  %v1314_v62 = vadd.f32 %v10483_v24, %v7977_v14  ;;  %v10487_v5 = vcvt.f32.s32 %v10486_v8 }
 0x54c   : > { %v3192_v4 = vpack.c.bf16 %v8951_v11, %v8933_v43  ;;  %v10482_v47 = vpack.c.bf16 %v10480_v49, %v10481_v40  ;;  %v10492_v55 = vld [vmem:[#allocation195_spill] sm:$0xff]  ;;  %v10493_v49 = vld [vmem:[#allocation114_spill] sm:$0xff]  ;;  %v10494_v40 = vpack.c.bf16 %v8704_v18, %v8680_v46  ;;  %v10502_v46 = vld [vmem:[#allocation256_spill] sm:$0xff] }
 0x54d   : > { %v3126_v37 = vmul.f32 %v2998_v7, %v1201_v35  ;;  %1670 = vperm.xlu1 %5642, %v10485_v16   ;;  %v3006_v18 = vmul.f32 %v8751_v38, %v10502_v46  ;;  %v10517_v46 = vld [vmem:[#allocation40_spill] sm:$0xff] }
 0x54e   : > { %1718 = vperm.xlu0 %5641, %v10487_v5   ;;  %v10501_v5 = vld [vmem:[#allocation159_spill] sm:$0xff] }
 0x54f   : > { %v2871_v33 = vpop.f32.mrf.mxu1  ;;  %v3194_v53 = vpack.c.bf16 %v3126_v37, %v10492_v55  ;;  %v10499_v37 = vld [vmem:[#allocation32_spill] sm:$0xff]  ;;  %v10506_v55 = vpack.c.bf16 %v8712_v59, %v8691_v28  ;;  %v10515_v59 = vld [vmem:[#allocation69_spill] sm:$0xff] }
 0x550   : > { %v2996_v36 = vmul.f32 %v2871_v33, %v10476_v15  ;;  %v3127_v33 = vmul.f32 %v2999_v48, %v1314_v62  ;;  %v1427_v15 = vadd.f32 %v10490_v21, %v8313_v10  ;;  %v10495_v48 = vld [vmem:[#allocation47_spill] sm:$0xff]  ;;  %v10500_v16 = vcvt.f32.s32 %v10499_v37  ;;  %v10514_v37 = vld [vmem:[#allocation162_spill] sm:$0xff] }
 0x551   : > { %v10497_v62 = vld [vmem:[#allocation31_spill] sm:$0xff] }
 0x552   : > { %v8973_v39 = vmul.f32 %v2996_v36, %v1424_v26  ;;  %3765 = vmatmul.bf16.gmra.mxu1 %v10482_v47  ;;  %v10491_v36 = vld [vmem:[#allocation67_spill] sm:$0xff]  ;;  %v3195_v7 = vpack.c.bf16 %v3127_v33, %v10493_v49  ;;  %v10496_v47 = vcvt.f32.s32 %v10495_v48  ;;  %v10498_v54 = vcvt.f32.s32 %v10497_v62  ;;  %v10510_v48 = vld [vmem:[#allocation37_spill] sm:$0xff]  ;;  %v10512_v62 = vld [vmem:[#allocation56_spill] sm:$0xff] }
 0x553   : > { %1673 = vperm.xlu2 %5643, %v10489_v44   ;;  %v1430_v33 = vadd.f32 %v10501_v5, %v8313_v10 }
 0x555   : > { %1721 = vperm.xlu1 %5642, %v10496_v47   ;;  %v10511_v47 = vcvt.f32.s32 %v10510_v48  ;;  %v3667_v48 = vpop.f32.mrf.mxu0 }
 0x556   : > { %1667 = vperm.xlu0 %5641, %v10498_v54   ;;  %v10513_v54 = vcvt.f32.s32 %v10512_v62  ;;  %v10534_v62 = vld [vmem:[#allocation30_spill] sm:$0xff] }
 0x557   : > { %v2873_v26 = vpop.f32.mrf.mxu1 }
 0x558   : > { %v3000_v32 = vmul.f32 %v2873_v26, %v10491_v36  ;;  %v10504_v26 = vld [vmem:[#allocation254_spill] sm:$0xff] }
 0x559   : > { %v3007_v21 = vmul.f32 %v8737_v29, %v10504_v26 }
 0x55a   : > { %v8991_v35 = vmul.f32 %v3000_v32, %v1427_v15  ;;  %3538 = vmatmul.bf16.gmra.mxu2 %v10494_v40  ;;  %3627 = vmatmul.bf16.gmra.mxu3 %v3194_v53  ;;  %v10505_v15 = vld [vmem:[#allocation163_spill] sm:$0xff]  ;;  %v10507_v53 = vld [vmem:[#allocation164_spill] sm:$0xff] }
 0x55b   : > { %3716 = vmatmul.bf16.gmra.mxu0 %v3195_v7  ;;  %1664 = vperm.xlu2 %5643, %v10500_v16   ;;  %v1207_v36 = vadd.f32 %v10505_v15, %v7991_v58  ;;  %v1320_v49 = vadd.f32 %v10507_v53, %v7977_v14  ;;  %v10508_v40 = vld [vmem:[#allocation44_spill] sm:$0xff]  ;;  %v1433_v16 = vadd.f32 %v10514_v37, %v8313_v10 }
 0x55c   : > { %v3196_v24 = vpack.c.bf16 %v8991_v35, %v8973_v39  ;;  %v10509_v38 = vcvt.f32.s32 %v10508_v40  ;;  %v3578_v40 = vpop.f32.mrf.mxu3  ;;  %v10548_v35 = vmov 1.0|1.0  }
 0x55d   : > { %v3134_v7 = vmul.f32 %v3006_v18, %v1207_v36  ;;  %v3135_v29 = vmul.f32 %v3007_v21, %v1320_v49  ;;  %v10518_v18 = vcvt.f32.s32 %v10517_v46  ;;  %v10529_v49 = vld [vmem:[#allocation29_spill] sm:$0xff]  ;;  %v10541_v46 = vld [vmem:[#allocation52_spill] sm:$0xff] }
 0x55e   : > { %1712 = vperm.xlu1 %5642, %v10509_v38   ;;  %1658 = vperm.xlu0 %5641, %v10511_v47  }
 0x55f   : > { %v2876_v8 = vpop.f32.mrf.mxu1  ;;  %v3199_v14 = vpack.c.bf16 %v3135_v29, %v8719_v6  ;;  %v3489_v6 = vpop.f32.mrf.mxu2 }
 0x560   : > { %v3004_v44 = vmul.f32 %v2876_v8, %v10503_v30  ;;  %v3198_v8 = vpack.c.bf16 %v3134_v7, %v8735_v57  ;;  %v10519_v30 = vld [vmem:[#allocation45_spill] sm:$0xff]  ;;  %v10521_v57 = vld [vmem:[#allocation55_spill] sm:$0xff]  ;;  %v10530_v7 = vcvt.f32.s32 %v10529_v49 }
 0x561   : > { %v10522_v26 = vcvt.f32.s32 %v10521_v57 }
 0x562   : > { %v9013_v32 = vmul.f32 %v3004_v44, %v1430_v33  ;;  %3770 = vmatmul.bf16.gmra.mxu1 %v10506_v55  ;;  %v10516_v33 = vpack.c.bf16 %v8759_v9, %v8733_v2  ;;  %v10520_v44 = vcvt.f32.s32 %v10519_v30  ;;  %v10524_v2 = vpack.c.bf16 %v8764_v23, %v8744_v22  ;;  %v10525_v9 = vld [vmem:[#allocation27_spill] sm:$0xff]  ;;  %v10527_v55 = vld [vmem:[#allocation42_spill] sm:$0xff]  ;;  %v10532_v23 = vld [vmem:[#allocation41_spill] sm:$0xff] }
 0x563   : > { %1715 = vperm.xlu2 %5643, %v10513_v54   ;;  %v10526_v36 = vcvt.f32.s32 %v10525_v9  ;;  %v10528_v53 = vcvt.f32.s32 %v10527_v55  ;;  %v10533_v29 = vcvt.f32.s32 %v10532_v23  ;;  %v10535_v54 = vcvt.f32.s32 %v10534_v62 }
 0x566   : > { %1661 = vperm.xlu1 %5642, %v10518_v18   ;;  %1709 = vperm.xlu0 %5641, %v10520_v44   ;;  %v10542_v18 = vcvt.f32.s32 %v10541_v46 }
 0x567   : > { %v2878_v58 = vpop.f32.mrf.mxu1 }
 0x568   : > { %v3008_v28 = vmul.f32 %v2878_v58, %v10515_v59  ;;  %v10536_v58 = vld [vmem:[#allocation28_spill] sm:$0xff] }
 0x569   : > { %v10537_v37 = vcvt.f32.s32 %v10536_v58 }
 0x56a   : > { %v9031_v5 = vmul.f32 %v3008_v28, %v1433_v16  ;;  %3543 = vmatmul.bf16.gmra.mxu2 %v10516_v33  ;;  %3632 = vmatmul.bf16.gmra.mxu3 %v3198_v8  ;;  %v9074_v28 = vpop.f32.mrf.mxu0 }
 0x56b   : > { %3721 = vmatmul.bf16.gmra.mxu0 %v3199_v14  ;;  %1706 = vperm.xlu2 %5643, %v10522_v26   ;;  %v10539_v14 = vld [vmem:[#allocation38_spill] sm:$0xff] }
 0x56c   : > { %v10540_v33 = vcvt.f32.s32 %v10539_v14 }
 0x56e   : > { %1652 = vperm.xlu1 %5642, %v10526_v36   ;;  %1700 = vperm.xlu0 %5641, %v10528_v53  }
 0x56f   : > { %v3736_v21 = vpop.f32.mrf.mxu1 }
 0x570   : > { %v9045_v15 = vadd.f32 %v3736_v21, %v8791_v25  ;;  %v9059_v25 = vpop.f32.mrf.mxu2 }
 0x572   : > { %10523 = vst [vmem:[#allocation62_spill] sm:$0xff] %v9045_v15  ;;  %3775 = vmatmul.bf16.gmra.mxu1 %v10524_v2  ;;  %v9092_v26 = vpop.f32.mrf.mxu0 }
 0x573   : > { %1655 = vperm.xlu2 %5643, %v10530_v7  }
 0x576   : > { %1703 = vperm.xlu1 %5642, %v10533_v29   ;;  %1649 = vperm.xlu0 %5641, %v10535_v54  }
 0x577   : > { %v3738_v38 = vpop.f32.mrf.mxu1 }
 0x578   : > { %v9057_v47 = vadd.f32 %v3738_v38, %v8806_v45  ;;  %v9072_v45 = vpop.f32.mrf.mxu3  ;;  %v9079_v8 = vpop.f32.mrf.mxu2 }
 0x57a   : > { %10531 = vst [vmem:[#allocation167_spill] sm:$0xff] %v9057_v47 }
 0x57b   : > { %1646 = vperm.xlu2 %5643, %v10537_v37  }
 0x57e   : > { %1694 = vperm.xlu1 %5642, %v10540_v33  }
 0x57f   : > { %v3741_v16 = vpop.f32.mrf.mxu1 }
 0x580   : > { %v9070_v59 = vadd.f32 %v3741_v16, %v8825_v20  ;;  %v9090_v57 = vpop.f32.mrf.mxu3  ;;  %v9094_v41 = vpop.f32.mrf.mxu2 }
 0x582   : > { %10538 = vst [vmem:[#allocation61_spill] sm:$0xff] %v9070_v59  ;;  %3780 = vmatmul.bf16.gmra.mxu1 %v3176_v12 }
 0x583   : > { %1697 = vperm.xlu2 %5643, %v10542_v18  }
 0x587   : > { %v3743_v30 = vpop.f32.mrf.mxu1 }
 0x588   : > { %v9086_v20 = vadd.f32 %v3743_v30, %v8840_v52  ;;  %v9102_v21 = vpop.f32.mrf.mxu3  ;;  %v9104_v52 = vpop.f32.mrf.mxu0 }
 0x589   : > { %v9106_v2 = vpop.f32.mrf.mxu2 }
 0x58a   : > { %10543 = vst [vmem:[#allocation76_spill] sm:$0xff] %v9086_v20  ;;  %v1737_v7 = vpop.permute.xlu2 %1736 }
 0x58b   : > { %vm1771_vm13 = vcmp.eq.s32.totalorder %v10383_v17, %v1737_v7 }
 0x58f   : > { %v3746_v42 = vpop.f32.mrf.mxu1 }
 0x590   : > { %v9097_v12 = vadd.f32 %v3746_v42, %v8859_v1  ;;  %v9113_v53 = vpop.f32.mrf.mxu3  ;;  %v9118_v31 = vpop.f32.mrf.mxu0 }
 0x591   : > { %v9120_v3 = vpop.f32.mrf.mxu2 }
 0x592   : > { %10544 = vst [vmem:[#allocation197_spill] sm:$0xff] %v9097_v12  ;;  %3785 = vmatmul.bf16.gmra.mxu1 %v3180_v56  ;;  %v3490_v56 = vadd.f32 %v8772_v0, %v3489_v6  ;;  %v1683_v34 = vpop.permute.xlu2 %1682 }
 0x593   : > { %vm1753_vm3 = vcmp.eq.s32.totalorder %v10383_v17, %v1683_v34  ;;  %v3500_v34 = vadd.f32 %v8772_v0, %v9106_v2  ;;  %v3497_v2 = vadd.f32 %v8772_v0, %v9094_v41 }
 0x597   : > { %v3748_v9 = vpop.f32.mrf.mxu1 }
 0x598   : > { %v9109_v36 = vadd.f32 %v3748_v9, %v8874_v27  ;;  %v9129_v29 = vpop.f32.mrf.mxu3  ;;  %v9133_v54 = vpop.f32.mrf.mxu0 }
 0x599   : > { %v3504_v58 = vpop.f32.mrf.mxu2 }
 0x59a   : > { %10545 = vst [vmem:[#allocation199_spill] sm:$0xff] %v9109_v36 }
 0x59c   : > { %v1734_v46 = vpop.permute.xlu2 %1733 }
 0x59d   : > { %vm1770_vm0 = vcmp.eq.s32.totalorder %v10383_v17, %v1734_v46  ;;  %v10549_v46 = vpack.c.bf16 %v9031_v5, %v9013_v32  ;;  %v3492_v32 = vadd.f32 %v8772_v0, %v9059_v25  ;;  %v3495_v5 = vadd.f32 %v8772_v0, %v9079_v8 }
 0x59e   : > { %v3586_v8 = vadd.f32 %v9102_v21, %v3497_v2 }
 0x59f   : > { %v3751_v1 = vpop.f32.mrf.mxu1  ;;  %v1692_v27 = vpop.permute.xlu1 %1691 }
 0x5a0   : > { %v9116_v49 = vadd.f32 %v3751_v1, %v8893_v63  ;;  %v3579_v63 = vadd.f32 %v3578_v40, %v3490_v56  ;;  %v1689_v6 = vpop.permute.xlu0 %1688  ;;  %v9140_v14 = vpop.f32.mrf.mxu0  ;;  %vm1756_vm12 = vcmp.eq.s32.totalorder %v10383_v17, %v1692_v27 }
 0x5a1   : > { %v3506_v40 = vpop.f32.mrf.mxu2  ;;  %vm1755_vm15 = vcmp.eq.s32.totalorder %v10383_v17, %v1689_v6 }
 0x5a2   : > { %10546 = vst [vmem:[#allocation77_spill] sm:$0xff] %v9116_v49  ;;  %3790 = vmatmul.bf16.gmra.mxu1 %v3184_v61  ;;  %v3668_v37 = vadd.f32 %v3667_v48, %v3579_v63  ;;  %vm5310_vm11 = vmpackc.low %vm1756_vm12, %vm1755_vm15  ;;  %v3507_v36 = vadd.f32 %v8772_v0, %v3506_v40 }
 0x5a3   : > { %5311 = vmatpush.lsf.msk.bf16.msk.msrb.mxu2 %vm5310_vm11, %v10548_v35 }
 0x5a5   : > { %v9144_v9 = vpop.permute.xlu2 %1724 }
 0x5a6   : > { %vm1767_vm9 = vcmp.eq.s32.totalorder %v10383_v17, %v9144_v9  ;;  %v3584_v9 = vadd.f32 %v9090_v57, %v3495_v5  ;;  %v3675_v57 = vadd.f32 %v9104_v52, %v3586_v8 }
 0x5a7   : > { %v3753_v38 = vpop.f32.mrf.mxu1  ;;  %v1740_v60 = vpop.permute.xlu1 %1739 }
 0x5a8   : > { %v9127_v23 = vadd.f32 %v3753_v38, %v8914_v51  ;;  %v3593_v51 = vpop.f32.mrf.mxu3  ;;  %v1686_v30 = vpop.permute.xlu0 %1685  ;;  %vm1772_vm14 = vcmp.eq.s32.totalorder %v10383_v17, %v1740_v60 }
 0x5a9   : > { %v9148_v38 = vpop.f32.mrf.mxu0  ;;  %v3509_v19 = vpop.f32.mrf.mxu2  ;;  %vm5326_vm2 = vmpackc.low %vm1772_vm14, %vm1771_vm13  ;;  %vm1754_vm5 = vcmp.eq.s32.totalorder %v10383_v17, %v1686_v30 }
 0x5aa   : > { %10547 = vst [vmem:[#allocation79_spill] sm:$0xff] %v9127_v23  ;;  %5327 = vmatpush.lsf.msk.bf16.msk.msrb.mxu3 %vm5326_vm2, %v10548_v35  ;;  %vm5312_vm7 = vmpackc.low %vm1754_vm5, %vm1753_vm3 }
 0x5ab   : > { %5313 = vmatpush.lsf.msk.bf16.msk.msrb.mxu2 %vm5312_vm7, %v10548_v35 }
 0x5af   : > { %v3756_v61 = vpop.f32.mrf.mxu1  ;;  %v1731_v33 = vpop.permute.xlu1 %1730 }
 0x5b0   : > { %v9135_v16 = vadd.f32 %v3756_v61, %v3668_v37  ;;  %v3595_v48 = vpop.f32.mrf.mxu3  ;;  %v1677_v56 = vpop.permute.xlu0 %1676  ;;  %vm1769_vm4 = vcmp.eq.s32.totalorder %v10383_v17, %v1731_v33 }
 0x5b1   : > { %v9161_v22 = vpop.f32.mrf.mxu0  ;;  %v9163_v44 = vpop.f32.mrf.mxu2  ;;  %vm5328_vm6 = vmpackc.low %vm1770_vm0, %vm1769_vm4  ;;  %v3596_v33 = vadd.f32 %v3595_v48, %v3507_v36  ;;  %vm1751_vm10 = vcmp.eq.s32.totalorder %v10383_v17, %v1677_v56 }
 0x5b2   : > { %3795 = vmatmul.bf16.gmra.mxu1 %v3188_v50  ;;  %v9155_v50 = vpop.permute.xlu2 %1673  ;;  %5329 = vmatpush.lsf.msk.bf16.msk.msrb.mxu3 %vm5328_vm6, %v10548_v35 }
 0x5b3   : > { %v3685_v48 = vadd.f32 %v9148_v38, %v3596_v33  ;;  %vm1750_vm15 = vcmp.eq.s32.totalorder %v10383_v17, %v9155_v50  ;;  %v10551_v33 = vld [vmem:[#allocation77_spill] sm:$0xff] }
 0x5b7   : > { %v9142_v18 = vpop.f32.mrf.mxu1  ;;  %v1680_v42 = vpop.permute.xlu1 %1679 }
 0x5b8   : > { %v1728_v37 = vpop.permute.xlu0 %1727  ;;  %v9159_v61 = vpop.f32.mrf.mxu3  ;;  %vm1752_vm8 = vcmp.eq.s32.totalorder %v10383_v17, %v1680_v42 }
 0x5b9   : > { %v9180_v15 = vpop.f32.mrf.mxu2  ;;  %vm1768_vm1 = vcmp.eq.s32.totalorder %v10383_v17, %v1728_v37  ;;  %vm5314_vm12 = vmpackc.low %vm1752_vm8, %vm1751_vm10 }
 0x5ba   : > { %v9167_v62 = vpop.permute.xlu2 %1664  ;;  %vm5330_vm13 = vmpackc.low %vm1768_vm1, %vm1767_vm9  ;;  %5315 = vmatpush.lsf.msk.bf16.msk.msrb.mxu2 %vm5314_vm12, %v10548_v35 }
 0x5bb   : > { %5331 = vmatpush.lsf.msk.bf16.msk.msrb.mxu3 %vm5330_vm13, %v10548_v35  ;;  %vm1747_vm0 = vcmp.eq.s32.totalorder %v10383_v17, %v9167_v62  ;;  %v3673_v62 = vadd.f32 %v9092_v26, %v3584_v9  ;;  %v10560_v9 = vld [vmem:[#allocation62_spill] sm:$0xff] }
 0x5bf   : > { %v9146_v1 = vpop.f32.mrf.mxu1  ;;  %v9153_v13 = vpop.permute.xlu1 %1670 }
 0x5c0   : > { %v9171_v43 = vpop.permute.xlu0 %1718  ;;  %v9176_v11 = vpop.f32.mrf.mxu3  ;;  %vm1749_vm14 = vcmp.eq.s32.totalorder %v10383_v17, %v9153_v13 }
 0x5c1   : > { %v9214_v40 = vpop.f32.mrf.mxu2  ;;  %vm1765_vm2 = vcmp.eq.s32.totalorder %v10383_v17, %v9171_v43  ;;  %vm5316_vm3 = vmpackc.low %vm1750_vm15, %vm1749_vm14 }
 0x5c2   : > { %3800 = vmatmul.bf16.gmra.mxu1 %v3192_v4  ;;  %v9178_v4 = vpop.f32.mrf.mxu0  ;;  %v9184_v59 = vpop.permute.xlu2 %1715  ;;  %5317 = vmatpush.lsf.msk.bf16.msk.msrb.mxu2 %vm5316_vm3, %v10548_v35 }
 0x5c3   : > { %vm1764_vm6 = vcmp.eq.s32.totalorder %v10383_v17, %v9184_v59 }
 0x5c7   : > { %v9157_v63 = vpop.f32.mrf.mxu1  ;;  %v9165_v55 = vpop.permute.xlu1 %1721 }
 0x5c8   : > { %v9188_v12 = vpop.permute.xlu0 %1667  ;;  %v9194_v39 = vpop.f32.mrf.mxu3  ;;  %vm1766_vm11 = vcmp.eq.s32.totalorder %v10383_v17, %v9165_v55  ;;  %v3764_v59 = vadd.f32 %v9157_v63, %v3675_v57 }
 0x5c9   : > { %vm5332_vm4 = vmpackc.low %vm1766_vm11, %vm1765_vm2  ;;  %vm1748_vm7 = vcmp.eq.s32.totalorder %v10383_v17, %v9188_v12 }
 0x5ca   : > { %v9202_v27 = vpop.permute.xlu2 %1706  ;;  %v9212_v6 = vpop.f32.mrf.mxu0  ;;  %5333 = vmatpush.lsf.msk.bf16.msk.msrb.mxu3 %vm5332_vm4, %v10548_v35  ;;  %vm5318_vm9 = vmpackc.low %vm1748_vm7, %vm1747_vm0 }
 0x5cb   : > { %vm1761_vm1 = vcmp.eq.s32.totalorder %v10383_v17, %v9202_v27 }
 0x5cf   : > { %v9169_v10 = vpop.f32.mrf.mxu1 }
 0x5d0   : > { %v9182_v47 = vpop.permute.xlu1 %1712  ;;  %v9208_v60 = vpop.permute.xlu0 %1658 }
 0x5d1   : > { %v9256_v56 = vpop.f32.mrf.mxu3  ;;  %vm1763_vm5 = vcmp.eq.s32.totalorder %v10383_v17, %v9182_v47  ;;  %v3512_v47 = vadd.f32 %v8772_v0, %v9163_v44  ;;  %vm1745_vm12 = vcmp.eq.s32.totalorder %v10383_v17, %v9208_v60  ;;  %v3762_v44 = vadd.f32 %v9146_v1, %v3673_v62 }
 0x5d2   : > { %3805 = vmatmul.bf16.gmra.mxu1 %v3196_v24  ;;  %v3505_v24 = vadd.f32 %v8772_v0, %v3504_v58  ;;  %v3502_v58 = vadd.f32 %v8772_v0, %v9120_v3  ;;  %v3589_v3 = vadd.f32 %v9113_v53, %v3500_v34  ;;  %v9262_v21 = vpop.f32.mrf.mxu0  ;;  %vm5334_vm8 = vmpackc.low %vm1764_vm6, %vm1763_vm5  ;;  %v3515_v1 = vadd.f32 %v8772_v0, %v9180_v15 }
 0x5d3   : > { %5335 = vmatpush.lsf.msk.bf16.msk.msrb.mxu3 %vm5334_vm8, %v10548_v35 }
 0x5d4   : > { %v3594_v23 = vadd.f32 %v3593_v51, %v3505_v24  ;;  %v3591_v36 = vadd.f32 %v9129_v29, %v3502_v58  ;;  %v3510_v51 = vadd.f32 %v8772_v0, %v3509_v19  ;;  %v9242_v29 = vpop.permute.xlu2 %1655  ;;  %v3678_v38 = vadd.f32 %v9118_v31, %v3589_v3 }
 0x5d5   : > { %vm1744_vm2 = vcmp.eq.s32.totalorder %v10383_v17, %v9242_v29  ;;  %v3604_v15 = vadd.f32 %v9194_v39, %v3515_v1  ;;  %v10556_v29 = vld [vmem:[#allocation76_spill] sm:$0xff] }
 0x5d6   : > { %v3683_v30 = vadd.f32 %v9140_v14, %v3594_v23  ;;  %v3680_v53 = vadd.f32 %v9133_v54, %v3591_v36  ;;  %v3599_v55 = vadd.f32 %v9159_v61, %v3510_v51  ;;  %v9264_v54 = vpop.f32.mrf.mxu2  ;;  %v3767_v31 = vadd.f32 %v9169_v10, %v3678_v38  ;;  %v10553_v51 = vld [vmem:[#allocation199_spill] sm:$0xff] }
 0x5d7   : > { %v9186_v20 = vpop.f32.mrf.mxu1  ;;  %v3821_v61 = vpack.c.bf16 %v3764_v59, %v3762_v44  ;;  %v3517_v36 = vadd.f32 %v8772_v0, %v9214_v40  ;;  %v3520_v40 = vadd.f32 %v8772_v0, %v9264_v54 }
 0x5d8   : > { %v9200_v49 = vpop.permute.xlu1 %1661  ;;  %v1710_v25 = vpop.permute.xlu0 %1709  ;;  %v3769_v19 = vadd.f32 %v9186_v20, %v3680_v53  ;;  %v3581_v20 = vadd.f32 %v9072_v45, %v3492_v32  ;;  %v3688_v12 = vadd.f32 %v9161_v22, %v3599_v55  ;;  %v3693_v32 = vadd.f32 %v9212_v6, %v3604_v15 }
 0x5d9   : > { %vm1746_vm10 = vcmp.eq.s32.totalorder %v10383_v17, %v9200_v49  ;;  %vm1762_vm13 = vcmp.eq.s32.totalorder %v10383_v17, %v1710_v25  ;;  %v3601_v49 = vadd.f32 %v9176_v11, %v3512_v47  ;;  %v3608_v43 = vpop.f32.mrf.mxu3 }
 0x5da   : > { %v3822_v50 = vpack.c.bf16 %v3769_v19, %v3767_v31  ;;  %v3670_v22 = vadd.f32 %v9074_v28, %v3581_v20  ;;  %vm5320_vm14 = vmpackc.low %vm1746_vm10, %vm1745_vm12  ;;  %v3697_v28 = vpop.f32.mrf.mxu0  ;;  %v3609_v38 = vadd.f32 %v3608_v43, %v3520_v40  ;;  %vm3994_vm12 = vcmp.lt.s32.totalorder %v10383_v17, 16 }
 0x5db   : > { %vm5336_vm15 = vmpackc.low %vm1762_vm13, %vm1761_vm1  ;;  %v3690_v24 = vadd.f32 %v9178_v4, %v3601_v49  ;;  %v10550_v4 = vld [vmem:[#allocation79_spill] sm:$0xff] }
 0x5dc   : > { %v1647_v37 = vpop.permute.xlu2 %1646  ;;  %v3759_v63 = vadd.f32 %v9142_v18, %v3670_v22  ;;  %5337 = vmatpush.lsf.msk.bf16.msk.msrb.mxu3 %vm5336_vm15, %v10548_v35  ;;  %v3698_v57 = vadd.f32 %v3697_v28, %v3609_v38 }
 0x5dd   : > { %vm1741_vm6 = vcmp.eq.s32.totalorder %v10383_v17, %v1647_v37 }
 0x5de   : > { %v3521_v18 = vpop.f32.mrf.mxu2  ;;  %v3820_v11 = vpack.c.bf16 %v3759_v63, %v9135_v16 }
 0x5df   : > { %v3771_v7 = vpop.f32.mrf.mxu1  ;;  %v3522_v20 = vadd.f32 %v8772_v0, %v3521_v18 }
 0x5e0   : > { %v9240_v41 = vpop.permute.xlu1 %1652  ;;  %v3772_v23 = vadd.f32 %v3771_v7, %v3683_v30  ;;  %v1701_v10 = vpop.permute.xlu0 %1700  ;;  %v10554_v30 = vld [vmem:[#allocation197_spill] sm:$0xff] }
 0x5e1   : > { %vm1743_vm11 = vcmp.eq.s32.totalorder %v10383_v17, %v9240_v41  ;;  %vm1759_vm4 = vcmp.eq.s32.totalorder %v10383_v17, %v1701_v10  ;;  %v3610_v2 = vpop.f32.mrf.mxu3  ;;  %v3606_v41 = vadd.f32 %v9256_v56, %v3517_v36 }
 0x5e2   : > { %3810 = vmatmul.bf16.gmra.mxu1 %v10549_v46  ;;  %vm5322_vm0 = vmpackc.low %vm1744_vm2, %vm1743_vm11  ;;  %v10552_v46 = vpack.c.bf16 %v10550_v4, %v10551_v33  ;;  %v3699_v5 = vpop.f32.mrf.mxu0  ;;  %v3611_v62 = vadd.f32 %v3610_v2, %v3522_v20 }
 0x5e3   : > { %v3695_v6 = vadd.f32 %v9262_v21, %v3606_v41 }
 0x5e4   : > { %v1698_v7 = vpop.permute.xlu2 %1697 }
 0x5e5   : > { %vm1758_vm8 = vcmp.eq.s32.totalorder %v10383_v17, %v1698_v7 }
 0x5e7   : > { %v3773_v42 = vpop.f32.mrf.mxu1 }
 0x5e8   : > { %v3774_v14 = vadd.f32 %v3773_v42, %v3685_v48  ;;  %v1704_v45 = vpop.permute.xlu1 %1703  ;;  %v1650_v58 = vpop.permute.xlu0 %1649  ;;  %v10555_v48 = vpack.c.bf16 %v10553_v51, %v10554_v30  ;;  %v10557_v42 = vld [vmem:[#allocation61_spill] sm:$0xff] }
 0x5e9   : > { %vm1760_vm3 = vcmp.eq.s32.totalorder %v10383_v17, %v1704_v45  ;;  %vm1742_vm10 = vcmp.eq.s32.totalorder %v10383_v17, %v1650_v58  ;;  %v10558_v25 = vpack.c.bf16 %v10556_v29, %v10557_v42  ;;  %v3613_v8 = vpop.f32.mrf.mxu3 }
 0x5ea   : > { %v3823_v13 = vpack.c.bf16 %v3774_v14, %v3772_v23  ;;  %vm5338_vm5 = vmpackc.low %vm1760_vm3, %vm1759_vm4  ;;  %v10559_v14 = vld [vmem:[#allocation167_spill] sm:$0xff]  ;;  %v3702_v19 = vpop.f32.mrf.mxu0 }
 0x5eb   : > { %5339 = vmatpush.lsf.msk.bf16.msk.msrb.mxu3 %vm5338_vm5, %v10548_v35  ;;  %vm5324_vm1 = vmpackc.low %vm1742_vm10, %vm1741_vm6  ;;  %v10561_v55 = vpack.c.bf16 %v10559_v14, %v10560_v9 }
 0x5ec   : > { %3864 = vmatpush.bf16.msra.mxu2 %v3823_v13 }
 0x5ef   : > { %v3776_v52 = vpop.f32.mrf.mxu1 }
 0x5f0   : > { %5319 = vmatpush.lsf.msk.bf16.msk.msrb.mxu2 %vm5318_vm9, %v10548_v35  ;;  %v9294_v26 = vadd.f32 %v3776_v52, %v3688_v12  ;;  %v1695_v27 = vpop.permute.xlu1 %1694  ;;  %v3700_v12 = vadd.f32 %v3699_v5, %v3611_v62 }
 0x5f1   : > { %vm1757_vm7 = vcmp.eq.s32.totalorder %v10383_v17, %v1695_v27  ;;  %v3615_v21 = vpop.f32.mrf.mxu3 }
 0x5f2   : > { %vm5340_vm9 = vmpackc.low %vm1758_vm8, %vm1757_vm7  ;;  %v3704_v47 = vpop.f32.mrf.mxu0 }
 0x5f3   : > { %5341 = vmatpush.lsf.msk.bf16.msk.msrb.mxu3 %vm5340_vm9, %v10548_v35 }
 0x5f4   : > { %3865 = vmatpush.bf16.msra.mxu2 %v3822_v50 }
 0x5f5   : > { %5293 = vllmr.16.mxu3 }
 0x5f7   : > { %v3778_v60 = vpop.f32.mrf.mxu1 }
 0x5f8   : > { %5321 = vmatpush.lsf.msk.bf16.msk.msrb.mxu2 %vm5320_vm14, %v10548_v35  ;;  %v9315_v34 = vadd.f32 %v3778_v60, %v3690_v24 }
 0x5f9   : > { %v3618_v22 = vpop.f32.mrf.mxu3 }
 0x5fa   : > { %v3824_v16 = vpack.c.bf16 %v9315_v34, %v9294_v26  ;;  %v3707_v49 = vpop.f32.mrf.mxu0 }
 0x5fc   : > { %3866 = vmatpush.bf16.msra.mxu2 %v3821_v61 }
 0x5ff   : > { %v3781_v39 = vpop.f32.mrf.mxu1 }
 0x600   : > { %5323 = vmatpush.lsf.msk.bf16.msk.msrb.mxu2 %vm5322_vm0, %v10548_v35  ;;  %v9329_v3 = vadd.f32 %v3781_v39, %v3693_v32 }
 0x601   : > { %v9359_v1 = vpop.f32.mrf.mxu3 }
 0x602   : > { %v9362_v7 = vpop.f32.mrf.mxu0 }
 0x604   : > { %3867 = vmatpush.bf16.msra.mxu2 %v3820_v11 }
 0x607   : > { %v3783_v53 = vpop.f32.mrf.mxu1 }
 0x608   : > { %5325 = vmatpush.lsf.msk.bf16.msk.msrb.mxu2 %vm5324_vm1, %v10548_v35  ;;  %v3524_v35 = vpop.f32.mrf.mxu2  ;;  %v9341_v23 = vadd.f32 %v3783_v53, %v3695_v6 }
 0x609   : > { %v3525_v50 = vadd.f32 %v8772_v0, %v3524_v35 }
 0x60a   : > { %5265 = vllmr.16.mxu2  ;;  %v3825_v56 = vpack.c.bf16 %v9341_v23, %v9329_v3  ;;  %v3712_v32 = vpop.f32.mrf.mxu0 }
 0x60b   : > { %v3614_v52 = vadd.f32 %v3613_v8, %v3525_v50 }
 0x60c   : > { %3868 = vmatpush.bf16.msra.mxu2 %v10552_v46  ;;  %v3623_v46 = vpop.f32.mrf.mxu3 }
 0x60d   : > { %v3703_v63 = vadd.f32 %v3702_v19, %v3614_v52 }
 0x60f   : > { %v3786_v54 = vpop.f32.mrf.mxu1 }
 0x610   : > { %3869 = vmatpush.bf16.msra.mxu2 %v10555_v48  ;;  %v3526_v13 = vpop.f32.mrf.mxu2  ;;  %v9349_v31 = vadd.f32 %v3786_v54, %v3698_v57 }
 0x611   : > { %v3527_v44 = vadd.f32 %v8772_v0, %v3526_v13 }
 0x612   : > { %v3714_v30 = vpop.f32.mrf.mxu0 }
 0x613   : > { %v3616_v18 = vadd.f32 %v3615_v21, %v3527_v44 }
 0x614   : > { %3870 = vmatpush.bf16.msra.mxu2 %v10558_v25  ;;  %v3625_v51 = vpop.f32.mrf.mxu3 }
 0x615   : > { %v3705_v24 = vadd.f32 %v3704_v47, %v3616_v18 }
 0x617   : > { %v3788_v45 = vpop.f32.mrf.mxu1 }
 0x618   : > { %3871 = vmatpush.bf16.msra.mxu2 %v10561_v55  ;;  %v3529_v59 = vpop.f32.mrf.mxu2  ;;  %v9352_v37 = vadd.f32 %v3788_v45, %v3700_v12 }
 0x619   : > { %v3530_v11 = vadd.f32 %v8772_v0, %v3529_v59 }
 0x61a   : > { %v3826_v10 = vpack.c.bf16 %v9352_v37, %v9349_v31  ;;  %v3717_v29 = vpop.f32.mrf.mxu0 }
 0x61b   : > { %v3619_v15 = vadd.f32 %v3618_v22, %v3530_v11 }
 0x61c   : > { %v3628_v41 = vpop.f32.mrf.mxu3 }
 0x61d   : > { %v3708_v33 = vadd.f32 %v3707_v49, %v3619_v15 }
 0x61f   : > { %v3791_v43 = vpop.f32.mrf.mxu1 }
 0x620   : > { %v3531_v61 = vpop.f32.mrf.mxu2  ;;  %v9357_v28 = vadd.f32 %v3791_v43, %v3703_v63 }
 0x621   : > { %v3532_v49 = vadd.f32 %v8772_v0, %v3531_v61 }
 0x622   : > { %v3719_v8 = vpop.f32.mrf.mxu0 }
 0x624   : > { %v3630_v40 = vpop.f32.mrf.mxu3 }
 0x627   : > { %v3793_v27 = vpop.f32.mrf.mxu1 }
 0x628   : > { %v9364_v60 = vadd.f32 %v3793_v27, %v3705_v24  ;;  %v3534_v58 = vpop.f32.mrf.mxu2 }
 0x629   : > { %v3535_v45 = vadd.f32 %v8772_v0, %v3534_v58 }
 0x62a   : > { %v3827_v4 = vpack.c.bf16 %v9364_v60, %v9357_v28  ;;  %v3722_v55 = vpop.f32.mrf.mxu0 }
 0x62b   : > { %5266 = vmatmul.lmr.bf16.vlgmr.msra.gmra.16.mxu2  ;;  %v3624_v27 = vadd.f32 %v3623_v46, %v3535_v45 }
 0x62c   : > { %v3633_v14 = vpop.f32.mrf.mxu3 }
 0x62d   : > { %v3713_v58 = vadd.f32 %v3712_v32, %v3624_v27 }
 0x62f   : > { %v3796_v2 = vpop.f32.mrf.mxu1 }
 0x630   : > { %v9368_v36 = vadd.f32 %v3796_v2, %v3708_v33  ;;  %v3536_v39 = vpop.f32.mrf.mxu2 }
 0x631   : > { %v3537_v59 = vadd.f32 %v8772_v0, %v3536_v39  ;;  %v3621_v39 = vadd.f32 %v9359_v1, %v3532_v49 }
 0x632   : > { %v3724_v12 = vpop.f32.mrf.mxu0 }
 0x633   : > { %5267 = vmatmul.lmr.bf16.gmra.16.mxu2  ;;  %v3626_v43 = vadd.f32 %v3625_v51, %v3537_v59 }
 0x634   : > { %v3635_v54 = vpop.f32.mrf.mxu3 }
 0x637   : > { %v3798_v5 = vpop.f32.mrf.mxu1 }
 0x638   : > { %v3539_v48 = vpop.f32.mrf.mxu2 }
 0x639   : > { %v3540_v21 = vadd.f32 %v8772_v0, %v3539_v48  ;;  %v3715_v48 = vadd.f32 %v3714_v30, %v3626_v43 }
 0x63b   : > { %5268 = vmatmul.lmr.bf16.gmra.16.mxu2  ;;  %v3629_v52 = vadd.f32 %v3628_v41, %v3540_v21 }
 0x63d   : > { %v3718_v15 = vadd.f32 %v3717_v29, %v3629_v52 }
 0x63f   : > { %v3801_v35 = vpop.f32.mrf.mxu1 }
 0x640   : > { %v3541_v42 = vpop.f32.mrf.mxu2  ;;  %v3802_v61 = vadd.f32 %v3801_v35, %v3713_v58 }
 0x641   : > { %v3542_v57 = vadd.f32 %v8772_v0, %v3541_v42 }
 0x643   : > { %5269 = vmatmul.lmr.bf16.gmra.16.mxu2  ;;  %v3631_v50 = vadd.f32 %v3630_v40, %v3542_v57 }
 0x645   : > { %v3720_v18 = vadd.f32 %v3719_v8, %v3631_v50 }
 0x647   : > { %v3803_v25 = vpop.f32.mrf.mxu1 }
 0x648   : > { %v3544_v53 = vpop.f32.mrf.mxu2  ;;  %v3804_v41 = vadd.f32 %v3803_v25, %v3715_v48  ;;  %v6136_v25 = vmov 16  }
 0x649   : > { %v3545_v19 = vadd.f32 %v8772_v0, %v3544_v53  ;;  %5644 = vset.pattern.permute.xlu2 %v6136_v25  ;;  %5645 = vset.pattern.permute.xlu1 %v6136_v25 }
 0x64a   : > { %v3829_v8 = vpack.c.bf16 %v3804_v41, %v3802_v61  ;;  %5646 = vset.pattern.permute.xlu0 %v6136_v25 }
 0x64b   : > { %5270 = vmatmul.lmr.bf16.gmra.16.mxu2  ;;  %v3634_v62 = vadd.f32 %v3633_v14, %v3545_v19 }
 0x64d   : > { %v3723_v22 = vadd.f32 %v3722_v55, %v3634_v62 }
 0x64f   : > { %v3806_v6 = vpop.f32.mrf.mxu1 }
 0x650   : > { %v3546_v38 = vpop.f32.mrf.mxu2  ;;  %v3807_v42 = vadd.f32 %v3806_v6, %v3718_v15 }
 0x651   : > { %v3547_v13 = vadd.f32 %v8772_v0, %v3546_v38  ;;  %v3710_v0 = vadd.f32 %v9362_v7, %v3621_v39 }
 0x653   : > { %5271 = vmatmul.lmr.bf16.gmra.16.mxu2  ;;  %v3636_v47 = vadd.f32 %v3635_v54, %v3547_v13  ;;  %v3799_v51 = vadd.f32 %v3798_v5, %v3710_v0 }
 0x655   : > { %v3725_v44 = vadd.f32 %v3724_v12, %v3636_v47  ;;  %v3828_v46 = vpack.c.bf16 %v3799_v51, %v9368_v36 }
 0x657   : > { %v3808_v9 = vpop.f32.mrf.mxu1 }
 0x658   : > { %v3809_v33 = vadd.f32 %v3808_v9, %v3720_v18 }
 0x65a   : > { %v3830_v40 = vpack.c.bf16 %v3809_v33, %v3807_v42 }
 0x65b   : > { %5272 = vmatmul.lmr.bf16.gmra.16.mxu2 }
 0x65f   : > { %v3811_v20 = vpop.f32.mrf.mxu1 }
 0x660   : > { %v3812_v11 = vadd.f32 %v3811_v20, %v3723_v22 }
 0x663   : > { %5273 = vmatmul.lmr.bf16.gmra.16.mxu2 }
 0x667   : > { %v3813_v63 = vpop.f32.mrf.mxu1 }
 0x668   : > { %v3814_v24 = vadd.f32 %v3813_v63, %v3725_v44 }
 0x66a   : > { %v3831_v2 = vpack.c.bf16 %v3814_v24, %v3812_v11 }
 0x66b   : > { %5274 = vmatmul.lmr.bf16.gmra.16.mxu2 }
 0x66c   : > { %3913 = vmatpush.bf16.msra.mxu3 %v3831_v2 }
 0x670   : > { %3914 = vmatpush.bf16.msra.mxu3 %v3830_v40 }
 0x673   : > { %5275 = vmatmul.lmr.bf16.gmra.16.mxu2 }
 0x674   : > { %3915 = vmatpush.bf16.msra.mxu3 %v3829_v8 }
 0x678   : > { %3916 = vmatpush.bf16.msra.mxu3 %v3828_v46 }
 0x67b   : > { %5276 = vmatmul.lmr.bf16.gmra.16.mxu2 }
 0x67c   : > { %3917 = vmatpush.bf16.msra.mxu3 %v3827_v4 }
 0x680   : > { %3918 = vmatpush.bf16.msra.mxu3 %v3826_v10 }
 0x683   : > { %5277 = vmatmul.lmr.bf16.gmra.16.mxu2 }
 0x684   : > { %3919 = vmatpush.bf16.msra.mxu3 %v3825_v56 }
 0x688   : > { %3920 = vmatpush.bf16.msra.mxu3 %v3824_v16 }
 0x68b   : > { %5278 = vmatmul.lmr.bf16.gmra.16.mxu2  ;;  %5294 = vmatmul.lmr.bf16.vlgmr.msra.gmra.16.mxu3 }
 0x693   : > { %5279 = vmatmul.lmr.bf16.gmra.16.mxu2  ;;  %5295 = vmatmul.lmr.bf16.gmra.16.mxu3 }
 0x69b   : > { %5280 = vmatmul.lmr.bf16.gmra.16.mxu2  ;;  %5296 = vmatmul.lmr.bf16.gmra.16.mxu3 }
 0x6a3   : > { %5281 = vmatmul.lmr.bf16.gmra.16.mxu2  ;;  %5297 = vmatmul.lmr.bf16.gmra.16.mxu3 }
 0x6ab   : > { %5298 = vmatmul.lmr.bf16.gmra.16.mxu3 }
 0x6ae   : > { %v9392_v3 = vpop.f32.mrf.mxu2 }
 0x6b3   : > { %5299 = vmatmul.lmr.bf16.gmra.16.mxu3 }
 0x6b6   : > { %v9394_v26 = vpop.f32.mrf.mxu2 }
 0x6bb   : > { %5300 = vmatmul.lmr.bf16.gmra.16.mxu3 }
 0x6be   : > { %v9396_v34 = vpop.f32.mrf.mxu2 }
 0x6c3   : > { %5301 = vmatmul.lmr.bf16.gmra.16.mxu3 }
 0x6c6   : > { %v9398_v16 = vpop.f32.mrf.mxu2 }
 0x6cb   : > { %5302 = vmatmul.lmr.bf16.gmra.16.mxu3 }
 0x6ce   : > { %v9404_v31 = vpop.f32.mrf.mxu2 }
 0x6d3   : > { %5303 = vmatmul.lmr.bf16.gmra.16.mxu3 }
 0x6d6   : > { %v3885_v10 = vpop.f32.mrf.mxu2 }
 0x6db   : > { %5304 = vmatmul.lmr.bf16.gmra.16.mxu3 }
 0x6de   : > { %v3888_v1 = vpop.f32.mrf.mxu2 }
 0x6e3   : > { %5305 = vmatmul.lmr.bf16.gmra.16.mxu3 }
 0x6e6   : > { %v9412_v60 = vpop.f32.mrf.mxu2 }
 0x6eb   : > { %5306 = vmatmul.lmr.bf16.gmra.16.mxu3 }
 0x6ee   : > { %v3893_v32 = vpop.f32.mrf.mxu2 }
 0x6f3   : > { %5307 = vmatmul.lmr.bf16.gmra.16.mxu3 }
 0x6f6   : > { %v3895_v30 = vpop.f32.mrf.mxu2 }
 0x6fb   : > { %5308 = vmatmul.lmr.bf16.gmra.16.mxu3 }
 0x6fe   : > { %v3898_v29 = vpop.f32.mrf.mxu2 }
 0x703   : > { %5309 = vmatmul.lmr.bf16.gmra.16.mxu3 }
 0x706   : > { %v3900_v53 = vpop.f32.mrf.mxu2 }
 0x70e   : > { %v9400_v23 = vpop.f32.mrf.mxu3  ;;  %v3903_v55 = vpop.f32.mrf.mxu2 }
 0x716   : > { %v9402_v56 = vpop.f32.mrf.mxu3  ;;  %v3905_v57 = vpop.f32.mrf.mxu2 }
 0x71e   : > { %v9406_v37 = vpop.f32.mrf.mxu3  ;;  %v3908_v45 = vpop.f32.mrf.mxu2 }
 0x71f   : > { %v9446_v41 = vadd.f32 %v9406_v37, %v9396_v34 }
 0x721   : > { %v3964_v51 = vmax.f32 %v9446_v41, 1.0 }
 0x726   : > { %v9408_v28 = vpop.f32.mrf.mxu3  ;;  %v3910_v11 = vpop.f32.mrf.mxu2 }
 0x72e   : > { %v9410_v7 = vpop.f32.mrf.mxu3 }
 0x736   : > { %v3934_v4 = vpop.f32.mrf.mxu3 }
 0x737   : > { %v9433_v18 = vadd.f32 %v3934_v4, %v3885_v10  ;;  %v9453_v10 = vadd.f32 %v9408_v28, %v9398_v16  ;;  %v9463_v16 = vadd.f32 %v9400_v23, %v9392_v3  ;;  %v9467_v28 = vadd.f32 %v9410_v7, %v9404_v31 }
 0x738   : > { %v9473_v3 = vadd.f32 %v9402_v56, %v9394_v26 }
 0x739   : > { %v3967_v2 = vmax.f32 %v9433_v18, 1.0  ;;  %v3965_v37 = vmax.f32 %v9453_v10, 1.0 }
 0x73a   : > { %v3963_v23 = vmax.f32 %v9473_v3, 1.0 }
 0x73e   : > { %v3937_v36 = vpop.f32.mrf.mxu3 }
 0x73f   : > { %v9440_v42 = vadd.f32 %v3937_v36, %v3888_v1 }
 0x741   : > { %v3968_v40 = vmax.f32 %v9440_v42, 1.0 }
 0x746   : > { %v9414_v5 = vpop.f32.mrf.mxu3 }
 0x747   : > { %v9457_v34 = vadd.f32 %v9414_v5, %v9412_v60  ;;  %v3962_v60 = vmax.f32 %v9463_v16, 1.0  ;;  %v3966_v5 = vmax.f32 %v9467_v28, 1.0 }
 0x749   : > { %v3969_v1 = vmax.f32 %v9457_v34, 1.0 }
 0x74e   : > { %v3942_v35 = vpop.f32.mrf.mxu3 }
 0x74f   : > { %v9425_v12 = vadd.f32 %v3942_v35, %v3893_v32 }
 0x751   : > { %v3970_v52 = vmax.f32 %v9425_v12, 1.0 }
 0x756   : > { %v3944_v6 = vpop.f32.mrf.mxu3 }
 0x757   : > { %v9431_v43 = vadd.f32 %v3944_v6, %v3895_v30 }
 0x759   : > { %v3971_v24 = vmax.f32 %v9431_v43, 1.0 }
 0x75e   : > { %v3947_v14 = vpop.f32.mrf.mxu3 }
 0x75f   : > { %v9442_v58 = vadd.f32 %v3947_v14, %v3898_v29 }
 0x761   : > { %v3972_v0 = vmax.f32 %v9442_v58, 1.0 }
 0x766   : > { %v3949_v9 = vpop.f32.mrf.mxu3 }
 0x767   : > { %v9416_v38 = vadd.f32 %v3949_v9, %v3900_v53  ;;  %v10562_v9 = vmov 0.0  }
 0x768   : > { %v9478_v26 = vsel %vm3994_vm12, 1.0, %v10562_v9 }
 0x769   : > { %v3973_v19 = vmax.f32 %v9416_v38, 1.0 }
 0x76b   : > { %5648 = vrcp.f32 %v3973_v19 }
 0x76e   : > { %v3952_v13 = vpop.f32.mrf.mxu3 }
 0x76f   : > { %v9419_v20 = vadd.f32 %v3952_v13, %v3903_v55 }
 0x771   : > { %v5649_v54 = vpop.eup %5648  ;;  %v3974_v21 = vmax.f32 %v9419_v20, 1.0  ;;  %v4009_v17 = vmul.f32 %v9478_v26, %v9419_v20  ;;  %v4007_v20 = vmul.f32 %v9478_v26, %v9442_v58 }
 0x772   : > { %4070 = vperm.xlu2 %5644, %v5649_v54  }
 0x773   : > { %5650 = vrcp.f32 %v3974_v21 }
 0x776   : > { %v3954_v62 = vpop.f32.mrf.mxu3 }
 0x777   : > { %v9422_v47 = vadd.f32 %v3954_v62, %v3905_v57 }
 0x779   : > { %v5651_v59 = vpop.eup %5650  ;;  %v3975_v50 = vmax.f32 %v9422_v47, 1.0  ;;  %v4010_v57 = vmul.f32 %v9478_v26, %v9422_v47 }
 0x77a   : > { %4075 = vperm.xlu1 %5645, %v5651_v59   ;;  %v5744_v59 = vld [vmem:[%s6371_s27 + $0x78] sm:$0xff] }
 0x77b   : > { %5652 = vrcp.f32 %v3975_v50 }
 0x77c   : > { %5654 = vrcp.f32 %v3970_v52  ;;  %v4008_v52 = vmul.f32 %v9478_v26, %v9416_v38 }
 0x77e   : > { %v3957_v22 = vpop.f32.mrf.mxu3 }
 0x77f   : > { %v9428_v44 = vadd.f32 %v3957_v22, %v3908_v45 }
 0x781   : > { %v5653_v49 = vpop.eup %5652  ;;  %v3976_v63 = vmax.f32 %v9428_v44, 1.0  ;;  %v4011_v56 = vmul.f32 %v9478_v26, %v9428_v44  ;;  %v5745_v44 = vld [vmem:[%s6371_s27 + $0x70] sm:$0xff] }
 0x782   : > { %4080 = vperm.xlu2 %5644, %v5653_v49   ;;  %v5655_v33 = vpop.eup %5654 }
 0x783   : > { %5656 = vrcp.f32 %v3976_v63  ;;  %v5746_v63 = vld [vmem:[%s6371_s27 + $0x68] sm:$0xff] }
 0x784   : > { %5658 = vrcp.f32 %v3971_v24 }
 0x786   : > { %v3959_v27 = vpop.f32.mrf.mxu3 }
 0x787   : > { %v9436_v15 = vadd.f32 %v3959_v27, %v3910_v11  ;;  %v5747_v27 = vld [vmem:[%s6371_s27 + $0x60] sm:$0xff] }
 0x789   : > { %v5657_v39 = vpop.eup %5656  ;;  %v3977_v48 = vmax.f32 %v9436_v15, 1.0  ;;  %v4012_v55 = vmul.f32 %v9478_v26, %v9436_v15  ;;  %v4006_v15 = vmul.f32 %v9478_v26, %v9431_v43 }
 0x78a   : > { %4085 = vperm.xlu1 %5645, %v5657_v39   ;;  %4055 = vperm.xlu2 %5644, %v5655_v33   ;;  %v5659_v61 = vpop.eup %5658  ;;  %v5748_v39 = vld [vmem:[%s6371_s27 + $0x58] sm:$0xff] }
 0x78b   : > { %5660 = vrcp.f32 %v3977_v48 }
 0x78c   : > { %5662 = vrcp.f32 %v3967_v2 }
 0x78d   : > { %5664 = vrcp.f32 %v3968_v40  ;;  %v4005_v40 = vmul.f32 %v9478_v26, %v9425_v12  ;;  %v4004_v12 = vmul.f32 %v9478_v26, %v9457_v34  ;;  %v5753_v34 = vld [vmem:[%s6371_s27 + $0x30] sm:$0xff] }
 0x78e   : > { %5666 = vrcp.f32 %v3972_v0 }
 0x78f   : > { %5668 = vrcp.f32 %v3964_v51 }
 0x790   : > { %5670 = vrcp.f32 %v3965_v37  ;;  %v4003_v37 = vmul.f32 %v9478_v26, %v9440_v42 }
 0x791   : > { %v5661_v8 = vpop.eup %5660  ;;  %5672 = vrcp.f32 %v3969_v1 }
 0x792   : > { %v5663_v46 = vpop.eup %5662  ;;  %4090 = vperm.xlu0 %5646, %v5661_v8   ;;  %4060 = vperm.xlu1 %5645, %v5659_v61   ;;  %5674 = vrcp.f32 %v3962_v60  ;;  %v5749_v61 = vld [vmem:[%s6371_s27 + $0x50] sm:$0xff]  ;;  %v5750_v8 = vld [vmem:[%s6371_s27 + $0x48] sm:$0xff] }
 0x793   : > { %4040 = vperm.xlu2 %5644, %v5663_v46   ;;  %v5665_v4 = vpop.eup %5664  ;;  %5676 = vrcp.f32 %v3966_v5 }
 0x794   : > { %v5667_v36 = vpop.eup %5666  ;;  %5678 = vrcp.f32 %v3963_v23 }
 0x795   : > { %v5669_v32 = vpop.eup %5668 }
 0x796   : > { %v5671_v30 = vpop.eup %5670 }
 0x797   : > { %v5673_v35 = vpop.eup %5672 }
 0x798   : > { %v5675_v31 = vpop.eup %5674 }
 0x799   : > { %v5677_v7 = vpop.eup %5676 }
 0x79a   : > { %4065 = vperm.xlu0 %5646, %v5667_v36   ;;  %4045 = vperm.xlu1 %5645, %v5665_v4   ;;  %v5679_v29 = vpop.eup %5678  ;;  %v5751_v4 = vld [vmem:[%s6371_s27 + $0x40] sm:$0xff] }
 0x79b   : > { %4025 = vperm.xlu2 %5644, %v5669_v32   ;;  %v4002_v32 = vmul.f32 %v9478_v26, %v9433_v18 }
 0x7a2   : > { %4050 = vperm.xlu0 %5646, %v5673_v35   ;;  %4030 = vperm.xlu1 %5645, %v5671_v30   ;;  %v5752_v35 = vld [vmem:[%s6371_s27 + $0x38] sm:$0xff] }
 0x7aa   : > { %4035 = vperm.xlu0 %5646, %v5677_v7   ;;  %4015 = vperm.xlu1 %5645, %v5675_v31   ;;  %v5754_v7 = vld [vmem:[%s6371_s27 + $0x28] sm:$0xff] }
 0x7b2   : > { %4020 = vperm.xlu0 %5646, %v5679_v29   ;;  %v4000_v29 = vmul.f32 %v9478_v26, %v9453_v10  ;;  %v5756_v10 = vld [vmem:[%s6371_s27 + $0x18] sm:$0xff] }
 0x7cc   : > { %v4071_v6 = vpop.permute.xlu2 %4070 }
 0x7cd   : > { %v4104_v47 = vmul.f32 %v4071_v6, %v4008_v52  ;;  %v5758_v52 = vld [vmem:[%s6371_s27 + $0x8] sm:$0xff] }
 0x7cf   : > { %v9510_v48 = vadd.f32 %v5748_v39, %v4104_v47  ;;  %v9606_v39 = vld [vmem:[#allocation16 + $0x50] sm:$0xff] }
 0x7dc   : > { %v4081_v14 = vpop.permute.xlu2 %4080 }
 0x7dd   : > { %v4106_v62 = vmul.f32 %v4081_v14, %v4010_v57  ;;  %v3999_v14 = vmul.f32 %v9478_v26, %v9446_v41  ;;  %v3997_v41 = vmul.f32 %v9478_v26, %v9463_v16  ;;  %v9579_v16 = vld [vmem:[#allocation16 + $0x8] sm:$0xff] }
 0x7df   : > { %v9498_v11 = vadd.f32 %v5746_v63, %v4106_v62  ;;  %v3998_v62 = vmul.f32 %v9478_v26, %v9473_v3  ;;  %v9575_v63 = vld [vmem:[#allocation16] sm:$0xff]  ;;  %v9582_v3 = vld [vmem:[#allocation16 + $0x10] sm:$0xff] }
 0x7e4   : > { %v4056_v45 = vpop.permute.xlu2 %4055 }
 0x7e5   : > { %v4101_v0 = vmul.f32 %v4056_v45, %v4005_v40  ;;  %v9609_v40 = vld [vmem:[#allocation16 + $0x58] sm:$0xff] }
 0x7e7   : > { %v9528_v36 = vadd.f32 %v5751_v4, %v4101_v0  ;;  %v9615_v0 = vld [vmem:[#allocation16 + $0x68] sm:$0xff] }
 0x7ec   : > { %v4076_v25 = vpop.permute.xlu1 %4075 }
 0x7ed   : > { %v4105_v22 = vmul.f32 %v4076_v25, %v4009_v17  ;;  %v4041_v43 = vpop.permute.xlu2 %4040  ;;  %v4001_v25 = vmul.f32 %v9478_v26, %v9467_v28  ;;  %v9585_v26 = vld [vmem:[#allocation16 + $0x18] sm:$0xff] }
 0x7ee   : > { %v4098_v30 = vmul.f32 %v4041_v43, %v4002_v32  ;;  %v9621_v43 = vld [vmem:[#allocation16 + $0x78] sm:$0xff] }
 0x7ef   : > { %v9504_v38 = vadd.f32 %v5747_v27, %v4105_v22  ;;  %v9594_v27 = vld [vmem:[#allocation16 + $0x30] sm:$0xff] }
 0x7f0   : > { %v9542_v18 = vadd.f32 %v5754_v7, %v4098_v30 }
 0x7f5   : > { %v4026_v6 = vpop.permute.xlu2 %4025 }
 0x7fc   : > { %v4086_v53 = vpop.permute.xlu1 %4085 }
 0x7fd   : > { %v4107_v54 = vmul.f32 %v4086_v53, %v4011_v56 }
 0x7ff   : > { %v9494_v49 = vadd.f32 %v5745_v44, %v4107_v54  ;;  %v5757_v54 = vld [vmem:[%s6371_s27 + $0x10] sm:$0xff]  ;;  %v5759_v44 = vld [vmem:[%s6371_s27] sm:$0xff] }
 0x804   : > { %v4091_v19 = vpop.permute.xlu0 %4090  ;;  %v4061_v13 = vpop.permute.xlu1 %4060 }
 0x805   : > { %v4108_v21 = vmul.f32 %v4091_v19, %v4012_v55  ;;  %v4102_v58 = vmul.f32 %v4061_v13, %v4006_v15  ;;  %v4095_v55 = vmul.f32 %v4026_v6, %v3999_v14  ;;  %v5755_v19 = vld [vmem:[%s6371_s27 + $0x20] sm:$0xff]  ;;  %s6050_s27 = scalar_lea.hbm %s9795_s10, 256 }
 0x806   : > { %v9597_v15 = vld [vmem:[#allocation16 + $0x38] sm:$0xff]  ;;  %p6052_p9 = scmp.lt.s32.totalorder %s6050_s27, %s6046_s28 }
 0x807   : > { %v9489_v50 = vadd.f32 %v5744_v59, %v4108_v21  ;;  %v9520_v46 = vadd.f32 %v5750_v8, %v4102_v58  ;;  %v9560_v21 = vadd.f32 %v5757_v54, %v4095_v55  ;;  %v9612_v58 = vld [vmem:[#allocation16 + $0x60] sm:$0xff] }
 0x808   : > { %p6053_p5 = por %p6052_p9, %p6051_p7 }
 0x809   : > { %4141 = vmatpush.msra.mxu2 %v9489_v50 }
 0x80a   : > { %p6054_p8 = pnand %p6053_p5, %p6049_p13 }
 0x80b   : > { %4142 = vmatpush.msra.mxu2 %v9494_v49 }
 0x80c   : > { %v4066_v24 = vpop.permute.xlu0 %4065  ;;  %v4046_v2 = vpop.permute.xlu1 %4045 }
 0x80d   : > { %v4103_v33 = vmul.f32 %v4066_v24, %v4007_v20  ;;  %4143 = vmatpush.msra.mxu2 %v9498_v11  ;;  %v4099_v60 = vmul.f32 %v4046_v2, %v4003_v37  ;;  %v9588_v20 = vld [vmem:[#allocation16 + $0x20] sm:$0xff]  ;;  %v9591_v24 = vld [vmem:[#allocation16 + $0x28] sm:$0xff] }
 0x80e   : > { %v9603_v2 = vld [vmem:[#allocation16 + $0x48] sm:$0xff] }
 0x80f   : > { %4144 = vmatpush.msra.mxu2 %v9504_v38  ;;  %v9516_v51 = vadd.f32 %v5749_v61, %v4103_v33  ;;  %v9538_v31 = vadd.f32 %v5753_v34, %v4099_v60  ;;  %v9600_v33 = vld [vmem:[#allocation16 + $0x40] sm:$0xff]  ;;  %v9618_v61 = vld [vmem:[#allocation16 + $0x70] sm:$0xff] }
 0x811   : > { %4145 = vmatpush.msra.mxu2 %v9510_v48 }
 0x813   : > { %4146 = vmatpush.msra.mxu2 %v9516_v51 }
 0x814   : > { %v4051_v1 = vpop.permute.xlu0 %4050  ;;  %v4031_v23 = vpop.permute.xlu1 %4030 }
 0x815   : > { %v4100_v5 = vmul.f32 %v4051_v1, %v4004_v12  ;;  %4147 = vmatpush.msra.mxu2 %v9520_v46  ;;  %v4096_v9 = vmul.f32 %v4031_v23, %v4000_v29 }
 0x817   : > { %v9534_v42 = vadd.f32 %v5752_v35, %v4100_v5  ;;  %4148 = vmatpush.msra.mxu2 %v9528_v36  ;;  %v9556_v57 = vadd.f32 %v5756_v10, %v4096_v9 }
 0x819   : > { %4149 = vmatpush.msra.mxu2 %v9534_v42 }
 0x81b   : > { %4150 = vmatpush.msra.mxu2 %v9538_v31 }
 0x81c   : > { %v4036_v53 = vpop.permute.xlu0 %4035  ;;  %v4016_v28 = vpop.permute.xlu1 %4015 }
 0x81d   : > { %v4097_v56 = vmul.f32 %v4036_v53, %v4001_v25  ;;  %4151 = vmatpush.msra.mxu2 %v9542_v18  ;;  %v4093_v59 = vmul.f32 %v4016_v28, %v3997_v41 }
 0x81f   : > { %v9553_v13 = vadd.f32 %v5755_v19, %v4097_v56  ;;  %v9572_v47 = vadd.f32 %v5759_v44, %v4093_v59 }
 0x821   : > { %4152 = vmatpush.msra.mxu2 %v9553_v13 }
 0x823   : > { %4153 = vmatpush.msra.mxu2 %v9556_v57 }
 0x824   : > { %v4021_v17 = vpop.permute.xlu0 %4020 }
 0x825   : > { %v4094_v45 = vmul.f32 %v4021_v17, %v3998_v62  ;;  %4154 = vmatpush.msra.mxu2 %v9560_v21 }
 0x827   : > { %v9569_v22 = vadd.f32 %v5758_v52, %v4094_v45 }
 0x829   : > { %4155 = vmatpush.msra.mxu2 %v9569_v22 }
 0x82b   : > { %4156 = vmatpush.msra.mxu2 %v9572_v47 }
 0x82c   : > { %4157 = vmatmul.f32.vlgmr.msra.gmra.mxu2 %v9575_v63 }
 0x834   : > { %4160 = vmatmul.f32.gmra.mxu2 %v9579_v16 }
 0x83c   : > { %4163 = vmatmul.f32.gmra.mxu2 %v9582_v3 }
 0x844   : > { %4166 = vmatmul.f32.gmra.mxu2 %v9585_v26 }
 0x84c   : > { %4169 = vmatmul.f32.gmra.mxu2 %v9588_v20 }
 0x854   : > { %4172 = vmatmul.f32.gmra.mxu2 %v9591_v24 }
 0x85c   : > { %4175 = vmatmul.f32.gmra.mxu2 %v9594_v27 }
 0x864   : > { %4178 = vmatmul.f32.gmra.mxu2 %v9597_v15 }
 0x86c   : > { %4181 = vmatmul.f32.gmra.mxu2 %v9600_v33 }
 0x874   : > { %4184 = vmatmul.f32.gmra.mxu2 %v9603_v2 }
 0x87c   : > { %4187 = vmatmul.f32.gmra.mxu2 %v9606_v39 }
 0x884   : > { %4190 = vmatmul.f32.gmra.mxu2 %v9609_v40 }
 0x88c   : > { %4193 = vmatmul.f32.gmra.mxu2 %v9612_v58 }
 0x894   : > { %4196 = vmatmul.f32.gmra.mxu2 %v9615_v0 }
 0x89c   : > { %4199 = vmatmul.f32.gmra.mxu2 %v9618_v61 }
 0x8a4   : > { %4202 = vmatmul.f32.gmra.mxu2 %v9621_v43 }
 0x8af   : > { %v4158_v8 = vpop.f32.mrf.mxu2 }
 0x8b7   : > { %v4161_v37 = vpop.f32.mrf.mxu2 }
 0x8bf   : > { %v4164_v12 = vpop.f32.mrf.mxu2 }
 0x8c7   : > { %v4167_v1 = vpop.f32.mrf.mxu2 }
 0x8cf   : > { %v4170_v4 = vpop.f32.mrf.mxu2 }
 0x8d7   : > { %v4173_v32 = vpop.f32.mrf.mxu2 }
 0x8df   : > { %v4176_v60 = vpop.f32.mrf.mxu2 }
 0x8e7   : > { %v4179_v5 = vpop.f32.mrf.mxu2 }
 0x8ef   : > { %v4182_v30 = vpop.f32.mrf.mxu2 }
 0x8f7   : > { %v4185_v35 = vpop.f32.mrf.mxu2 }
 0x8ff   : > { %v4188_v23 = vpop.f32.mrf.mxu2 }
 0x907   : > { %v4191_v34 = vpop.f32.mrf.mxu2 }
 0x908   : > { %v9641_v10 = vsub.f32 %v9510_v48, %v4191_v34  ;;  %v9656_v48 = vsub.f32 %v9528_v36, %v4182_v30  ;;  %v9671_v36 = vsub.f32 %v9542_v18, %v4173_v32  ;;  %v9686_v18 = vsub.f32 %v9560_v21, %v4164_v12 }
 0x90a   : > { %v4233_v28 = vmul.f32 %v9641_v10, %v9641_v10  ;;  %v4230_v62 = vmul.f32 %v9656_v48, %v9656_v48  ;;  %v4227_v45 = vmul.f32 %v9671_v36, %v9671_v36 }
 0x90f   : > { %v4194_v7 = vpop.f32.mrf.mxu2 }
 0x910   : > { %v9636_v55 = vsub.f32 %v9504_v38, %v4194_v7  ;;  %v9651_v38 = vsub.f32 %v9520_v46, %v4185_v35  ;;  %v9666_v46 = vsub.f32 %v9538_v31, %v4176_v60  ;;  %v9681_v31 = vsub.f32 %v9556_v57, %v4167_v1 }
 0x911   : > { %v4206_v57 = vsub.f32 %v9572_v47, %v4158_v8  ;;  %v4224_v1 = vmul.f32 %v9686_v18, %v9686_v18 }
 0x912   : > { %v4231_v41 = vmul.f32 %v9651_v38, %v9651_v38  ;;  %v4228_v59 = vmul.f32 %v9666_v46, %v9666_v46  ;;  %v4225_v44 = vmul.f32 %v9681_v31, %v9681_v31 }
 0x913   : > { %v4222_v12 = vmul.f32 %v4206_v57, %v4206_v57 }
 0x917   : > { %v4197_v29 = vpop.f32.mrf.mxu2 }
 0x918   : > { %v9631_v9 = vsub.f32 %v9498_v11, %v4197_v29  ;;  %v4234_v11 = vmul.f32 %v9636_v55, %v9636_v55 }
 0x91f   : > { %v4200_v25 = vpop.f32.mrf.mxu2 }
 0x920   : > { %v9625_v53 = vsub.f32 %v9494_v49, %v4200_v25  ;;  %v9646_v49 = vsub.f32 %v9516_v51, %v4188_v23  ;;  %v9661_v51 = vsub.f32 %v9534_v42, %v4179_v5  ;;  %v9676_v42 = vsub.f32 %v9553_v13, %v4170_v4 }
 0x921   : > { %v9691_v13 = vsub.f32 %v9569_v22, %v4161_v37 }
 0x922   : > { %v4236_v19 = vmul.f32 %v9625_v53, %v9625_v53  ;;  %v4232_v54 = vmul.f32 %v9646_v49, %v9646_v49  ;;  %v4229_v17 = vmul.f32 %v9661_v51, %v9661_v51  ;;  %v4226_v52 = vmul.f32 %v9676_v42, %v9676_v42 }
 0x923   : > { %v4223_v21 = vmul.f32 %v9691_v13, %v9691_v13 }
 0x927   : > { %v4203_v6 = vpop.f32.mrf.mxu2 }
 0x928   : > { %v9628_v14 = vsub.f32 %v9489_v50, %v4203_v6  ;;  %v4235_v50 = vmul.f32 %v9631_v9, %v9631_v9 }
 0x92a   : > { %v4237_v56 = vmul.f32 %v9628_v14, %v9628_v14 }
 0x92c   : > { %4238 = vmatpush.msra.mxu3 %v4237_v56 }
 0x92e   : > { %4239 = vmatpush.msra.mxu3 %v4236_v19 }
 0x930   : > { %4240 = vmatpush.msra.mxu3 %v4235_v50 }
 0x932   : > { %4241 = vmatpush.msra.mxu3 %v4234_v11 }
 0x934   : > { %4242 = vmatpush.msra.mxu3 %v4233_v28 }
 0x936   : > { %4243 = vmatpush.msra.mxu3 %v4232_v54 }
 0x938   : > { %4244 = vmatpush.msra.mxu3 %v4231_v41 }
 0x93a   : > { %4245 = vmatpush.msra.mxu3 %v4230_v62 }
 0x93c   : > { %4246 = vmatpush.msra.mxu3 %v4229_v17 }
 0x93e   : > { %4247 = vmatpush.msra.mxu3 %v4228_v59 }
 0x940   : > { %4248 = vmatpush.msra.mxu3 %v4227_v45 }
 0x942   : > { %4249 = vmatpush.msra.mxu3 %v4226_v52 }
 0x944   : > { %4250 = vmatpush.msra.mxu3 %v4225_v44 }
 0x946   : > { %4251 = vmatpush.msra.mxu3 %v4224_v1 }
 0x948   : > { %4252 = vmatpush.msra.mxu3 %v4223_v21 }
 0x94a   : > { %4253 = vmatpush.msra.mxu3 %v4222_v12 }
 0x94b   : > { %4254 = vmatmul.f32.vlgmr.msra.gmra.mxu3 %v9575_v63 }
 0x953   : > { %4257 = vmatmul.f32.gmra.mxu3 %v9579_v16 }
 0x95b   : > { %4260 = vmatmul.f32.gmra.mxu3 %v9582_v3 }
 0x963   : > { %4263 = vmatmul.f32.gmra.mxu3 %v9585_v26 }
 0x96b   : > { %4266 = vmatmul.f32.gmra.mxu3 %v9588_v20 }
 0x973   : > { %4269 = vmatmul.f32.gmra.mxu3 %v9591_v24 }
 0x97b   : > { %4272 = vmatmul.f32.gmra.mxu3 %v9594_v27 }
 0x983   : > { %4275 = vmatmul.f32.gmra.mxu3 %v9597_v15 }
 0x98b   : > { %4278 = vmatmul.f32.gmra.mxu3 %v9600_v33 }
 0x993   : > { %4281 = vmatmul.f32.gmra.mxu3 %v9603_v2 }
 0x99b   : > { %4284 = vmatmul.f32.gmra.mxu3 %v9606_v39 }
 0x9a3   : > { %4287 = vmatmul.f32.gmra.mxu3 %v9609_v40 }
 0x9ab   : > { %4290 = vmatmul.f32.gmra.mxu3 %v9612_v58 }
 0x9b3   : > { %4293 = vmatmul.f32.gmra.mxu3 %v9615_v0 }
 0x9bb   : > { %4296 = vmatmul.f32.gmra.mxu3 %v9618_v61 }
 0x9c3   : > { %4299 = vmatmul.f32.gmra.mxu3 %v9621_v43 }
 0x9ce   : > { %v4255_v22 = vpop.f32.mrf.mxu3 }
 0x9cf   : > { %v4256_v47 = vadd.f32 1e-05, %v4255_v22 }
 0x9d1   : > { %5680 = vrsqrt.f32 %v4256_v47  ;;  %vm4309_vm14 = vweird.f32 %v4256_v47 }
 0x9d6   : > { %v4258_v63 = vpop.f32.mrf.mxu3 }
 0x9d7   : > { %v5681_v16 = vpop.eup %5680  ;;  %v4259_v3 = vadd.f32 1e-05, %v4258_v63 }
 0x9d8   : > { %v4304_v26 = vmul.f32 %v5681_v16, %v4256_v47  ;;  %vm4310_vm13 = vweird.f32 %v5681_v16 }
 0x9d9   : > { %5682 = vrsqrt.f32 %v4259_v3  ;;  %vm4311_vm15 = vmor %vm4309_vm14, %vm4310_vm13  ;;  %vm4319_vm2 = vweird.f32 %v4259_v3 }
 0x9da   : > { %v4305_v20 = vmul.f32 %v5681_v16, %v4304_v26 }
 0x9dc   : > { %v4306_v24 = vmul.f32 0.5, %v4305_v20 }
 0x9de   : > { %v4307_v27 = vsub.f32 1.5, %v4306_v24  ;;  %v4261_v15 = vpop.f32.mrf.mxu3 }
 0x9df   : > { %v5683_v33 = vpop.eup %5682  ;;  %v4262_v2 = vadd.f32 1e-05, %v4261_v15 }
 0x9e0   : > { %v4308_v39 = vmul.f32 %v5681_v16, %v4307_v27  ;;  %v4314_v40 = vmul.f32 %v5683_v33, %v4259_v3  ;;  %vm4320_vm11 = vweird.f32 %v5683_v33 }
 0x9e1   : > { %5684 = vrsqrt.f32 %v4262_v2  ;;  %vm4321_vm3 = vmor %vm4319_vm2, %vm4320_vm11  ;;  %vm4329_vm0 = vweird.f32 %v4262_v2 }
 0x9e2   : > { %v4312_v58 = vsel %vm4311_vm15, %v5681_v16, %v4308_v39  ;;  %v4315_v0 = vmul.f32 %v5683_v33, %v4314_v40 }
 0x9e3   : > { %v4463_v61 = vmul.f32 %v4312_v58, %v4206_v57 }
 0x9e4   : > { %v4316_v43 = vmul.f32 0.5, %v4315_v0 }
 0x9e5   : > { %4479 = vst [vmem:[%s9718_s9] sm:$0xff] %v4463_v61 }
 0x9e6   : > { %v4317_v8 = vsub.f32 1.5, %v4316_v43  ;;  %v4264_v37 = vpop.f32.mrf.mxu3 }
 0x9e7   : > { %v5685_v4 = vpop.eup %5684  ;;  %v4265_v32 = vadd.f32 1e-05, %v4264_v37 }
 0x9e8   : > { %v4318_v60 = vmul.f32 %v5683_v33, %v4317_v8  ;;  %v4324_v5 = vmul.f32 %v5685_v4, %v4262_v2  ;;  %vm4330_vm4 = vweird.f32 %v5685_v4 }
 0x9e9   : > { %5686 = vrsqrt.f32 %v4265_v32  ;;  %vm4331_vm5 = vmor %vm4329_vm0, %vm4330_vm4  ;;  %vm4339_vm7 = vweird.f32 %v4265_v32 }
 0x9ea   : > { %v4322_v30 = vsel %vm4321_vm3, %v5683_v33, %v4318_v60  ;;  %v4325_v35 = vmul.f32 %v5685_v4, %v4324_v5 }
 0x9eb   : > { %v4464_v23 = vmul.f32 %v4322_v30, %v9691_v13 }
 0x9ec   : > { %v4326_v34 = vmul.f32 0.5, %v4325_v35 }
 0x9ed   : > { %4480 = vst [vmem:[%s9718_s9 + $0x8] sm:$0xff] %v4464_v23 }
 0x9ee   : > { %v4327_v7 = vsub.f32 1.5, %v4326_v34  ;;  %v4267_v29 = vpop.f32.mrf.mxu3 }
 0x9ef   : > { %v5687_v25 = vpop.eup %5686  ;;  %v4268_v6 = vadd.f32 1e-05, %v4267_v29 }
 0x9f0   : > { %v4328_v56 = vmul.f32 %v5685_v4, %v4327_v7  ;;  %v4334_v19 = vmul.f32 %v5687_v25, %v4265_v32  ;;  %vm4340_vm6 = vweird.f32 %v5687_v25 }
 0x9f1   : > { %5688 = vrsqrt.f32 %v4268_v6  ;;  %vm4341_vm8 = vmor %vm4339_vm7, %vm4340_vm6  ;;  %vm4349_vm10 = vweird.f32 %v4268_v6 }
 0x9f2   : > { %v4332_v50 = vsel %vm4331_vm5, %v5685_v4, %v4328_v56  ;;  %v4335_v11 = vmul.f32 %v5687_v25, %v4334_v19 }
 0x9f3   : > { %v4465_v28 = vmul.f32 %v4332_v50, %v9686_v18 }
 0x9f4   : > { %v4336_v54 = vmul.f32 0.5, %v4335_v11 }
 0x9f5   : > { %4481 = vst [vmem:[%s9718_s9 + $0x10] sm:$0xff] %v4465_v28 }
 0x9f6   : > { %v4337_v41 = vsub.f32 1.5, %v4336_v54  ;;  %v4270_v62 = vpop.f32.mrf.mxu3 }
 0x9f7   : > { %v5689_v17 = vpop.eup %5688  ;;  %v4271_v59 = vadd.f32 1e-05, %v4270_v62 }
 0x9f8   : > { %v4338_v45 = vmul.f32 %v5687_v25, %v4337_v41  ;;  %v4344_v52 = vmul.f32 %v5689_v17, %v4268_v6  ;;  %vm4350_vm9 = vweird.f32 %v5689_v17 }
 0x9f9   : > { %5690 = vrsqrt.f32 %v4271_v59  ;;  %vm4351_vm1 = vmor %vm4349_vm10, %vm4350_vm9  ;;  %vm4359_vm13 = vweird.f32 %v4271_v59 }
 0x9fa   : > { %v4342_v13 = vsel %vm4341_vm8, %v5687_v25, %v4338_v45  ;;  %v4345_v44 = vmul.f32 %v5689_v17, %v4344_v52 }
 0x9fb   : > { %v4466_v57 = vmul.f32 %v4342_v13, %v9681_v31 }
 0x9fc   : > { %v4346_v1 = vmul.f32 0.5, %v4345_v44 }
 0x9fd   : > { %4482 = vst [vmem:[%s9718_s9 + $0x18] sm:$0xff] %v4466_v57 }
 0x9fe   : > { %v4347_v18 = vsub.f32 1.5, %v4346_v1  ;;  %v4273_v21 = vpop.f32.mrf.mxu3 }
 0x9ff   : > { %v5691_v12 = vpop.eup %5690  ;;  %v4274_v22 = vadd.f32 1e-05, %v4273_v21 }
 0xa00   : > { %v4348_v47 = vmul.f32 %v5689_v17, %v4347_v18  ;;  %v4354_v63 = vmul.f32 %v5691_v12, %v4271_v59  ;;  %vm4360_vm12 = vweird.f32 %v5691_v12 }
 0xa01   : > { %5692 = vrsqrt.f32 %v4274_v22  ;;  %vm4361_vm14 = vmor %vm4359_vm13, %vm4360_vm12  ;;  %vm4369_vm11 = vweird.f32 %v4274_v22 }
 0xa02   : > { %v4352_v16 = vsel %vm4351_vm1, %v5689_v17, %v4348_v47  ;;  %v4355_v3 = vmul.f32 %v5691_v12, %v4354_v63 }
 0xa03   : > { %v4467_v26 = vmul.f32 %v4352_v16, %v9676_v42 }
 0xa04   : > { %v4356_v20 = vmul.f32 0.5, %v4355_v3 }
 0xa05   : > { %4483 = vst [vmem:[%s9718_s9 + $0x20] sm:$0xff] %v4467_v26 }
 0xa06   : > { %v4357_v31 = vsub.f32 1.5, %v4356_v20  ;;  %v4276_v24 = vpop.f32.mrf.mxu3 }
 0xa07   : > { %v5693_v27 = vpop.eup %5692  ;;  %v4277_v15 = vadd.f32 1e-05, %v4276_v24 }
 0xa08   : > { %v4358_v33 = vmul.f32 %v5691_v12, %v4357_v31  ;;  %v4364_v2 = vmul.f32 %v5693_v27, %v4274_v22  ;;  %vm4370_vm15 = vweird.f32 %v5693_v27 }
 0xa09   : > { %5694 = vrsqrt.f32 %v4277_v15  ;;  %vm4371_vm2 = vmor %vm4369_vm11, %vm4370_vm15  ;;  %vm4379_vm4 = vweird.f32 %v4277_v15 }
 0xa0a   : > { %v4362_v39 = vsel %vm4361_vm14, %v5691_v12, %v4358_v33  ;;  %v4365_v40 = vmul.f32 %v5693_v27, %v4364_v2 }
 0xa0b   : > { %v4468_v58 = vmul.f32 %v4362_v39, %v9671_v36 }
 0xa0c   : > { %v4366_v0 = vmul.f32 0.5, %v4365_v40 }
 0xa0d   : > { %4484 = vst [vmem:[%s9718_s9 + $0x28] sm:$0xff] %v4468_v58 }
 0xa0e   : > { %v4367_v42 = vsub.f32 1.5, %v4366_v0  ;;  %v4279_v61 = vpop.f32.mrf.mxu3 }
 0xa0f   : > { %v5695_v43 = vpop.eup %5694  ;;  %v4280_v8 = vadd.f32 1e-05, %v4279_v61 }
 0xa10   : > { %v4368_v37 = vmul.f32 %v5693_v27, %v4367_v42  ;;  %v4374_v4 = vmul.f32 %v5695_v43, %v4277_v15  ;;  %vm4380_vm3 = vweird.f32 %v5695_v43 }
 0xa11   : > { %5696 = vrsqrt.f32 %v4280_v8  ;;  %vm4381_vm0 = vmor %vm4379_vm4, %vm4380_vm3  ;;  %vm4389_vm6 = vweird.f32 %v4280_v8 }
 0xa12   : > { %v4372_v32 = vsel %vm4371_vm2, %v5693_v27, %v4368_v37  ;;  %v4375_v60 = vmul.f32 %v5695_v43, %v4374_v4 }
 0xa13   : > { %v4469_v5 = vmul.f32 %v4372_v32, %v9666_v46 }
 0xa14   : > { %v4376_v30 = vmul.f32 0.5, %v4375_v60 }
 0xa15   : > { %4485 = vst [vmem:[%s9718_s9 + $0x30] sm:$0xff] %v4469_v5 }
 0xa16   : > { %v4377_v36 = vsub.f32 1.5, %v4376_v30  ;;  %v4282_v35 = vpop.f32.mrf.mxu3 }
 0xa17   : > { %v5697_v23 = vpop.eup %5696  ;;  %v4283_v34 = vadd.f32 1e-05, %v4282_v35 }
 0xa18   : > { %v4378_v7 = vmul.f32 %v5695_v43, %v4377_v36  ;;  %v4384_v29 = vmul.f32 %v5697_v23, %v4280_v8  ;;  %vm4390_vm5 = vweird.f32 %v5697_v23 }
 0xa19   : > { %5698 = vrsqrt.f32 %v4283_v34  ;;  %vm4391_vm7 = vmor %vm4389_vm6, %vm4390_vm5  ;;  %vm4399_vm9 = vweird.f32 %v4283_v34 }
 0xa1a   : > { %v4382_v25 = vsel %vm4381_vm0, %v5695_v43, %v4378_v7  ;;  %v4385_v6 = vmul.f32 %v5697_v23, %v4384_v29 }
 0xa1b   : > { %v4470_v56 = vmul.f32 %v4382_v25, %v9661_v51 }
 0xa1c   : > { %v4386_v19 = vmul.f32 0.5, %v4385_v6 }
 0xa1d   : > { %4486 = vst [vmem:[%s9718_s9 + $0x38] sm:$0xff] %v4470_v56 }
 0xa1e   : > { %v4387_v46 = vsub.f32 1.5, %v4386_v19  ;;  %v4285_v50 = vpop.f32.mrf.mxu3 }
 0xa1f   : > { %v5699_v11 = vpop.eup %5698  ;;  %v4286_v28 = vadd.f32 1e-05, %v4285_v50 }
 0xa20   : > { %v4388_v54 = vmul.f32 %v5697_v23, %v4387_v46  ;;  %v4394_v41 = vmul.f32 %v5699_v11, %v4283_v34  ;;  %vm4400_vm8 = vweird.f32 %v5699_v11 }
 0xa21   : > { %5700 = vrsqrt.f32 %v4286_v28  ;;  %vm4401_vm10 = vmor %vm4399_vm9, %vm4400_vm8  ;;  %vm4409_vm12 = vweird.f32 %v4286_v28 }
 0xa22   : > { %v4392_v62 = vsel %vm4391_vm7, %v5697_v23, %v4388_v54  ;;  %v4395_v17 = vmul.f32 %v5699_v11, %v4394_v41 }
 0xa23   : > { %v4471_v59 = vmul.f32 %v4392_v62, %v9656_v48 }
 0xa24   : > { %v4396_v45 = vmul.f32 0.5, %v4395_v17 }
 0xa25   : > { %4487 = vst [vmem:[%s9718_s9 + $0x40] sm:$0xff] %v4471_v59 }
 0xa26   : > { %v4397_v51 = vsub.f32 1.5, %v4396_v45  ;;  %v4288_v52 = vpop.f32.mrf.mxu3 }
 0xa27   : > { %v5701_v13 = vpop.eup %5700  ;;  %v4289_v44 = vadd.f32 1e-05, %v4288_v52 }
 0xa28   : > { %v4398_v57 = vmul.f32 %v5699_v11, %v4397_v51  ;;  %v4404_v1 = vmul.f32 %v5701_v13, %v4286_v28  ;;  %vm4410_vm1 = vweird.f32 %v5701_v13 }
 0xa29   : > { %5702 = vrsqrt.f32 %v4289_v44  ;;  %vm4411_vm13 = vmor %vm4409_vm12, %vm4410_vm1  ;;  %vm4419_vm15 = vweird.f32 %v4289_v44 }
 0xa2a   : > { %v4402_v18 = vsel %vm4401_vm10, %v5699_v11, %v4398_v57  ;;  %v4405_v21 = vmul.f32 %v5701_v13, %v4404_v1 }
 0xa2b   : > { %v4472_v12 = vmul.f32 %v4402_v18, %v9651_v38 }
 0xa2c   : > { %v4406_v22 = vmul.f32 0.5, %v4405_v21 }
 0xa2d   : > { %4488 = vst [vmem:[%s9718_s9 + $0x48] sm:$0xff] %v4472_v12 }
 0xa2e   : > { %v4407_v48 = vsub.f32 1.5, %v4406_v22  ;;  %v4291_v47 = vpop.f32.mrf.mxu3 }
 0xa2f   : > { %v5703_v63 = vpop.eup %5702  ;;  %v4292_v16 = vadd.f32 1e-05, %v4291_v47 }
 0xa30   : > { %v4408_v3 = vmul.f32 %v5701_v13, %v4407_v48  ;;  %v4414_v26 = vmul.f32 %v5703_v63, %v4289_v44  ;;  %vm4420_vm14 = vweird.f32 %v5703_v63 }
 0xa31   : > { %5704 = vrsqrt.f32 %v4292_v16  ;;  %vm4421_vm11 = vmor %vm4419_vm15, %vm4420_vm14  ;;  %vm4429_vm3 = vweird.f32 %v4292_v16 }
 0xa32   : > { %v4412_v20 = vsel %vm4411_vm13, %v5701_v13, %v4408_v3  ;;  %v4415_v31 = vmul.f32 %v5703_v63, %v4414_v26 }
 0xa33   : > { %v4473_v24 = vmul.f32 %v4412_v20, %v9646_v49 }
 0xa34   : > { %v4416_v27 = vmul.f32 0.5, %v4415_v31 }
 0xa35   : > { %4489 = vst [vmem:[%s9718_s9 + $0x50] sm:$0xff] %v4473_v24 }
 0xa36   : > { %v4417_v38 = vsub.f32 1.5, %v4416_v27  ;;  %v4294_v15 = vpop.f32.mrf.mxu3 }
 0xa37   : > { %v5705_v33 = vpop.eup %5704  ;;  %v4295_v2 = vadd.f32 1e-05, %v4294_v15 }
 0xa38   : > { %v4418_v39 = vmul.f32 %v5703_v63, %v4417_v38  ;;  %v4424_v40 = vmul.f32 %v5705_v33, %v4292_v16  ;;  %vm4430_vm2 = vweird.f32 %v5705_v33 }
 0xa39   : > { %5706 = vrsqrt.f32 %v4295_v2  ;;  %vm4431_vm4 = vmor %vm4429_vm3, %vm4430_vm2  ;;  %vm4439_vm5 = vweird.f32 %v4295_v2 }
 0xa3a   : > { %v4422_v58 = vsel %vm4421_vm11, %v5703_v63, %v4418_v39  ;;  %v4425_v0 = vmul.f32 %v5705_v33, %v4424_v40 }
 0xa3b   : > { %v4474_v42 = vmul.f32 %v4422_v58, %v9641_v10 }
 0xa3c   : > { %v4426_v61 = vmul.f32 0.5, %v4425_v0 }
 0xa3d   : > { %4490 = vst [vmem:[%s9718_s9 + $0x58] sm:$0xff] %v4474_v42 }
 0xa3e   : > { %v4427_v49 = vsub.f32 1.5, %v4426_v61  ;;  %v4297_v43 = vpop.f32.mrf.mxu3 }
 0xa3f   : > { %v5707_v8 = vpop.eup %5706  ;;  %v4298_v37 = vadd.f32 1e-05, %v4297_v43 }
 0xa40   : > { %v4428_v4 = vmul.f32 %v5705_v33, %v4427_v49  ;;  %v4434_v32 = vmul.f32 %v5707_v8, %v4295_v2  ;;  %vm4440_vm0 = vweird.f32 %v5707_v8 }
 0xa41   : > { %5708 = vrsqrt.f32 %v4298_v37  ;;  %vm4441_vm6 = vmor %vm4439_vm5, %vm4440_vm0  ;;  %vm4449_vm8 = vweird.f32 %v4298_v37 }
 0xa42   : > { %v4432_v60 = vsel %vm4431_vm4, %v5705_v33, %v4428_v4  ;;  %v4435_v5 = vmul.f32 %v5707_v8, %v4434_v32 }
 0xa43   : > { %v4475_v30 = vmul.f32 %v4432_v60, %v9636_v55 }
 0xa44   : > { %v4436_v36 = vmul.f32 0.5, %v4435_v5 }
 0xa45   : > { %4491 = vst [vmem:[%s9718_s9 + $0x60] sm:$0xff] %v4475_v30 }
 0xa46   : > { %v4437_v10 = vsub.f32 1.5, %v4436_v36  ;;  %v4300_v35 = vpop.f32.mrf.mxu3 }
 0xa47   : > { %v5709_v23 = vpop.eup %5708  ;;  %v4301_v34 = vadd.f32 1e-05, %v4300_v35 }
 0xa48   : > { %v4438_v7 = vmul.f32 %v5707_v8, %v4437_v10  ;;  %v4444_v29 = vmul.f32 %v5709_v23, %v4298_v37  ;;  %vm4450_vm7 = vweird.f32 %v5709_v23 }
 0xa49   : > { %5710 = vrsqrt.f32 %v4301_v34  ;;  %vm4451_vm9 = vmor %vm4449_vm8, %vm4450_vm7  ;;  %vm4459_vm1 = vweird.f32 %v4301_v34 }
 0xa4a   : > { %v4442_v25 = vsel %vm4441_vm6, %v5707_v8, %v4438_v7  ;;  %v4445_v6 = vmul.f32 %v5709_v23, %v4444_v29 }
 0xa4b   : > { %v4476_v56 = vmul.f32 %v4442_v25, %v9631_v9 }
 0xa4c   : > { %v4446_v55 = vmul.f32 0.5, %v4445_v6 }
 0xa4d   : > { %4492 = vst [vmem:[%s9718_s9 + $0x68] sm:$0xff] %v4476_v56 }
 0xa4e   : > { %v4447_v19 = vsub.f32 1.5, %v4446_v55 }
 0xa4f   : > { %v5711_v46 = vpop.eup %5710 }
 0xa50   : > { %v4448_v50 = vmul.f32 %v5709_v23, %v4447_v19  ;;  %v4454_v11 = vmul.f32 %v5711_v46, %v4301_v34  ;;  %vm4460_vm10 = vweird.f32 %v5711_v46 }
 0xa51   : > { %vm4461_vm12 = vmor %vm4459_vm1, %vm4460_vm10 }
 0xa52   : > { %v4452_v28 = vsel %vm4451_vm9, %v5709_v23, %v4448_v50  ;;  %v4455_v54 = vmul.f32 %v5711_v46, %v4454_v11 }
 0xa53   : > { %v4477_v41 = vmul.f32 %v4452_v28, %v9625_v53 }
 0xa54   : > { %v4456_v62 = vmul.f32 0.5, %v4455_v54 }
 0xa55   : > { %4493 = vst [vmem:[%s9718_s9 + $0x70] sm:$0xff] %v4477_v41 }
 0xa56   : > { %v4457_v9 = vsub.f32 1.5, %v4456_v62 }
 0xa58   : > { %v4458_v17 = vmul.f32 %v5711_v46, %v4457_v9 }
 0xa5a   : > { %v4462_v59 = vsel %vm4461_vm12, %v5711_v46, %v4458_v17 }
 0xa5b   : > { %v4478_v53 = vmul.f32 %v4462_v59, %v9628_v14 }
 0xa5d   : > { %4494 = vst [vmem:[%s9718_s9 + $0x78] sm:$0xff] %v4478_v53 }
 0xa5e   : > { %6057 = shalt.err (!%p6054_p8)
}
 0xa5f   : > { %s6137_s6 = smov 128   ;;  %s6138_s22 = smov 8  }
 0xa60   : > { %5534 = dma.vmem_to_hbm [thread:$0]  (%p6302_p0), %s4509_s8, 2048, %s4511_s7, %s4496_s20, %s6137_s6, %s6137_s6, %s6138_s22  }
 0xa61 PF: > { %s4525_s3 = sand.u32 1, %s6104_s13   ;;  %p10563_p10 = scmp.ge.s32.totalorder %s6116_s16, 2 }
 0xa62   : > { %s4526_s11 = scalar_lea.sflag [#allocation4], %s4525_s3 }
 0xa63   : > { %p5566_p11 = pnand %p10563_p10, %p6310_p6 }
 0xa65   : > { %p5567_p12 = pneg %p5566_p11 }
 0xa67   : > { %6099 = dma.done.wait (%p5567_p12), %s4526_s11, 2048  }
 0xa68   : > { %6101 = vsyncadd (%p5567_p12), %s4526_s11, 4294965248  ;;  %s10564_s18 = sld [smem:[#allocation25_spill]]  ;;  %p29_p2 = scmp.ge.s32.totalorder %s6278_s24, 4  }
 0xa69   : > { %s10565_s15 = sld [smem:[#allocation26_spill]]  ;;  %s10566_s13 = smov %s6108_s14 }
 0xa6a   : > { %s10568_s16 = smov %s6278_s24  ;;  %31 = sbr.rel (!%p29_p2) target bundleno = 18 (0x12), region = 146 }
 0xa6e   : > { %s10567_s14 = smov %s10564_s18 }
 0xa6f   :  { %4532 = vsyncpa [#allocation3], 1 }
 0xa70   :  { %4534 = vsyncpa [#allocation3 + $0x1], 1 }
 0xa71   :  { %4535 = vsyncpa [#allocation6], 1 }
 0xa72   :  { %4537 = vsyncpa [#allocation6 + $0x1], 1 }
 0xa73   :  { %4538 = vsyncpa [#allocation9], 1 }
 0xa74   :  { %4539 = vsyncpa [#allocation12], 1 }
 0xa75   :  { %4540 = vsyncpa [#allocation15], 1 }
 0xa76   :  { %4541 = vsyncpa [#allocation4], 1 }
 0xa77   :  { %4543 = vsyncpa [#allocation4 + $0x1], 1 }

</bundles_post_ra>
